<compile_context>
chip_gen: v5e
topology: v5e:2x2
jax: 0.10.0
libtpu: 0.0.40
codegen_flags: <defaults>
</compile_context>

<pallas_src>
import functools

import jax
import jax.numpy as jnp
from jax import lax
from jax.experimental import pallas as pl
from jax.experimental.pallas import tpu as pltpu


# ----------------------------------------------------------------------------
# 1-D bilinear interpolation matrix (align_corners=True): (n_out, n_in).
# ----------------------------------------------------------------------------
def _interp_matrix(n_in: int, n_out: int) -> jnp.ndarray:
    if n_in == 1:
        return jnp.ones((n_out, 1), jnp.float32)
    src = jnp.arange(n_out, dtype=jnp.float32) * (n_in - 1) / (n_out - 1)
    lo = jnp.clip(jnp.floor(src).astype(jnp.int32), 0, n_in - 2)
    frac = src - lo.astype(jnp.float32)
    oh_lo = jax.nn.one_hot(lo, n_in, dtype=jnp.float32)
    oh_hi = jax.nn.one_hot(lo + 1, n_in, dtype=jnp.float32)
    return oh_lo * (1.0 - frac)[:, None] + oh_hi * frac[:, None]


# ----------------------------------------------------------------------------
# Fused kernel: upsample x2 -> conv3x3+bias+ReLU -> conv3x3+bias+ReLU.
# One batch element per grid step; all intermediates stay on-chip.
# ----------------------------------------------------------------------------
def _up_doubleconv_kernel(x_ref, kup_ref, w1_ref, b1_ref, w2_ref, b2_ref,
                          o_ref, pad1_ref, pad2_ref, *,
                          H, W, Cin, Cmid, Cout, cdtype):
    H2, W2 = 2 * H, 2 * W

    # ---- bilinear x2 upsample (align_corners=True) as one MXU matmul ------
    # kup = kron(A, B): (H2*W2, H*W);  x_flat: (H*W, Cin)
    x_flat = x_ref[0].reshape(H * W, Cin).astype(cdtype)
    u = jnp.dot(kup_ref[...], x_flat,
                preferred_element_type=jnp.float32)          # (H2*W2, Cin) f32

    def conv3x3_bias_relu(act_flat, pad_ref, w_ref, b_ref, cin, cout):
        # Halo padding (pad=1) built in VMEM scratch: zero buffer, then write
        # the interior.  Scratch is re-zeroed every step (cheap, and safe when
        # the 'parallel' grid axis is split across TensorCores).
        pad_ref[...] = jnp.zeros_like(pad_ref)
        pad_ref[pl.ds(1, H2), pl.ds(1, W2), :] = act_flat.reshape(H2, W2, cin)
        padded = pad_ref[...]                                # (H2+2, W2+2, cin)

        # 3x3 conv as 9 shifted full-size MXU matmuls, f32 accumulation.
        acc = jnp.zeros((H2 * W2, cout), jnp.float32)
        for dy in range(3):
            for dx in range(3):
                patch = padded[dy:dy + H2, dx:dx + W2, :]
                patch = patch.reshape(H2 * W2, cin).astype(cdtype)
                acc = acc + jnp.dot(patch, w_ref[dy * 3 + dx],
                                    preferred_element_type=jnp.float32)
        # BN scale is already folded into the weights; add bias, then ReLU.
        return jnp.maximum(acc + b_ref[...], 0.0)            # (H2*W2, cout)

    z = conv3x3_bias_relu(u, pad1_ref, w1_ref, b1_ref, Cin, Cmid)
    y = conv3x3_bias_relu(z, pad2_ref, w2_ref, b2_ref, Cmid, Cout)

    o_ref[0] = y.reshape(H2, W2, Cout).astype(o_ref.dtype)


@functools.partial(jax.jit, static_argnames=("compute_dtype",))
def up_forward(x, params, compute_dtype=jnp.bfloat16):
    """`Up.forward` (bilinear=True): upsample x2 then DoubleConv. NHWC in/out."""
    n, h, w, cin = x.shape
    h2, w2 = 2 * h, 2 * w
    cmid = params['w1'].shape[-1]
    cout = params['w2'].shape[-1]

    # Upsample operator (grid-invariant constant; DMA'd into VMEM once).
    a = _interp_matrix(h, h2)
    b = _interp_matrix(w, w2)
    kup = jnp.kron(a, b).astype(compute_dtype)               # (h2*w2, h*w)

    # Fold BN scale into the conv weights offline; reshape to (9, Cin, Cout).
    w1 = (params['w1'] * params['s1']).reshape(9, cin, cmid).astype(compute_dtype)
    w2k = (params['w2'] * params['s2']).reshape(9, cmid, cout).astype(compute_dtype)
    b1 = params['b1'].reshape(1, cmid).astype(jnp.float32)
    b2 = params['b2'].reshape(1, cout).astype(jnp.float32)

    kernel = functools.partial(_up_doubleconv_kernel, H=h, W=w, Cin=cin,
                               Cmid=cmid, Cout=cout, cdtype=compute_dtype)

    # NOTE: at real UNet sizes this whole-image-per-step kernel should be
    # spatially row-tiled with halos sized against v7x's 64 MiB VMEM.
    return pl.pallas_call(
        kernel,
        out_shape=jax.ShapeDtypeStruct((n, h2, w2, cout), x.dtype),
        grid=(n,),
        in_specs=[
            pl.BlockSpec((1, h, w, cin), lambda i: (i, 0, 0, 0)),
            pl.BlockSpec((h2 * w2, h * w), lambda i: (0, 0)),
            pl.BlockSpec((9, cin, cmid), lambda i: (0, 0, 0)),
            pl.BlockSpec((1, cmid), lambda i: (0, 0)),
            pl.BlockSpec((9, cmid, cout), lambda i: (0, 0, 0)),
            pl.BlockSpec((1, cout), lambda i: (0, 0)),
        ],
        out_specs=pl.BlockSpec((1, h2, w2, cout), lambda i: (i, 0, 0, 0)),
        scratch_shapes=[
            pltpu.VMEM((h2 + 2, w2 + 2, cin), jnp.float32),   # padded upsample
            pltpu.VMEM((h2 + 2, w2 + 2, cmid), jnp.float32),  # padded conv1 out
        ],
        compiler_params=pltpu.CompilerParams(
            dimension_semantics=("parallel",)),
    )(x, kup, w1, b1, w2k, b2)


# ----------------------------------------------------------------------------
# Parameters (deterministic, synthetic) + folded eval-mode BatchNorm.
# ----------------------------------------------------------------------------
def fold_bn(gamma, beta, mean, var, eps=1e-5):
    scale = gamma / jnp.sqrt(var + eps)
    bias = beta - mean * scale
    return scale, bias


def make_params(key, in_channels, out_channels):
    mid_channels = out_channels  # DoubleConv default: mid = out
    ks = jax.random.split(key, 10)
    w1 = 0.1 * jax.random.normal(ks[0], (3, 3, in_channels, mid_channels), jnp.float32)
    g1 = jax.random.uniform(ks[1], (mid_channels,), jnp.float32, 0.5, 1.5)
    b1 = 0.1 * jax.random.normal(ks[2], (mid_channels,), jnp.float32)
    m1 = 0.1 * jax.random.normal(ks[3], (mid_channels,), jnp.float32)
    v1 = jax.random.uniform(ks[4], (mid_channels,), jnp.float32, 0.5, 1.5)
    w2 = 0.1 * jax.random.normal(ks[5], (3, 3, mid_channels, out_channels), jnp.float32)
    g2 = jax.random.uniform(ks[6], (out_channels,), jnp.float32, 0.5, 1.5)
    b2 = 0.1 * jax.random.normal(ks[7], (out_channels,), jnp.float32)
    m2 = 0.1 * jax.random.normal(ks[8], (out_channels,), jnp.float32)
    v2 = jax.random.uniform(ks[9], (out_channels,), jnp.float32, 0.5, 1.5)
    s1, o1 = fold_bn(g1, b1, m1, v1)
    s2, o2 = fold_bn(g2, b2, m2, v2)
    return dict(w1=w1, s1=s1, b1=o1, w2=w2, s2=s2, b2=o2)


# Pure-JAX reference (same math, XLA ops).
def up_forward_ref(x, params):
    n, h, w, c = x.shape
    a = _interp_matrix(h, 2 * h)
    b = _interp_matrix(w, 2 * w)
    y = jnp.einsum('ih,jw,nhwc->nijc', a, b, x)
    for wk, sk, bk in ((params['w1'], params['s1'], params['b1']),
                       (params['w2'], params['s2'], params['b2'])):
        y = lax.conv_general_dilated(
            y, wk, window_strides=(1, 1), padding='SAME',
            dimension_numbers=('NHWC', 'HWIO', 'NHWC'))
        y = jnp.maximum(y * sk + bk, 0.0)
    return y


if __name__ == "__main__":
    key = jax.random.PRNGKey(0)
    kx, kp = jax.random.split(key)

    N, H, W = 2, 8, 8
    in_channels, out_channels = 8, 4

    # NHWC input (torch equivalent would be NCHW (2, 8, 8, 8) transposed).
    x = jax.random.normal(kx, (N, H, W, in_channels), jnp.float32)
    params = make_params(kp, in_channels, out_channels)

    ref = jax.block_until_ready(up_forward_ref(x, params))

    # f32 compute path: tight check against the XLA reference.
    out_f32 = jax.block_until_ready(
        up_forward(x, params, compute_dtype=jnp.float32))
    assert out_f32.shape == (N, 2 * H, 2 * W, out_channels), out_f32.shape
    assert jnp.allclose(out_f32, ref, atol=1e-3, rtol=1e-3), \
        float(jnp.max(jnp.abs(out_f32 - ref)))

    # bf16 MXU path (v6e/v7x-targeted): relaxed, relative-error check.
    out_bf16 = jax.block_until_ready(
        up_forward(x, params, compute_dtype=jnp.bfloat16))
    rel_err = float(jnp.linalg.norm(out_bf16 - ref) / jnp.linalg.norm(ref))
    assert out_bf16.shape == (N, 2 * H, 2 * W, out_channels), out_bf16.shape
    assert rel_err < 3e-2, rel_err

    print("KERNEL_OK")
</pallas_src>

<mosaic_0001>
module attributes {stable_mosaic.version = 11 : i64} {
  func.func @_up_doubleconv_kernel(%arg0: i32, %arg1: memref<1x8x8x8xf32, #tpu.memory_space<vmem>>, %arg2: memref<256x64xf32, #tpu.memory_space<vmem>>, %arg3: memref<9x8x4xf32, #tpu.memory_space<vmem>>, %arg4: memref<1x4xf32, #tpu.memory_space<vmem>>, %arg5: memref<9x4x4xf32, #tpu.memory_space<vmem>>, %arg6: memref<1x4xf32, #tpu.memory_space<vmem>>, %arg7: memref<1x16x16x4xf32, #tpu.memory_space<vmem>>, %arg8: memref<18x18x8xf32, #tpu.memory_space<vmem>>, %arg9: memref<18x18x4xf32, #tpu.memory_space<vmem>>) attributes {dimension_semantics = [#tpu.dimension_semantics<parallel>], iteration_bounds = array<i64: 2>, scalar_prefetch = 0 : i64, scratch_operands = 2 : i64, tpu.core_type = #tpu.core_type<tc>, window_params = [{transform_indices = @transform_0, window_bounds = array<i64: 1, 8, 8, 8>}, {pipeline_mode = #tpu.pipeline_mode<synchronous>, transform_indices = @transform_1, window_bounds = array<i64: 256, 64>}, {pipeline_mode = #tpu.pipeline_mode<synchronous>, transform_indices = @transform_2, window_bounds = array<i64: 9, 8, 4>}, {pipeline_mode = #tpu.pipeline_mode<synchronous>, transform_indices = @transform_3, window_bounds = array<i64: 1, 4>}, {pipeline_mode = #tpu.pipeline_mode<synchronous>, transform_indices = @transform_4, window_bounds = array<i64: 9, 4, 4>}, {pipeline_mode = #tpu.pipeline_mode<synchronous>, transform_indices = @transform_5, window_bounds = array<i64: 1, 4>}, {transform_indices = @transform_6, window_bounds = array<i64: 1, 16, 16, 4>}]} {
    %c0 = arith.constant 0 : index
    %c0_0 = arith.constant 0 : index
    %c0_1 = arith.constant 0 : index
    %c0_2 = arith.constant 0 : index
    %0 = vector.load %arg1[%c0, %c0_0, %c0_1, %c0_2] : memref<1x8x8x8xf32, #tpu.memory_space<vmem>>, vector<1x8x8x8xf32>
    %1 = vector.shape_cast %0 : vector<1x8x8x8xf32> to vector<8x8x8xf32>
    %2 = vector.shape_cast %1 : vector<8x8x8xf32> to vector<64x8xf32>
    %c0_3 = arith.constant 0 : index
    %c0_4 = arith.constant 0 : index
    %3 = vector.load %arg2[%c0_3, %c0_4] : memref<256x64xf32, #tpu.memory_space<vmem>>, vector<256x64xf32>
    %cst = arith.constant dense<0.000000e+00> : vector<256x8xf32>
    %4 = tpu.matmul %3, %2, %cst {dimension_numbers = #tpu.dot_dimension_numbers<[1], [0], [0], [1], [0, 0, 1, 1], [], []>} : vector<256x64xf32>, vector<64x8xf32>, vector<256x8xf32> -> vector<256x8xf32>
    %cst_5 = arith.constant 0.000000e+00 : f32
    %5 = vector.broadcast %cst_5 : f32 to vector<18x18x8xf32>
    %c0_6 = arith.constant 0 : index
    %c0_7 = arith.constant 0 : index
    %c0_8 = arith.constant 0 : index
    %6 = vector.load %arg8[%c0_6, %c0_7, %c0_8] : memref<18x18x8xf32, #tpu.memory_space<vmem>>, vector<18x18x8xf32>
    tpu.vector_store %arg8[%c0_6, %c0_7, %c0_8], %5 {strides = array<i32>} : memref<18x18x8xf32, #tpu.memory_space<vmem>>, vector<18x18x8xf32>,
    %7 = vector.shape_cast %4 : vector<256x8xf32> to vector<16x16x8xf32>
    %c1 = arith.constant 1 : index
    %c1_9 = arith.constant 1 : index
    %c0_10 = arith.constant 0 : index
    %8 = vector.load %arg8[%c1, %c1_9, %c0_10] : memref<18x18x8xf32, #tpu.memory_space<vmem>>, vector<16x16x8xf32>
    tpu.vector_store %arg8[%c1, %c1_9, %c0_10], %7 {strides = array<i32>} : memref<18x18x8xf32, #tpu.memory_space<vmem>>, vector<16x16x8xf32>,
    %c0_11 = arith.constant 0 : index
    %c0_12 = arith.constant 0 : index
    %c0_13 = arith.constant 0 : index
    %9 = vector.load %arg8[%c0_11, %c0_12, %c0_13] : memref<18x18x8xf32, #tpu.memory_space<vmem>>, vector<18x18x8xf32>
    %cst_14 = arith.constant 0.000000e+00 : f32
    %10 = vector.broadcast %cst_14 : f32 to vector<256x4xf32>
    %11 = vector.extract_strided_slice %9 {offsets = [0, 0, 0], sizes = [16, 16, 8], strides = [1, 1, 1]} : vector<18x18x8xf32> to vector<16x16x8xf32>
    %12 = vector.shape_cast %11 : vector<16x16x8xf32> to vector<256x8xf32>
    %c0_15 = arith.constant 0 : index
    %c0_16 = arith.constant 0 : index
    %c0_17 = arith.constant 0 : index
    %13 = vector.load %arg3[%c0_15, %c0_16, %c0_17] : memref<9x8x4xf32, #tpu.memory_space<vmem>>, vector<1x8x4xf32>
    %14 = vector.shape_cast %13 : vector<1x8x4xf32> to vector<8x4xf32>
    %cst_18 = arith.constant dense<0.000000e+00> : vector<256x4xf32>
    %15 = tpu.matmul %12, %14, %cst_18 {dimension_numbers = #tpu.dot_dimension_numbers<[1], [0], [0], [1], [0, 0, 1, 1], [], []>} : vector<256x8xf32>, vector<8x4xf32>, vector<256x4xf32> -> vector<256x4xf32>
    %16 = arith.addf %10, %15 : vector<256x4xf32>
    %17 = vector.extract_strided_slice %9 {offsets = [0, 1, 0], sizes = [16, 16, 8], strides = [1, 1, 1]} : vector<18x18x8xf32> to vector<16x16x8xf32>
    %18 = vector.shape_cast %17 : vector<16x16x8xf32> to vector<256x8xf32>
    %c1_19 = arith.constant 1 : index
    %c0_20 = arith.constant 0 : index
    %c0_21 = arith.constant 0 : index
    %19 = vector.load %arg3[%c1_19, %c0_20, %c0_21] : memref<9x8x4xf32, #tpu.memory_space<vmem>>, vector<1x8x4xf32>
    %20 = vector.shape_cast %19 : vector<1x8x4xf32> to vector<8x4xf32>
    %cst_22 = arith.constant dense<0.000000e+00> : vector<256x4xf32>
    %21 = tpu.matmul %18, %20, %cst_22 {dimension_numbers = #tpu.dot_dimension_numbers<[1], [0], [0], [1], [0, 0, 1, 1], [], []>} : vector<256x8xf32>, vector<8x4xf32>, vector<256x4xf32> -> vector<256x4xf32>
    %22 = arith.addf %16, %21 : vector<256x4xf32>
    %23 = vector.extract_strided_slice %9 {offsets = [0, 2, 0], sizes = [16, 16, 8], strides = [1, 1, 1]} : vector<18x18x8xf32> to vector<16x16x8xf32>
    %24 = vector.shape_cast %23 : vector<16x16x8xf32> to vector<256x8xf32>
    %c2 = arith.constant 2 : index
    %c0_23 = arith.constant 0 : index
    %c0_24 = arith.constant 0 : index
    %25 = vector.load %arg3[%c2, %c0_23, %c0_24] : memref<9x8x4xf32, #tpu.memory_space<vmem>>, vector<1x8x4xf32>
    %26 = vector.shape_cast %25 : vector<1x8x4xf32> to vector<8x4xf32>
    %cst_25 = arith.constant dense<0.000000e+00> : vector<256x4xf32>
    %27 = tpu.matmul %24, %26, %cst_25 {dimension_numbers = #tpu.dot_dimension_numbers<[1], [0], [0], [1], [0, 0, 1, 1], [], []>} : vector<256x8xf32>, vector<8x4xf32>, vector<256x4xf32> -> vector<256x4xf32>
    %28 = arith.addf %22, %27 : vector<256x4xf32>
    %29 = vector.extract_strided_slice %9 {offsets = [1, 0, 0], sizes = [16, 16, 8], strides = [1, 1, 1]} : vector<18x18x8xf32> to vector<16x16x8xf32>
    %30 = vector.shape_cast %29 : vector<16x16x8xf32> to vector<256x8xf32>
    %c3 = arith.constant 3 : index
    %c0_26 = arith.constant 0 : index
    %c0_27 = arith.constant 0 : index
    %31 = vector.load %arg3[%c3, %c0_26, %c0_27] : memref<9x8x4xf32, #tpu.memory_space<vmem>>, vector<1x8x4xf32>
    %32 = vector.shape_cast %31 : vector<1x8x4xf32> to vector<8x4xf32>
    %cst_28 = arith.constant dense<0.000000e+00> : vector<256x4xf32>
    %33 = tpu.matmul %30, %32, %cst_28 {dimension_numbers = #tpu.dot_dimension_numbers<[1], [0], [0], [1], [0, 0, 1, 1], [], []>} : vector<256x8xf32>, vector<8x4xf32>, vector<256x4xf32> -> vector<256x4xf32>
    %34 = arith.addf %28, %33 : vector<256x4xf32>
    %35 = vector.extract_strided_slice %9 {offsets = [1, 1, 0], sizes = [16, 16, 8], strides = [1, 1, 1]} : vector<18x18x8xf32> to vector<16x16x8xf32>
    %36 = vector.shape_cast %35 : vector<16x16x8xf32> to vector<256x8xf32>
    %c4 = arith.constant 4 : index
    %c0_29 = arith.constant 0 : index
    %c0_30 = arith.constant 0 : index
    %37 = vector.load %arg3[%c4, %c0_29, %c0_30] : memref<9x8x4xf32, #tpu.memory_space<vmem>>, vector<1x8x4xf32>
    %38 = vector.shape_cast %37 : vector<1x8x4xf32> to vector<8x4xf32>
    %cst_31 = arith.constant dense<0.000000e+00> : vector<256x4xf32>
    %39 = tpu.matmul %36, %38, %cst_31 {dimension_numbers = #tpu.dot_dimension_numbers<[1], [0], [0], [1], [0, 0, 1, 1], [], []>} : vector<256x8xf32>, vector<8x4xf32>, vector<256x4xf32> -> vector<256x4xf32>
    %40 = arith.addf %34, %39 : vector<256x4xf32>
    %41 = vector.extract_strided_slice %9 {offsets = [1, 2, 0], sizes = [16, 16, 8], strides = [1, 1, 1]} : vector<18x18x8xf32> to vector<16x16x8xf32>
    %42 = vector.shape_cast %41 : vector<16x16x8xf32> to vector<256x8xf32>
    %c5 = arith.constant 5 : index
    %c0_32 = arith.constant 0 : index
    %c0_33 = arith.constant 0 : index
    %43 = vector.load %arg3[%c5, %c0_32, %c0_33] : memref<9x8x4xf32, #tpu.memory_space<vmem>>, vector<1x8x4xf32>
    %44 = vector.shape_cast %43 : vector<1x8x4xf32> to vector<8x4xf32>
    %cst_34 = arith.constant dense<0.000000e+00> : vector<256x4xf32>
    %45 = tpu.matmul %42, %44, %cst_34 {dimension_numbers = #tpu.dot_dimension_numbers<[1], [0], [0], [1], [0, 0, 1, 1], [], []>} : vector<256x8xf32>, vector<8x4xf32>, vector<256x4xf32> -> vector<256x4xf32>
    %46 = arith.addf %40, %45 : vector<256x4xf32>
    %47 = vector.extract_strided_slice %9 {offsets = [2, 0, 0], sizes = [16, 16, 8], strides = [1, 1, 1]} : vector<18x18x8xf32> to vector<16x16x8xf32>
    %48 = vector.shape_cast %47 : vector<16x16x8xf32> to vector<256x8xf32>
    %c6 = arith.constant 6 : index
    %c0_35 = arith.constant 0 : index
    %c0_36 = arith.constant 0 : index
    %49 = vector.load %arg3[%c6, %c0_35, %c0_36] : memref<9x8x4xf32, #tpu.memory_space<vmem>>, vector<1x8x4xf32>
    %50 = vector.shape_cast %49 : vector<1x8x4xf32> to vector<8x4xf32>
    %cst_37 = arith.constant dense<0.000000e+00> : vector<256x4xf32>
    %51 = tpu.matmul %48, %50, %cst_37 {dimension_numbers = #tpu.dot_dimension_numbers<[1], [0], [0], [1], [0, 0, 1, 1], [], []>} : vector<256x8xf32>, vector<8x4xf32>, vector<256x4xf32> -> vector<256x4xf32>
    %52 = arith.addf %46, %51 : vector<256x4xf32>
    %53 = vector.extract_strided_slice %9 {offsets = [2, 1, 0], sizes = [16, 16, 8], strides = [1, 1, 1]} : vector<18x18x8xf32> to vector<16x16x8xf32>
    %54 = vector.shape_cast %53 : vector<16x16x8xf32> to vector<256x8xf32>
    %c7 = arith.constant 7 : index
    %c0_38 = arith.constant 0 : index
    %c0_39 = arith.constant 0 : index
    %55 = vector.load %arg3[%c7, %c0_38, %c0_39] : memref<9x8x4xf32, #tpu.memory_space<vmem>>, vector<1x8x4xf32>
    %56 = vector.shape_cast %55 : vector<1x8x4xf32> to vector<8x4xf32>
    %cst_40 = arith.constant dense<0.000000e+00> : vector<256x4xf32>
    %57 = tpu.matmul %54, %56, %cst_40 {dimension_numbers = #tpu.dot_dimension_numbers<[1], [0], [0], [1], [0, 0, 1, 1], [], []>} : vector<256x8xf32>, vector<8x4xf32>, vector<256x4xf32> -> vector<256x4xf32>
    %58 = arith.addf %52, %57 : vector<256x4xf32>
    %59 = vector.extract_strided_slice %9 {offsets = [2, 2, 0], sizes = [16, 16, 8], strides = [1, 1, 1]} : vector<18x18x8xf32> to vector<16x16x8xf32>
    %60 = vector.shape_cast %59 : vector<16x16x8xf32> to vector<256x8xf32>
    %c8 = arith.constant 8 : index
    %c0_41 = arith.constant 0 : index
    %c0_42 = arith.constant 0 : index
    %61 = vector.load %arg3[%c8, %c0_41, %c0_42] : memref<9x8x4xf32, #tpu.memory_space<vmem>>, vector<1x8x4xf32>
    %62 = vector.shape_cast %61 : vector<1x8x4xf32> to vector<8x4xf32>
    %cst_43 = arith.constant dense<0.000000e+00> : vector<256x4xf32>
    %63 = tpu.matmul %60, %62, %cst_43 {dimension_numbers = #tpu.dot_dimension_numbers<[1], [0], [0], [1], [0, 0, 1, 1], [], []>} : vector<256x8xf32>, vector<8x4xf32>, vector<256x4xf32> -> vector<256x4xf32>
    %64 = arith.addf %58, %63 : vector<256x4xf32>
    %c0_44 = arith.constant 0 : index
    %c0_45 = arith.constant 0 : index
    %65 = vector.load %arg4[%c0_44, %c0_45] : memref<1x4xf32, #tpu.memory_space<vmem>>, vector<1x4xf32>
    %66 = vector.broadcast %65 : vector<1x4xf32> to vector<256x4xf32>
    %67 = arith.addf %64, %66 : vector<256x4xf32>
    %cst_46 = arith.constant 0.000000e+00 : f32
    %68 = vector.broadcast %cst_46 : f32 to vector<256x4xf32>
    %69 = arith.maximumf %67, %68 : vector<256x4xf32>
    %cst_47 = arith.constant 0.000000e+00 : f32
    %70 = vector.broadcast %cst_47 : f32 to vector<18x18x4xf32>
    %c0_48 = arith.constant 0 : index
    %c0_49 = arith.constant 0 : index
    %c0_50 = arith.constant 0 : index
    %71 = vector.load %arg9[%c0_48, %c0_49, %c0_50] : memref<18x18x4xf32, #tpu.memory_space<vmem>>, vector<18x18x4xf32>
    tpu.vector_store %arg9[%c0_48, %c0_49, %c0_50], %70 {strides = array<i32>} : memref<18x18x4xf32, #tpu.memory_space<vmem>>, vector<18x18x4xf32>,
    %72 = vector.shape_cast %69 : vector<256x4xf32> to vector<16x16x4xf32>
    %c1_51 = arith.constant 1 : index
    %c1_52 = arith.constant 1 : index
    %c0_53 = arith.constant 0 : index
    %73 = vector.load %arg9[%c1_51, %c1_52, %c0_53] : memref<18x18x4xf32, #tpu.memory_space<vmem>>, vector<16x16x4xf32>
    tpu.vector_store %arg9[%c1_51, %c1_52, %c0_53], %72 {strides = array<i32>} : memref<18x18x4xf32, #tpu.memory_space<vmem>>, vector<16x16x4xf32>,
    %c0_54 = arith.constant 0 : index
    %c0_55 = arith.constant 0 : index
    %c0_56 = arith.constant 0 : index
    %74 = vector.load %arg9[%c0_54, %c0_55, %c0_56] : memref<18x18x4xf32, #tpu.memory_space<vmem>>, vector<18x18x4xf32>
    %cst_57 = arith.constant 0.000000e+00 : f32
    %75 = vector.broadcast %cst_57 : f32 to vector<256x4xf32>
    %76 = vector.extract_strided_slice %74 {offsets = [0, 0, 0], sizes = [16, 16, 4], strides = [1, 1, 1]} : vector<18x18x4xf32> to vector<16x16x4xf32>
    %77 = vector.shape_cast %76 : vector<16x16x4xf32> to vector<256x4xf32>
    %c0_58 = arith.constant 0 : index
    %c0_59 = arith.constant 0 : index
    %c0_60 = arith.constant 0 : index
    %78 = vector.load %arg5[%c0_58, %c0_59, %c0_60] : memref<9x4x4xf32, #tpu.memory_space<vmem>>, vector<1x4x4xf32>
    %79 = vector.shape_cast %78 : vector<1x4x4xf32> to vector<4x4xf32>
    %cst_61 = arith.constant dense<0.000000e+00> : vector<256x4xf32>
    %80 = tpu.matmul %77, %79, %cst_61 {dimension_numbers = #tpu.dot_dimension_numbers<[1], [0], [0], [1], [0, 0, 1, 1], [], []>} : vector<256x4xf32>, vector<4x4xf32>, vector<256x4xf32> -> vector<256x4xf32>
    %81 = arith.addf %75, %80 : vector<256x4xf32>
    %82 = vector.extract_strided_slice %74 {offsets = [0, 1, 0], sizes = [16, 16, 4], strides = [1, 1, 1]} : vector<18x18x4xf32> to vector<16x16x4xf32>
    %83 = vector.shape_cast %82 : vector<16x16x4xf32> to vector<256x4xf32>
    %c1_62 = arith.constant 1 : index
    %c0_63 = arith.constant 0 : index
    %c0_64 = arith.constant 0 : index
    %84 = vector.load %arg5[%c1_62, %c0_63, %c0_64] : memref<9x4x4xf32, #tpu.memory_space<vmem>>, vector<1x4x4xf32>
    %85 = vector.shape_cast %84 : vector<1x4x4xf32> to vector<4x4xf32>
    %cst_65 = arith.constant dense<0.000000e+00> : vector<256x4xf32>
    %86 = tpu.matmul %83, %85, %cst_65 {dimension_numbers = #tpu.dot_dimension_numbers<[1], [0], [0], [1], [0, 0, 1, 1], [], []>} : vector<256x4xf32>, vector<4x4xf32>, vector<256x4xf32> -> vector<256x4xf32>
    %87 = arith.addf %81, %86 : vector<256x4xf32>
    %88 = vector.extract_strided_slice %74 {offsets = [0, 2, 0], sizes = [16, 16, 4], strides = [1, 1, 1]} : vector<18x18x4xf32> to vector<16x16x4xf32>
    %89 = vector.shape_cast %88 : vector<16x16x4xf32> to vector<256x4xf32>
    %c2_66 = arith.constant 2 : index
    %c0_67 = arith.constant 0 : index
    %c0_68 = arith.constant 0 : index
    %90 = vector.load %arg5[%c2_66, %c0_67, %c0_68] : memref<9x4x4xf32, #tpu.memory_space<vmem>>, vector<1x4x4xf32>
    %91 = vector.shape_cast %90 : vector<1x4x4xf32> to vector<4x4xf32>
    %cst_69 = arith.constant dense<0.000000e+00> : vector<256x4xf32>
    %92 = tpu.matmul %89, %91, %cst_69 {dimension_numbers = #tpu.dot_dimension_numbers<[1], [0], [0], [1], [0, 0, 1, 1], [], []>} : vector<256x4xf32>, vector<4x4xf32>, vector<256x4xf32> -> vector<256x4xf32>
    %93 = arith.addf %87, %92 : vector<256x4xf32>
    %94 = vector.extract_strided_slice %74 {offsets = [1, 0, 0], sizes = [16, 16, 4], strides = [1, 1, 1]} : vector<18x18x4xf32> to vector<16x16x4xf32>
    %95 = vector.shape_cast %94 : vector<16x16x4xf32> to vector<256x4xf32>
    %c3_70 = arith.constant 3 : index
    %c0_71 = arith.constant 0 : index
    %c0_72 = arith.constant 0 : index
    %96 = vector.load %arg5[%c3_70, %c0_71, %c0_72] : memref<9x4x4xf32, #tpu.memory_space<vmem>>, vector<1x4x4xf32>
    %97 = vector.shape_cast %96 : vector<1x4x4xf32> to vector<4x4xf32>
    %cst_73 = arith.constant dense<0.000000e+00> : vector<256x4xf32>
    %98 = tpu.matmul %95, %97, %cst_73 {dimension_numbers = #tpu.dot_dimension_numbers<[1], [0], [0], [1], [0, 0, 1, 1], [], []>} : vector<256x4xf32>, vector<4x4xf32>, vector<256x4xf32> -> vector<256x4xf32>
    %99 = arith.addf %93, %98 : vector<256x4xf32>
    %100 = vector.extract_strided_slice %74 {offsets = [1, 1, 0], sizes = [16, 16, 4], strides = [1, 1, 1]} : vector<18x18x4xf32> to vector<16x16x4xf32>
    %101 = vector.shape_cast %100 : vector<16x16x4xf32> to vector<256x4xf32>
    %c4_74 = arith.constant 4 : index
    %c0_75 = arith.constant 0 : index
    %c0_76 = arith.constant 0 : index
    %102 = vector.load %arg5[%c4_74, %c0_75, %c0_76] : memref<9x4x4xf32, #tpu.memory_space<vmem>>, vector<1x4x4xf32>
    %103 = vector.shape_cast %102 : vector<1x4x4xf32> to vector<4x4xf32>
    %cst_77 = arith.constant dense<0.000000e+00> : vector<256x4xf32>
    %104 = tpu.matmul %101, %103, %cst_77 {dimension_numbers = #tpu.dot_dimension_numbers<[1], [0], [0], [1], [0, 0, 1, 1], [], []>} : vector<256x4xf32>, vector<4x4xf32>, vector<256x4xf32> -> vector<256x4xf32>
    %105 = arith.addf %99, %104 : vector<256x4xf32>
    %106 = vector.extract_strided_slice %74 {offsets = [1, 2, 0], sizes = [16, 16, 4], strides = [1, 1, 1]} : vector<18x18x4xf32> to vector<16x16x4xf32>
    %107 = vector.shape_cast %106 : vector<16x16x4xf32> to vector<256x4xf32>
    %c5_78 = arith.constant 5 : index
    %c0_79 = arith.constant 0 : index
    %c0_80 = arith.constant 0 : index
    %108 = vector.load %arg5[%c5_78, %c0_79, %c0_80] : memref<9x4x4xf32, #tpu.memory_space<vmem>>, vector<1x4x4xf32>
    %109 = vector.shape_cast %108 : vector<1x4x4xf32> to vector<4x4xf32>
    %cst_81 = arith.constant dense<0.000000e+00> : vector<256x4xf32>
    %110 = tpu.matmul %107, %109, %cst_81 {dimension_numbers = #tpu.dot_dimension_numbers<[1], [0], [0], [1], [0, 0, 1, 1], [], []>} : vector<256x4xf32>, vector<4x4xf32>, vector<256x4xf32> -> vector<256x4xf32>
    %111 = arith.addf %105, %110 : vector<256x4xf32>
    %112 = vector.extract_strided_slice %74 {offsets = [2, 0, 0], sizes = [16, 16, 4], strides = [1, 1, 1]} : vector<18x18x4xf32> to vector<16x16x4xf32>
    %113 = vector.shape_cast %112 : vector<16x16x4xf32> to vector<256x4xf32>
    %c6_82 = arith.constant 6 : index
    %c0_83 = arith.constant 0 : index
    %c0_84 = arith.constant 0 : index
    %114 = vector.load %arg5[%c6_82, %c0_83, %c0_84] : memref<9x4x4xf32, #tpu.memory_space<vmem>>, vector<1x4x4xf32>
    %115 = vector.shape_cast %114 : vector<1x4x4xf32> to vector<4x4xf32>
    %cst_85 = arith.constant dense<0.000000e+00> : vector<256x4xf32>
    %116 = tpu.matmul %113, %115, %cst_85 {dimension_numbers = #tpu.dot_dimension_numbers<[1], [0], [0], [1], [0, 0, 1, 1], [], []>} : vector<256x4xf32>, vector<4x4xf32>, vector<256x4xf32> -> vector<256x4xf32>
    %117 = arith.addf %111, %116 : vector<256x4xf32>
    %118 = vector.extract_strided_slice %74 {offsets = [2, 1, 0], sizes = [16, 16, 4], strides = [1, 1, 1]} : vector<18x18x4xf32> to vector<16x16x4xf32>
    %119 = vector.shape_cast %118 : vector<16x16x4xf32> to vector<256x4xf32>
    %c7_86 = arith.constant 7 : index
    %c0_87 = arith.constant 0 : index
    %c0_88 = arith.constant 0 : index
    %120 = vector.load %arg5[%c7_86, %c0_87, %c0_88] : memref<9x4x4xf32, #tpu.memory_space<vmem>>, vector<1x4x4xf32>
    %121 = vector.shape_cast %120 : vector<1x4x4xf32> to vector<4x4xf32>
    %cst_89 = arith.constant dense<0.000000e+00> : vector<256x4xf32>
    %122 = tpu.matmul %119, %121, %cst_89 {dimension_numbers = #tpu.dot_dimension_numbers<[1], [0], [0], [1], [0, 0, 1, 1], [], []>} : vector<256x4xf32>, vector<4x4xf32>, vector<256x4xf32> -> vector<256x4xf32>
    %123 = arith.addf %117, %122 : vector<256x4xf32>
    %124 = vector.extract_strided_slice %74 {offsets = [2, 2, 0], sizes = [16, 16, 4], strides = [1, 1, 1]} : vector<18x18x4xf32> to vector<16x16x4xf32>
    %125 = vector.shape_cast %124 : vector<16x16x4xf32> to vector<256x4xf32>
    %c8_90 = arith.constant 8 : index
    %c0_91 = arith.constant 0 : index
    %c0_92 = arith.constant 0 : index
    %126 = vector.load %arg5[%c8_90, %c0_91, %c0_92] : memref<9x4x4xf32, #tpu.memory_space<vmem>>, vector<1x4x4xf32>
    %127 = vector.shape_cast %126 : vector<1x4x4xf32> to vector<4x4xf32>
    %cst_93 = arith.constant dense<0.000000e+00> : vector<256x4xf32>
    %128 = tpu.matmul %125, %127, %cst_93 {dimension_numbers = #tpu.dot_dimension_numbers<[1], [0], [0], [1], [0, 0, 1, 1], [], []>} : vector<256x4xf32>, vector<4x4xf32>, vector<256x4xf32> -> vector<256x4xf32>
    %129 = arith.addf %123, %128 : vector<256x4xf32>
    %c0_94 = arith.constant 0 : index
    %c0_95 = arith.constant 0 : index
    %130 = vector.load %arg6[%c0_94, %c0_95] : memref<1x4xf32, #tpu.memory_space<vmem>>, vector<1x4xf32>
    %131 = vector.broadcast %130 : vector<1x4xf32> to vector<256x4xf32>
    %132 = arith.addf %129, %131 : vector<256x4xf32>
    %cst_96 = arith.constant 0.000000e+00 : f32
    %133 = vector.broadcast %cst_96 : f32 to vector<256x4xf32>
    %134 = arith.maximumf %132, %133 : vector<256x4xf32>
    %135 = vector.shape_cast %134 : vector<256x4xf32> to vector<16x16x4xf32>
    %c0_97 = arith.constant 0 : index
    %c0_98 = arith.constant 0 : index
    %c0_99 = arith.constant 0 : index
    %c0_100 = arith.constant 0 : index
    %136 = vector.load %arg7[%c0_97, %c0_98, %c0_99, %c0_100] : memref<1x16x16x4xf32, #tpu.memory_space<vmem>>, vector<1x16x16x4xf32>
    %137 = vector.shape_cast %136 : vector<1x16x16x4xf32> to vector<16x16x4xf32>
    %138 = vector.shape_cast %135 : vector<16x16x4xf32> to vector<1x16x16x4xf32>
    tpu.vector_store %arg7[%c0_97, %c0_98, %c0_99, %c0_100], %138 {strides = array<i32>} : memref<1x16x16x4xf32, #tpu.memory_space<vmem>>, vector<1x16x16x4xf32>,
    return
  }
  func.func @transform_0(%arg0: i32) -> (i32, i32, i32, i32) {
    %c0_i32 = arith.constant 0 : i32
    %c0_i32_0 = arith.constant 0 : i32
    %c0_i32_1 = arith.constant 0 : i32
    %c0_i32_2 = arith.constant 0 : i32
    return %arg0, %c0_i32, %c0_i32_0, %c0_i32_1 : i32, i32, i32, i32
  }
  func.func @transform_1(%arg0: i32) -> (i32, i32) {
    %c0_i32 = arith.constant 0 : i32
    %c0_i32_0 = arith.constant 0 : i32
    %c0_i32_1 = arith.constant 0 : i32
    return %c0_i32, %c0_i32_0 : i32, i32
  }
  func.func @transform_2(%arg0: i32) -> (i32, i32, i32) {
    %c0_i32 = arith.constant 0 : i32
    %c0_i32_0 = arith.constant 0 : i32
    %c0_i32_1 = arith.constant 0 : i32
    %c0_i32_2 = arith.constant 0 : i32
    return %c0_i32, %c0_i32_0, %c0_i32_1 : i32, i32, i32
  }
  func.func @transform_3(%arg0: i32) -> (i32, i32) {
    %c0_i32 = arith.constant 0 : i32
    %c0_i32_0 = arith.constant 0 : i32
    %c0_i32_1 = arith.constant 0 : i32
    return %c0_i32, %c0_i32_0 : i32, i32
  }
  func.func @transform_4(%arg0: i32) -> (i32, i32, i32) {
    %c0_i32 = arith.constant 0 : i32
    %c0_i32_0 = arith.constant 0 : i32
    %c0_i32_1 = arith.constant 0 : i32
    %c0_i32_2 = arith.constant 0 : i32
    return %c0_i32, %c0_i32_0, %c0_i32_1 : i32, i32, i32
  }
  func.func @transform_5(%arg0: i32) -> (i32, i32) {
    %c0_i32 = arith.constant 0 : i32
    %c0_i32_0 = arith.constant 0 : i32
    %c0_i32_1 = arith.constant 0 : i32
    return %c0_i32, %c0_i32_0 : i32, i32
  }
  func.func @transform_6(%arg0: i32) -> (i32, i32, i32, i32) {
    %c0_i32 = arith.constant 0 : i32
    %c0_i32_0 = arith.constant 0 : i32
    %c0_i32_1 = arith.constant 0 : i32
    %c0_i32_2 = arith.constant 0 : i32
    return %arg0, %c0_i32, %c0_i32_0, %c0_i32_1 : i32, i32, i32, i32
  }
}

</mosaic_0001>

<bundles_post_ra>
// kernel: up_forward.1
= control target key start
LH: loop header
LB: loop body
LE: loop exit
PB: predicated region body
PF: predicated region fallthrough
CT: control target
= control target key end

     0   :  { %s5190_s21 = smov 0   ;;  %s8428_s0 = inlined_call_operand.vmem [shape: f32[2,8,8,8], index: 0, kind: input, shape index: {}]   ;;  %s8429_s1 = inlined_call_operand.vmem [shape: f32[256,64], index: 1, kind: input, shape index: {}]   ;;  %s8430_s2 = inlined_call_operand.vmem [shape: f32[9,8,4], index: 2, kind: input, shape index: {}]   ;;  %s8431_s3 = inlined_call_operand.vmem [shape: f32[1,4], index: 3, kind: input, shape index: {}]   ;;  %s8432_s4 = inlined_call_operand.vmem [shape: f32[9,4,4], index: 4, kind: input, shape index: {}]   ;;  %s8433_s5 = inlined_call_operand.vmem [shape: f32[1,4], index: 5, kind: input, shape index: {}]   ;;  %s8434_s6 = inlined_call_operand.vmem [shape: f32[2,16,16,4], index: 6, kind: output, shape index: {}]  }
   0x1 LB: > { %s4457_s22 = sadd.s32 4294967295, %s5152_s21   ;;  %p4461_p0 = scmp.ge.s32.totalorder %s5152_s21, 1  ;;  %s5152_s21 = sphi %s5190_s21, %s16_s21  }
   0x2   : > { %p212_p1 = scmp.lt.s32.totalorder %s5152_s21, 3 }
   0x4   : > { %p213_p2 = pnand %p4461_p0, %p212_p1 }
   0x6   : > { %216 = sbr.rel (%p213_p2) target bundleno = 1711 (0x6af), region = 44 }
   0xb   : > { %p242_p3 = scmp.lt.s32.totalorder %s4457_s22, 1  ;;  %v260_v8 = vld [vmem:[%s8429_s1] sm:$0xff]  ;;  %vm292_vm0 = vcmask 523264   ;;  %v261_v9 = vld [vmem:[%s8429_s1 + $0x8] sm:$0xff]  ;;  %v262_v10 = vld [vmem:[%s8429_s1 + $0x10] sm:$0xff]  ;;  %vm502_vm1 = vcmask 64512  }
   0xc   : > { %v263_v11 = vld [vmem:[%s8429_s1 + $0x18] sm:$0xff]  ;;  %v264_v12 = vld [vmem:[%s8429_s1 + $0x20] sm:$0xff]  ;;  %v265_v13 = vld [vmem:[%s8429_s1 + $0x28] sm:$0xff]  ;;  %v8435_v21 = vmov 0.0   ;;  %vm505_vm2 = vcmask 58368   ;;  %vm694_vm3 = vcmask 1046528  }
   0xd   : > { %s8986_s22 = smov (!%p242_p3, %s4457_s22), 1  ;;  %v266_v14 = vld [vmem:[%s8429_s1 + $0x30] sm:$0xff]  ;;  %v267_v15 = vld [vmem:[%s8429_s1 + $0x38] sm:$0xff]  ;;  %v268_v16 = vld [vmem:[%s8429_s1 + $0x40] sm:$0xff]  ;;  %507 = vst.msk [vmem:[#allocation2 + $0x18] sm:$0xff] %vm502_vm1, %v8435_v21  ;;  %vm1131_vm4 = vcmask 1045504  }
   0xe   : > { %s5101_s23 = sshll.u32 %s8986_s22, 6  ;;  %v269_v17 = vld [vmem:[%s8429_s1 + $0x48] sm:$0xff]  ;;  %v270_v18 = vld [vmem:[%s8429_s1 + $0x50] sm:$0xff]  ;;  %v271_v19 = vld [vmem:[%s8429_s1 + $0x58] sm:$0xff]  ;;  %508 = vst.msk [vmem:[#allocation2 + $0x20] sm:$0xff] %vm502_vm1, %v8435_v21  ;;  %vm2761_vm5 = vcmask 1043456  }
   0xf   : > { %s246_s26 = scalar_lea.vmem %s8428_s0, %s5101_s23  ;;  %v272_v20 = vld [vmem:[%s8429_s1 + $0x60] sm:$0xff]  ;;  %503 = vst.msk [vmem:[#allocation2] sm:$0xff] %vm502_vm1, %v8435_v21  ;;  %v273_v22 = vld [vmem:[%s8429_s1 + $0x68] sm:$0xff]  ;;  %v274_v23 = vld [vmem:[%s8429_s1 + $0x70] sm:$0xff]  ;;  %vm2423_vm6 = vcmask 31744   ;;  %vm2426_vm7 = vcmask 25600  }
  0x10   : > { %v259_v0 = vld [vmem:[%s246_s26 + $0x38] sm:$0xff]  ;;  %v258_v1 = vld [vmem:[%s246_s26 + $0x30] sm:$0xff]  ;;  %v257_v2 = vld [vmem:[%s246_s26 + $0x28] sm:$0xff]  ;;  %504 = vst.msk [vmem:[#allocation2 + $0x8] sm:$0xff] %vm502_vm1, %v8435_v21  ;;  %s5102_s23 = sshll.u32 %s8986_s22, 8 }
  0x11   : > { %397 = vmatpush.msra.mxu0 %v259_v0  ;;  %v256_v3 = vld [vmem:[%s246_s26 + $0x20] sm:$0xff]  ;;  %v255_v4 = vld [vmem:[%s246_s26 + $0x18] sm:$0xff]  ;;  %v254_v5 = vld [vmem:[%s246_s26 + $0x10] sm:$0xff]  ;;  %510 = vst.msk [vmem:[#allocation2 + $0x30] sm:$0xff] %vm502_vm1, %v8435_v21 }
  0x12   : > { %v253_v6 = vld [vmem:[%s246_s26 + $0x8] sm:$0xff]  ;;  %v252_v7 = vld [vmem:[%s246_s26] sm:$0xff]  ;;  %511 = vst.msk [vmem:[#allocation2 + $0x38] sm:$0xff] %vm502_vm1, %v8435_v21  ;;  %v275_v24 = vld [vmem:[%s8429_s1 + $0x78] sm:$0xff]  ;;  %s8264_s26 = scalar_lea.vmem %s8434_s6, %s5102_s23 }
  0x13   : > { %398 = vmatpush.msra.mxu0 %v258_v1  ;;  %513 = vst.msk [vmem:[#allocation2 + $0x48] sm:$0xff] %vm502_vm1, %v8435_v21  ;;  %v276_v26 = vld [vmem:[%s8429_s1 + $0x80] sm:$0xff]  ;;  %v277_v28 = vld [vmem:[%s8429_s1 + $0x88] sm:$0xff]  ;;  %v278_v30 = vld [vmem:[%s8429_s1 + $0x90] sm:$0xff] }
  0x14   : > { %514 = vst.msk [vmem:[#allocation2 + $0x50] sm:$0xff] %vm502_vm1, %v8435_v21  ;;  %v645_v31 = vld [vmem:[%s8430_s2] sm:$0xff]  ;;  %v4498_v32 = vld [vmem:[%s8430_s2 + $0x8] sm:$0xff]  ;;  %v5391_v33 = vld [vmem:[%s8430_s2 + $0x10] sm:$0xff] }
  0x15   : > { %399 = vmatpush.msra.mxu0 %v257_v2  ;;  %516 = vst.msk [vmem:[#allocation2 + $0x60] sm:$0xff] %vm502_vm1, %v8435_v21  ;;  %5104 = vmatpush.msra.mxu2 %v645_v31  ;;  %v279_v35 = vld [vmem:[%s8429_s1 + $0x98] sm:$0xff]  ;;  %v4629_v36 = vld [vmem:[%s8430_s2 + $0x20] sm:$0xff]  ;;  %v281_v41 = vld [vmem:[%s8429_s1 + $0xa8] sm:$0xff] }
  0x16   : > { %517 = vst.msk [vmem:[#allocation2 + $0x68] sm:$0xff] %vm502_vm1, %v8435_v21  ;;  %5103 = vmatpush.msra.mxu1 %v4498_v32  ;;  %5105 = vmatpush.msra.mxu3 %v5391_v33  ;;  %v4596_v37 = vld [vmem:[%s8430_s2 + $0x18] sm:$0xff]  ;;  %v280_v39 = vld [vmem:[%s8429_s1 + $0xa0] sm:$0xff]  ;;  %v282_v44 = vld [vmem:[%s8429_s1 + $0xb0] sm:$0xff] }
  0x17   : > { %400 = vmatpush.msra.mxu0 %v256_v3  ;;  %519 = vst.msk [vmem:[#allocation2 + $0x78] sm:$0xff] %vm502_vm1, %v8435_v21  ;;  %1603 = vmatpush.msrb.mxu2 %v4629_v36  ;;  %v283_v54 = vld [vmem:[%s8429_s1 + $0xb8] sm:$0xff]  ;;  %v284_v57 = vld [vmem:[%s8429_s1 + $0xc0] sm:$0xff] }
  0x18   : > { %520 = vst.msk [vmem:[#allocation2 + $0x80] sm:$0xff] %vm502_vm1, %v8435_v21  ;;  %1446 = vmatpush.msrb.mxu1 %v4596_v37 }
  0x19   : > { %401 = vmatpush.msra.mxu0 %v255_v4  ;;  %522 = vst.msk [vmem:[#allocation2 + $0x90] sm:$0xff] %vm502_vm1, %v8435_v21 }
  0x1a   : > { %523 = vst.msk [vmem:[#allocation2 + $0x98] sm:$0xff] %vm502_vm1, %v8435_v21 }
  0x1b   : > { %402 = vmatpush.msra.mxu0 %v254_v5  ;;  %525 = vst.msk [vmem:[#allocation2 + $0xa8] sm:$0xff] %vm502_vm1, %v8435_v21  ;;  %v285_v5 = vld [vmem:[%s8429_s1 + $0xc8] sm:$0xff] }
  0x1c   : > { %526 = vst.msk [vmem:[#allocation2 + $0xb0] sm:$0xff] %vm502_vm1, %v8435_v21 }
  0x1d   : > { %403 = vmatpush.msra.mxu0 %v253_v6  ;;  %528 = vst.msk [vmem:[#allocation2 + $0xc0] sm:$0xff] %vm502_vm1, %v8435_v21 }
  0x1e   : > { %529 = vst.msk [vmem:[#allocation2 + $0xc8] sm:$0xff] %vm502_vm1, %v8435_v21 }
  0x1f   : > { %404 = vmatpush.msra.mxu0 %v252_v7  ;;  %531 = vst.msk [vmem:[#allocation2 + $0xd8] sm:$0xff] %vm502_vm1, %v8435_v21 }
  0x20   : > { %4466 = vmatmul.msk.f32.vlgmr.msra.gmra.mxu0 %vm292_vm0, %v260_v8  ;;  %532 = vst.msk [vmem:[#allocation2 + $0xe0] sm:$0xff] %vm502_vm1, %v8435_v21 }
  0x21   : > { %534 = vst.msk [vmem:[#allocation2 + $0xf0] sm:$0xff] %vm502_vm1, %v8435_v21  ;;  %856 = vmatpush.msrb.mxu0 %v4498_v32 }
  0x22   : > { %535 = vst.msk [vmem:[#allocation2 + $0xf8] sm:$0xff] %vm502_vm1, %v8435_v21 }
  0x23   : > { %537 = vst.msk [vmem:[#allocation2 + $0x108] sm:$0xff] %vm502_vm1, %v8435_v21  ;;  %1033 = vmatpush.msra.mxu0 %v645_v31 }
  0x24   : > { %538 = vst.msk [vmem:[#allocation2 + $0x110] sm:$0xff] %vm502_vm1, %v8435_v21 }
  0x25   : > { %540 = vst.msk [vmem:[#allocation2 + $0x120] sm:$0xff] %vm502_vm1, %v8435_v21 }
  0x26   : > { %541 = vst.msk [vmem:[#allocation2 + $0x128] sm:$0xff] %vm502_vm1, %v8435_v21 }
  0x27   : > { %543 = vst.msk [vmem:[#allocation2 + $0x138] sm:$0xff] %vm502_vm1, %v8435_v21 }
  0x28   : > { %4467 = vmatmul.msk.f32.gmra.mxu0 %vm292_vm0, %v261_v9  ;;  %544 = vst.msk [vmem:[#allocation2 + $0x140] sm:$0xff] %vm502_vm1, %v8435_v21 }
  0x29   : > { %546 = vst.msk [vmem:[#allocation2 + $0x150] sm:$0xff] %vm502_vm1, %v8435_v21 }
  0x2a   : > { %547 = vst.msk [vmem:[#allocation2 + $0x158] sm:$0xff] %vm502_vm1, %v8435_v21 }
  0x2b   : > { %549 = vst.msk [vmem:[#allocation2 + $0x168] sm:$0xff] %vm502_vm1, %v8435_v21 }
  0x2c   : > { %550 = vst.msk [vmem:[#allocation2 + $0x170] sm:$0xff] %vm502_vm1, %v8435_v21 }
  0x2d   : > { %552 = vst.msk [vmem:[#allocation2 + $0x180] sm:$0xff] %vm502_vm1, %v8435_v21 }
  0x2e   : > { %553 = vst.msk [vmem:[#allocation2 + $0x188] sm:$0xff] %vm502_vm1, %v8435_v21 }
  0x2f   : > { %555 = vst.msk [vmem:[#allocation2 + $0x198] sm:$0xff] %vm502_vm1, %v8435_v21 }
  0x30   : > { %4468 = vmatmul.msk.f32.gmra.mxu0 %vm292_vm0, %v262_v10  ;;  %556 = vst.msk [vmem:[#allocation2 + $0x1a0] sm:$0xff] %vm502_vm1, %v8435_v21  ;;  %v286_v10 = vld [vmem:[%s8429_s1 + $0xd0] sm:$0xff] }
  0x31   : > { %509 = vst.msk [vmem:[#allocation2 + $0x28] sm:$0x3] %vm505_vm2, %v8435_v21 }
  0x32   : > { %506 = vst.msk [vmem:[#allocation2 + $0x10] sm:$0x3] %vm505_vm2, %v8435_v21 }
  0x33   : > { %512 = vst.msk [vmem:[#allocation2 + $0x40] sm:$0x3] %vm505_vm2, %v8435_v21 }
  0x34   : > { %515 = vst.msk [vmem:[#allocation2 + $0x58] sm:$0x3] %vm505_vm2, %v8435_v21 }
  0x35   : > { %518 = vst.msk [vmem:[#allocation2 + $0x70] sm:$0x3] %vm505_vm2, %v8435_v21 }
  0x36   : > { %521 = vst.msk [vmem:[#allocation2 + $0x88] sm:$0x3] %vm505_vm2, %v8435_v21 }
  0x37   : > { %524 = vst.msk [vmem:[#allocation2 + $0xa0] sm:$0x3] %vm505_vm2, %v8435_v21 }
  0x38   : > { %4469 = vmatmul.msk.f32.gmra.mxu0 %vm292_vm0, %v263_v11  ;;  %527 = vst.msk [vmem:[#allocation2 + $0xb8] sm:$0x3] %vm505_vm2, %v8435_v21 }
  0x39   : > { %530 = vst.msk [vmem:[#allocation2 + $0xd0] sm:$0x3] %vm505_vm2, %v8435_v21 }
  0x3a   : > { %533 = vst.msk [vmem:[#allocation2 + $0xe8] sm:$0x3] %vm505_vm2, %v8435_v21 }
  0x3b   : > { %536 = vst.msk [vmem:[#allocation2 + $0x100] sm:$0x3] %vm505_vm2, %v8435_v21 }
  0x3c   : > { %539 = vst.msk [vmem:[#allocation2 + $0x118] sm:$0x3] %vm505_vm2, %v8435_v21 }
  0x3d   : > { %542 = vst.msk [vmem:[#allocation2 + $0x130] sm:$0x3] %vm505_vm2, %v8435_v21 }
  0x3e   : > { %545 = vst.msk [vmem:[#allocation2 + $0x148] sm:$0x3] %vm505_vm2, %v8435_v21 }
  0x3f   : > { %548 = vst.msk [vmem:[#allocation2 + $0x160] sm:$0x3] %vm505_vm2, %v8435_v21 }
  0x40   : > { %4470 = vmatmul.msk.f32.gmra.mxu0 %vm292_vm0, %v264_v12  ;;  %551 = vst.msk [vmem:[#allocation2 + $0x178] sm:$0x3] %vm505_vm2, %v8435_v21 }
  0x41   : > { %554 = vst.msk [vmem:[#allocation2 + $0x190] sm:$0x3] %vm505_vm2, %v8435_v21 }
  0x42   : > { %557 = vst.msk [vmem:[#allocation2 + $0x1a8] sm:$0x3] %vm505_vm2, %v8435_v21 }
  0x48   : > { %4471 = vmatmul.msk.f32.gmra.mxu0 %vm292_vm0, %v265_v13 }
  0x50   : > { %4472 = vmatmul.msk.f32.gmra.mxu0 %vm292_vm0, %v266_v14 }
  0x58   : > { %4473 = vmatmul.msk.f32.gmra.mxu0 %vm292_vm0, %v267_v15 }
  0x60   : > { %4474 = vmatmul.msk.f32.gmra.mxu0 %vm292_vm0, %v268_v16 }
  0x68   : > { %4475 = vmatmul.msk.f32.gmra.mxu0 %vm292_vm0, %v269_v17 }
  0x70   : > { %4476 = vmatmul.msk.f32.gmra.mxu0 %vm292_vm0, %v270_v18 }
  0x78   : > { %4477 = vmatmul.msk.f32.gmra.mxu0 %vm292_vm0, %v271_v19 }
  0x80   : > { %4478 = vmatmul.msk.f32.gmra.mxu0 %vm292_vm0, %v272_v20 }
  0x88   : > { %4479 = vmatmul.msk.f32.gmra.mxu0 %vm292_vm0, %v273_v22 }
  0x90   : > { %4480 = vmatmul.msk.f32.gmra.mxu0 %vm292_vm0, %v274_v23  ;;  %v287_v23 = vld [vmem:[%s8429_s1 + $0xd8] sm:$0xff] }
  0x98   : > { %4481 = vmatmul.msk.f32.gmra.mxu0 %vm292_vm0, %v275_v24 }
  0x9d   : > { %v406_v25 = vpop.f32.mrf.mxu0 }
  0x9e   : > { %559 = vst.msk [vmem:[#allocation2 + $0x19] sm:$0xff] %vm502_vm1, %v406_v25 }
  0xa0   : > { %4482 = vmatmul.msk.f32.gmra.mxu0 %vm292_vm0, %v276_v26 }
  0xa5   : > { %v409_v27 = vpop.f32.mrf.mxu0 }
  0xa6   : > { %560 = vst.msk [vmem:[#allocation2 + $0x21] sm:$0xff] %vm502_vm1, %v409_v27 }
  0xa8   : > { %4483 = vmatmul.msk.f32.gmra.mxu0 %vm292_vm0, %v277_v28  ;;  %v288_v28 = vld [vmem:[%s8429_s1 + $0xe0] sm:$0xff] }
  0xad   : > { %v412_v29 = vpop.f32.mrf.mxu0 }
  0xae   : > { %561 = vst.msk [vmem:[#allocation2 + $0x31] sm:$0xff] %vm502_vm1, %v412_v29 }
  0xb0   : > { %4484 = vmatmul.msk.f32.gmra.mxu0 %vm292_vm0, %v278_v30 }
  0xb5   : > { %v415_v34 = vpop.f32.mrf.mxu0 }
  0xb6   : > { %562 = vst.msk [vmem:[#allocation2 + $0x39] sm:$0xff] %vm502_vm1, %v415_v34 }
  0xb8   : > { %4485 = vmatmul.msk.f32.gmra.mxu0 %vm292_vm0, %v279_v35 }
  0xbd   : > { %v418_v38 = vpop.f32.mrf.mxu0 }
  0xbe   : > { %563 = vst.msk [vmem:[#allocation2 + $0x49] sm:$0xff] %vm502_vm1, %v418_v38 }
  0xc0   : > { %4486 = vmatmul.msk.f32.gmra.mxu0 %vm292_vm0, %v280_v39 }
  0xc5   : > { %v421_v40 = vpop.f32.mrf.mxu0 }
  0xc6   : > { %564 = vst.msk [vmem:[#allocation2 + $0x51] sm:$0xff] %vm502_vm1, %v421_v40 }
  0xc8   : > { %4487 = vmatmul.msk.f32.gmra.mxu0 %vm292_vm0, %v281_v41  ;;  %v289_v41 = vld [vmem:[%s8429_s1 + $0xe8] sm:$0xff] }
  0xcd   : > { %v424_v42 = vpop.f32.mrf.mxu0  ;;  %v5424_v43 = vld [vmem:[#allocation2 + $0x50] sm:$0xff]  ;;  %v602_v45 = vld [vmem:[#allocation2 + $0x58] sm:$0x3] }
  0xce   : > { %565 = vst.msk [vmem:[#allocation2 + $0x61] sm:$0xff] %vm502_vm1, %v424_v42  ;;  %4538 = vmatmul.msk.f32.vlgmr.msra.gmra.mxu2 %vm502_vm1, %v5424_v43  ;;  %v8438_v46 = vrot.slane %v5424_v43, 1  ;;  %v713_v47 = vrot.slane %v602_v45, 1  ;;  %v8437_v48 = vrot.slane %v5424_v43, 2  ;;  %v1150_v49 = vrot.slane %v602_v45, 2 }
  0xd0   : > { %4488 = vmatmul.msk.f32.gmra.mxu0 %vm292_vm0, %v282_v44  ;;  %v5438_v50 = vsel %vm694_vm3, %v8438_v46, %v713_v47  ;;  %v5443_v51 = vsel %vm1131_vm4, %v8437_v48, %v1150_v49  ;;  %v290_v49 = vld [vmem:[%s8429_s1 + $0xf0] sm:$0xff] }
  0xd1   : > { %8613 = vst [vmem:[#allocation4_spill] sm:$0xff] %v5438_v50  ;;  %4506 = vmatmul.msk.f32.vlgmr.msra.gmra.mxu1 %vm502_vm1, %v5438_v50  ;;  %4571 = vmatmul.msk.f32.vlgmr.msra.gmra.mxu3 %vm502_vm1, %v5443_v51 }
  0xd5   : > { %v427_v52 = vpop.f32.mrf.mxu0  ;;  %v5449_v53 = vld [vmem:[#allocation2 + $0x60] sm:$0xff] }
  0xd6   : > { %566 = vst.msk [vmem:[#allocation2 + $0x69] sm:$0xff] %vm502_vm1, %v427_v52  ;;  %4539 = vmatmul.msk.f32.gmra.mxu2 %vm502_vm1, %v5449_v53  ;;  %v715_v58 = vrot.slane %v5449_v53, 1  ;;  %v1152_v60 = vrot.slane %v5449_v53, 2 }
  0xd8   : > { %4489 = vmatmul.msk.f32.gmra.mxu0 %vm292_vm0, %v283_v54 }
  0xdd   : > { %v430_v55 = vpop.f32.mrf.mxu0  ;;  %v5458_v56 = vld [vmem:[#allocation2 + $0x68] sm:$0xff]  ;;  %v605_v0 = vld [vmem:[#allocation2 + $0x70] sm:$0x3] }
  0xde   : > { %567 = vst.msk [vmem:[#allocation2 + $0x79] sm:$0xff] %vm502_vm1, %v430_v55  ;;  %4540 = vmatmul.msk.f32.gmra.mxu2 %vm502_vm1, %v5458_v56  ;;  %v716_v59 = vrot.slane %v5458_v56, 1  ;;  %v1153_v61 = vrot.slane %v5458_v56, 2  ;;  %v718_v1 = vrot.slane %v605_v0, 1  ;;  %v1155_v2 = vrot.slane %v605_v0, 2 }
  0xe0   : > { %4490 = vmatmul.msk.f32.gmra.mxu0 %vm292_vm0, %v284_v57  ;;  %v5472_v62 = vsel %vm694_vm3, %v715_v58, %v716_v59  ;;  %v5475_v63 = vsel %vm1131_vm4, %v1152_v60, %v1153_v61  ;;  %v5491_v6 = vsel %vm694_vm3, %v716_v59, %v718_v1  ;;  %v5494_v7 = vsel %vm1131_vm4, %v1153_v61, %v1155_v2 }
  0xe1   : > { %4507 = vmatmul.msk.f32.gmra.mxu1 %vm502_vm1, %v5472_v62  ;;  %4572 = vmatmul.msk.f32.gmra.mxu3 %vm502_vm1, %v5475_v63 }
  0xe5   : > { %v433_v3 = vpop.f32.mrf.mxu0  ;;  %v5481_v4 = vld [vmem:[#allocation2 + $0x78] sm:$0xff] }
  0xe6   : > { %568 = vst.msk [vmem:[#allocation2 + $0x81] sm:$0xff] %vm502_vm1, %v433_v3  ;;  %4541 = vmatmul.msk.f32.gmra.mxu2 %vm502_vm1, %v5481_v4  ;;  %v720_v11 = vrot.slane %v5481_v4, 1  ;;  %v1157_v13 = vrot.slane %v5481_v4, 2  ;;  %v291_v3 = vld [vmem:[%s8429_s1 + $0xf8] sm:$0xff] }
  0xe8   : > { %4491 = vmatmul.msk.f32.gmra.mxu0 %vm292_vm0, %v285_v5  ;;  %v5615_v5 = vld [vmem:[#allocation2] sm:$0xff] }
  0xe9   : > { %4508 = vmatmul.msk.f32.gmra.mxu1 %vm502_vm1, %v5491_v6  ;;  %4573 = vmatmul.msk.f32.gmra.mxu3 %vm502_vm1, %v5494_v7 }
  0xed   : > { %v436_v8 = vpop.f32.mrf.mxu0  ;;  %v5500_v9 = vld [vmem:[#allocation2 + $0x80] sm:$0xff]  ;;  %v608_v17 = vld [vmem:[#allocation2 + $0x88] sm:$0x3] }
  0xee   : > { %569 = vst.msk [vmem:[#allocation2 + $0x91] sm:$0xff] %vm502_vm1, %v436_v8  ;;  %4542 = vmatmul.msk.f32.gmra.mxu2 %vm502_vm1, %v5500_v9  ;;  %v721_v12 = vrot.slane %v5500_v9, 1  ;;  %v1158_v14 = vrot.slane %v5500_v9, 2  ;;  %v723_v18 = vrot.slane %v608_v17, 1  ;;  %v1160_v19 = vrot.slane %v608_v17, 2  ;;  %v5617_v8 = vld [vmem:[#allocation2 + $0x8] sm:$0xff] }
  0xf0   : > { %4492 = vmatmul.msk.f32.gmra.mxu0 %vm292_vm0, %v286_v10  ;;  %v5514_v15 = vsel %vm694_vm3, %v720_v11, %v721_v12  ;;  %v5517_v16 = vsel %vm1131_vm4, %v1157_v13, %v1158_v14  ;;  %v5533_v24 = vsel %vm694_vm3, %v721_v12, %v723_v18  ;;  %v5536_v25 = vsel %vm1131_vm4, %v1158_v14, %v1160_v19  ;;  %v5635_v19 = vld [vmem:[#allocation2 + $0x10] sm:$0x3] }
  0xf1   : > { %4509 = vmatmul.msk.f32.gmra.mxu1 %vm502_vm1, %v5514_v15  ;;  %4574 = vmatmul.msk.f32.gmra.mxu3 %vm502_vm1, %v5517_v16  ;;  %v695_v12 = vrot.slane %v5615_v5, 1  ;;  %v696_v13 = vrot.slane %v5617_v8, 1 }
  0xf3   : > { %v697_v18 = vsel %vm694_vm3, %v695_v12, %v696_v13 }
  0xf5   : > { %v439_v20 = vpop.f32.mrf.mxu0  ;;  %v5523_v22 = vld [vmem:[#allocation2 + $0x90] sm:$0xff] }
  0xf6   : > { %570 = vst.msk [vmem:[#allocation2 + $0x99] sm:$0xff] %vm502_vm1, %v439_v20  ;;  %4543 = vmatmul.msk.f32.gmra.mxu2 %vm502_vm1, %v5523_v22  ;;  %v725_v29 = vrot.slane %v5523_v22, 1  ;;  %v1162_v31 = vrot.slane %v5523_v22, 2 }
  0xf8   : > { %4493 = vmatmul.msk.f32.gmra.mxu0 %vm292_vm0, %v287_v23 }
  0xf9   : > { %4510 = vmatmul.msk.f32.gmra.mxu1 %vm502_vm1, %v5533_v24  ;;  %4575 = vmatmul.msk.f32.gmra.mxu3 %vm502_vm1, %v5536_v25 }
  0xfd   : > { %v442_v26 = vpop.f32.mrf.mxu0  ;;  %v5542_v27 = vld [vmem:[#allocation2 + $0x98] sm:$0xff]  ;;  %v611_v36 = vld [vmem:[#allocation2 + $0xa0] sm:$0x3] }
  0xfe   : > { %571 = vst.msk [vmem:[#allocation2 + $0xa9] sm:$0xff] %vm502_vm1, %v442_v26  ;;  %4544 = vmatmul.msk.f32.gmra.mxu2 %vm502_vm1, %v5542_v27  ;;  %v726_v30 = vrot.slane %v5542_v27, 1  ;;  %v1163_v32 = vrot.slane %v5542_v27, 2  ;;  %v728_v37 = vrot.slane %v611_v36, 1  ;;  %v1165_v38 = vrot.slane %v611_v36, 2 }
 0x100   : > { %4494 = vmatmul.msk.f32.gmra.mxu0 %vm292_vm0, %v288_v28  ;;  %v5556_v34 = vsel %vm694_vm3, %v725_v29, %v726_v30  ;;  %v5559_v35 = vsel %vm1131_vm4, %v1162_v31, %v1163_v32  ;;  %v5575_v42 = vsel %vm694_vm3, %v726_v30, %v728_v37  ;;  %v5578_v44 = vsel %vm1131_vm4, %v1163_v32, %v1165_v38 }
 0x101   : > { %4511 = vmatmul.msk.f32.gmra.mxu1 %vm502_vm1, %v5556_v34  ;;  %4576 = vmatmul.msk.f32.gmra.mxu3 %vm502_vm1, %v5559_v35  ;;  %v698_v31 = vrot.slane %v5635_v19, 1 }
 0x105   : > { %v445_v39 = vpop.f32.mrf.mxu0  ;;  %v5565_v40 = vld [vmem:[#allocation2 + $0xa8] sm:$0xff] }
 0x106   : > { %572 = vst.msk [vmem:[#allocation2 + $0xb1] sm:$0xff] %vm502_vm1, %v445_v39  ;;  %4545 = vmatmul.msk.f32.gmra.mxu2 %vm502_vm1, %v5565_v40  ;;  %v730_v52 = vrot.slane %v5565_v40, 1  ;;  %v1167_v55 = vrot.slane %v5565_v40, 2 }
 0x108   : > { %4495 = vmatmul.msk.f32.gmra.mxu0 %vm292_vm0, %v289_v41  ;;  %v699_v41 = vsel %vm694_vm3, %v696_v13, %v698_v31 }
 0x109   : > { %4512 = vmatmul.msk.f32.gmra.mxu1 %vm502_vm1, %v5575_v42  ;;  %4577 = vmatmul.msk.f32.gmra.mxu3 %vm502_vm1, %v5578_v44 }
 0x10d   : > { %v448_v45 = vpop.f32.mrf.mxu0  ;;  %v5584_v47 = vld [vmem:[#allocation2 + $0xb0] sm:$0xff]  ;;  %v614_v60 = vld [vmem:[#allocation2 + $0xb8] sm:$0x3] }
 0x10e   : > { %573 = vst.msk [vmem:[#allocation2 + $0xc1] sm:$0xff] %vm502_vm1, %v448_v45  ;;  %4546 = vmatmul.msk.f32.gmra.mxu2 %vm502_vm1, %v5584_v47  ;;  %v731_v54 = vrot.slane %v5584_v47, 1  ;;  %v1168_v57 = vrot.slane %v5584_v47, 2  ;;  %v733_v61 = vrot.slane %v614_v60, 1  ;;  %v1170_v0 = vrot.slane %v614_v60, 2 }
 0x110   : > { %4496 = vmatmul.msk.f32.gmra.mxu0 %vm292_vm0, %v290_v49  ;;  %v5598_v58 = vsel %vm694_vm3, %v730_v52, %v731_v54  ;;  %v5601_v59 = vsel %vm1131_vm4, %v1167_v55, %v1168_v57  ;;  %v5621_v10 = vsel %vm694_vm3, %v731_v54, %v733_v61  ;;  %v5624_v11 = vsel %vm1131_vm4, %v1168_v57, %v1170_v0  ;;  %v5676_v52 = vld [vmem:[#allocation2 + $0x18] sm:$0xff] }
 0x111   : > { %4513 = vmatmul.msk.f32.gmra.mxu1 %vm502_vm1, %v5598_v58  ;;  %4578 = vmatmul.msk.f32.gmra.mxu3 %vm502_vm1, %v5601_v59  ;;  %v700_v60 = vrot.slane %v5676_v52, 1 }
 0x115   : > { %v451_v1 = vpop.f32.mrf.mxu0  ;;  %v5607_v2 = vld [vmem:[#allocation2 + $0xc0] sm:$0xff] }
 0x116   : > { %574 = vst.msk [vmem:[#allocation2 + $0xc9] sm:$0xff] %vm502_vm1, %v451_v1  ;;  %4547 = vmatmul.msk.f32.gmra.mxu2 %vm502_vm1, %v5607_v2  ;;  %v735_v20 = vrot.slane %v5607_v2, 1  ;;  %v1172_v26 = vrot.slane %v5607_v2, 2 }
 0x118   : > { %4497 = vmatmul.msk.f32.gmra.mxu0 %vm292_vm0, %v291_v3 }
 0x119   : > { %4514 = vmatmul.msk.f32.gmra.mxu1 %vm502_vm1, %v5621_v10  ;;  %4579 = vmatmul.msk.f32.gmra.mxu3 %vm502_vm1, %v5624_v11 }
 0x11d   : > { %v454_v14 = vpop.f32.mrf.mxu0  ;;  %v5632_v17 = vld [vmem:[#allocation2 + $0xc8] sm:$0xff]  ;;  %v617_v32 = vld [vmem:[#allocation2 + $0xd0] sm:$0x3] }
 0x11e   : > { %575 = vst.msk [vmem:[#allocation2 + $0xd9] sm:$0xff] %vm502_vm1, %v454_v14  ;;  %4548 = vmatmul.msk.f32.gmra.mxu2 %vm502_vm1, %v5632_v17  ;;  %v736_v23 = vrot.slane %v5632_v17, 1  ;;  %v1173_v28 = vrot.slane %v5632_v17, 2  ;;  %v738_v36 = vrot.slane %v617_v32, 1  ;;  %v1175_v37 = vrot.slane %v617_v32, 2 }
 0x120   : > { %4499 = vmatmul.msk.f32.vlgmr.msrb.gmra.mxu0 %vm502_vm1, %v697_v18  ;;  %v5646_v29 = vsel %vm694_vm3, %v735_v20, %v736_v23  ;;  %v5649_v30 = vsel %vm1131_vm4, %v1172_v26, %v1173_v28  ;;  %v5665_v45 = vsel %vm694_vm3, %v736_v23, %v738_v36  ;;  %v5668_v49 = vsel %vm1131_vm4, %v1173_v28, %v1175_v37  ;;  %v5700_v18 = vld [vmem:[#allocation2 + $0x28] sm:$0x3] }
 0x121   : > { %8614 = vst [vmem:[#allocation5_spill] sm:$0xff] %v5646_v29  ;;  %4515 = vmatmul.msk.f32.gmra.mxu1 %vm502_vm1, %v5646_v29  ;;  %4580 = vmatmul.msk.f32.gmra.mxu3 %vm502_vm1, %v5649_v30  ;;  %v703_v23 = vrot.slane %v5700_v18, 1 }
 0x122   : > { %1293 = vmatpush.msrb.mxu0 %v5391_v33  ;;  %8616 = vst [vmem:[#allocation7_spill] sm:$0xff] %v5665_v45  ;;  %v5670_v33 = vld [vmem:[#allocation2 + $0x20] sm:$0xff] }
 0x123   : > { %8617 = vst [vmem:[#allocation8_spill] sm:$0xff] %v5668_v49  ;;  %v701_v54 = vrot.slane %v5670_v33, 1 }
 0x125   : > { %v457_v38 = vpop.f32.mrf.mxu0  ;;  %v5657_v39 = vld [vmem:[#allocation2 + $0xd8] sm:$0xff]  ;;  %v5690_v12 = vsel %vm694_vm3, %v700_v60, %v701_v54  ;;  %v5713_v36 = vsel %vm694_vm3, %v701_v54, %v703_v23 }
 0x126   : > { %8615 = vst [vmem:[#allocation6_spill] sm:$0xff] %v5657_v39  ;;  %4549 = vmatmul.msk.f32.gmra.mxu2 %vm502_vm1, %v5657_v39  ;;  %v740_v61 = vrot.slane %v5657_v39, 1  ;;  %v1177_v1 = vrot.slane %v5657_v39, 2 }
 0x127   : > { %576 = vst.msk [vmem:[#allocation2 + $0xe1] sm:$0xff] %vm502_vm1, %v457_v38 }
 0x128   : > { %4500 = vmatmul.msk.f32.gmra.mxu0 %vm502_vm1, %v699_v41  ;;  %v5723_v41 = vld [vmem:[#allocation2 + $0x38] sm:$0xff] }
 0x129   : > { %4516 = vmatmul.msk.f32.gmra.mxu1 %vm502_vm1, %v5665_v45  ;;  %4581 = vmatmul.msk.f32.gmra.mxu3 %vm502_vm1, %v5668_v49  ;;  %v706_v54 = vrot.slane %v5723_v41, 1 }
 0x12d   : > { %v460_v55 = vpop.f32.mrf.mxu0 }
 0x12e   : > { %v5679_v57 = vld [vmem:[#allocation2 + $0xe0] sm:$0xff]  ;;  %577 = vst.msk [vmem:[#allocation2 + $0xf1] sm:$0xff] %vm502_vm1, %v460_v55  ;;  %v620_v20 = vld [vmem:[#allocation2 + $0xe8] sm:$0x3]  ;;  %v5729_v55 = vld [vmem:[#allocation2 + $0x30] sm:$0xff] }
 0x12f   : > { %8618 = vst [vmem:[#allocation9_spill] sm:$0xff] %v5679_v57  ;;  %4550 = vmatmul.msk.f32.gmra.mxu2 %vm502_vm1, %v5679_v57  ;;  %v741_v0 = vrot.slane %v5679_v57, 1  ;;  %v1178_v3 = vrot.slane %v5679_v57, 2  ;;  %v743_v26 = vrot.slane %v620_v20, 1  ;;  %v1180_v28 = vrot.slane %v620_v20, 2 }
 0x130   : > { %4501 = vmatmul.msk.f32.gmra.mxu0 %vm502_vm1, %v5690_v12 }
 0x131   : > { %v5695_v13 = vsel %vm694_vm3, %v740_v61, %v741_v0  ;;  %v5698_v14 = vsel %vm1131_vm4, %v1177_v1, %v1178_v3  ;;  %v5718_v37 = vsel %vm694_vm3, %v741_v0, %v743_v26  ;;  %v5721_v38 = vsel %vm1131_vm4, %v1178_v3, %v1180_v28 }
 0x132   : > { %8619 = vst [vmem:[#allocation10_spill] sm:$0xff] %v5695_v13  ;;  %4517 = vmatmul.msk.f32.gmra.mxu1 %vm502_vm1, %v5695_v13  ;;  %4582 = vmatmul.msk.f32.gmra.mxu3 %vm502_vm1, %v5698_v14  ;;  %v705_v0 = vrot.slane %v5729_v55, 1 }
 0x133   : > { %8620 = vst [vmem:[#allocation11_spill] sm:$0xff] %v5698_v14 }
 0x134   : > { %8622 = vst [vmem:[#allocation13_spill] sm:$0xff] %v5718_v37  ;;  %v5743_v26 = vsel %vm694_vm3, %v705_v0, %v706_v54  ;;  %v4662_v0 = vld [vmem:[%s8430_s2 + $0x28] sm:$0xff] }
 0x135   : > { %v463_v31 = vpop.f32.mrf.mxu0  ;;  %v5707_v32 = vld [vmem:[#allocation2 + $0xf0] sm:$0xff]  ;;  %8623 = vst [vmem:[#allocation14_spill] sm:$0xff] %v5721_v38  ;;  %1759 = vmatpush.msrb.mxu3 %v4662_v0 }
 0x136   : > { %8621 = vst [vmem:[#allocation12_spill] sm:$0xff] %v5707_v32  ;;  %v745_v1 = vrot.slane %v5707_v32, 1  ;;  %v1182_v20 = vrot.slane %v5707_v32, 2 }
 0x137   : > { %578 = vst.msk [vmem:[#allocation2 + $0xf9] sm:$0xff] %vm502_vm1, %v463_v31  ;;  %4551 = vmatmul.msk.f32.gmra.mxu2 %vm502_vm1, %v5707_v32 }
 0x138   : > { %4502 = vmatmul.msk.f32.gmra.mxu0 %vm502_vm1, %v5713_v36 }
 0x13a   : > { %4518 = vmatmul.msk.f32.gmra.mxu1 %vm502_vm1, %v5718_v37  ;;  %4583 = vmatmul.msk.f32.gmra.mxu3 %vm502_vm1, %v5721_v38 }
 0x13d   : > { %v466_v60 = vpop.f32.mrf.mxu0 }
 0x13e   : > { %v5732_v61 = vld [vmem:[#allocation2 + $0xf8] sm:$0xff]  ;;  %579 = vst.msk [vmem:[#allocation2 + $0x109] sm:$0xff] %vm502_vm1, %v466_v60  ;;  %v5753_v60 = vld [vmem:[#allocation2 + $0x40] sm:$0x3] }
 0x13f   : > { %8624 = vst [vmem:[#allocation15_spill] sm:$0xff] %v5732_v61  ;;  %4552 = vmatmul.msk.f32.gmra.mxu2 %vm502_vm1, %v5732_v61  ;;  %v746_v3 = vrot.slane %v5732_v61, 1  ;;  %v1183_v23 = vrot.slane %v5732_v61, 2  ;;  %v623_v21 = vld [vmem:[#allocation2 + $0x100] sm:$0x3] }
 0x140   : > { %4503 = vmatmul.msk.f32.gmra.mxu0 %vm502_vm1, %v5743_v26  ;;  %v748_v48 = vrot.slane %v623_v21, 1  ;;  %v1185_v46 = vrot.slane %v623_v21, 2  ;;  %v5783_v21 = vld [vmem:[#allocation2 + $0x48] sm:$0xff] }
 0x141   : > { %v5748_v28 = vsel %vm694_vm3, %v745_v1, %v746_v3  ;;  %v5751_v31 = vsel %vm1131_vm4, %v1182_v20, %v1183_v23  ;;  %v708_v1 = vrot.slane %v5753_v60, 1 }
 0x142   : > { %8625 = vst [vmem:[#allocation16_spill] sm:$0xff] %v5748_v28  ;;  %4519 = vmatmul.msk.f32.gmra.mxu1 %vm502_vm1, %v5748_v28  ;;  %4584 = vmatmul.msk.f32.gmra.mxu3 %vm502_vm1, %v5751_v31  ;;  %v5774_v0 = vsel %vm694_vm3, %v746_v3, %v748_v48  ;;  %v5777_v32 = vsel %vm1131_vm4, %v1183_v23, %v1185_v46 }
 0x143   : > { %8626 = vst [vmem:[#allocation17_spill] sm:$0xff] %v5751_v31  ;;  %v5769_v31 = vsel %vm694_vm3, %v706_v54, %v708_v1  ;;  %v710_v1 = vrot.slane %v5783_v21, 1 }
 0x144   : > { %8628 = vst [vmem:[#allocation19_spill] sm:$0xff] %v5774_v0 }
 0x145   : > { %v469_v20 = vpop.f32.mrf.mxu0  ;;  %v5763_v61 = vld [vmem:[#allocation2 + $0x108] sm:$0xff]  ;;  %8629 = vst [vmem:[#allocation20_spill] sm:$0xff] %v5777_v32 }
 0x146   : > { %8627 = vst [vmem:[#allocation18_spill] sm:$0xff] %v5763_v61  ;;  %v750_v46 = vrot.slane %v5763_v61, 1  ;;  %v1187_v3 = vrot.slane %v5763_v61, 2 }
 0x147   : > { %580 = vst.msk [vmem:[#allocation2 + $0x111] sm:$0xff] %vm502_vm1, %v469_v20  ;;  %4553 = vmatmul.msk.f32.gmra.mxu2 %vm502_vm1, %v5763_v61 }
 0x148   : > { %4504 = vmatmul.msk.f32.gmra.mxu0 %vm502_vm1, %v5769_v31 }
 0x14a   : > { %4520 = vmatmul.msk.f32.gmra.mxu1 %vm502_vm1, %v5774_v0  ;;  %4585 = vmatmul.msk.f32.gmra.mxu3 %vm502_vm1, %v5777_v32  ;;  %v8631_v32 = vrot.slane %v5424_v43, 1 }
 0x14c   : > { %v5798_v0 = vsel %vm694_vm3, %v710_v1, %v8631_v32 }
 0x14d   : > { %v472_v20 = vpop.f32.mrf.mxu0  ;;  %8632 = vst [vmem:[#allocation22_spill] sm:$0xff] %v5798_v0 }
 0x14e   : > { %v5785_v54 = vld [vmem:[#allocation2 + $0x110] sm:$0xff]  ;;  %581 = vst.msk [vmem:[#allocation2 + $0x121] sm:$0xff] %vm502_vm1, %v472_v20  ;;  %v5816_v14 = vpop.f32.mrf.mxu1 }
 0x14f   : > { %8630 = vst [vmem:[#allocation21_spill] sm:$0xff] %v5785_v54  ;;  %4554 = vmatmul.msk.f32.gmra.mxu2 %vm502_vm1, %v5785_v54  ;;  %v751_v48 = vrot.slane %v5785_v54, 1  ;;  %v1188_v23 = vrot.slane %v5785_v54, 2  ;;  %v626_v54 = vld [vmem:[#allocation2 + $0x118] sm:$0x3] }
 0x150   : > { %4505 = vmatmul.msk.f32.gmra.mxu0 %vm502_vm1, %v5798_v0  ;;  %v753_v32 = vrot.slane %v626_v54, 1  ;;  %v1190_v1 = vrot.slane %v626_v54, 2  ;;  %8637 = vst [vmem:[#allocation27_spill] sm:$0xff] %v5816_v14 }
 0x151   : > { %v5803_v20 = vsel %vm694_vm3, %v750_v46, %v751_v48  ;;  %v5806_v38 = vsel %vm1131_vm4, %v1187_v3, %v1188_v23  ;;  %v5810_v61 = vpop.f32.mrf.mxu2 }
 0x152   : > { %8633 = vst [vmem:[#allocation23_spill] sm:$0xff] %v5803_v20  ;;  %4521 = vmatmul.msk.f32.gmra.mxu1 %vm502_vm1, %v5803_v20  ;;  %4586 = vmatmul.msk.f32.gmra.mxu3 %vm502_vm1, %v5806_v38  ;;  %v5824_v46 = vsel %vm694_vm3, %v751_v48, %v753_v32  ;;  %v5827_v3 = vsel %vm1131_vm4, %v1188_v23, %v1190_v1 }
 0x153   : > { %8634 = vst [vmem:[#allocation24_spill] sm:$0xff] %v5806_v38 }
 0x154   : > { %8635 = vst [vmem:[#allocation25_spill] sm:$0xff] %v5810_v61 }
 0x155   : > { %v475_v57 = vpop.f32.mrf.mxu0  ;;  %v5814_v28 = vld [vmem:[#allocation2 + $0x120] sm:$0xff]  ;;  %8638 = vst [vmem:[#allocation28_spill] sm:$0xff] %v5824_v46 }
 0x156   : > { %8636 = vst [vmem:[#allocation26_spill] sm:$0xff] %v5814_v28  ;;  %v755_v48 = vrot.slane %v5814_v28, 1  ;;  %v1192_v32 = vrot.slane %v5814_v28, 2 }
 0x157   : > { %582 = vst.msk [vmem:[#allocation2 + $0x129] sm:$0xff] %vm502_vm1, %v475_v57  ;;  %4555 = vmatmul.msk.f32.gmra.mxu2 %vm502_vm1, %v5814_v28  ;;  %v5833_v57 = vpop.f32.mrf.mxu3 }
 0x158   : > { %4531 = vmatmul.msk.f32.vlgmr.msra.gmra.mxu0 %vm502_vm1, %v5615_v5  ;;  %8639 = vst [vmem:[#allocation29_spill] sm:$0xff] %v5827_v3 }
 0x159   : > { %v1059_v54 = vpop.f32.mrf.mxu2  ;;  %8640 = vst [vmem:[#allocation30_spill] sm:$0xff] %v5833_v57 }
 0x15a   : > { %4522 = vmatmul.msk.f32.gmra.mxu1 %vm502_vm1, %v5824_v46  ;;  %4587 = vmatmul.msk.f32.gmra.mxu3 %vm502_vm1, %v5827_v3 }
 0x15d   : > { %v478_v61 = vpop.f32.mrf.mxu0 }
 0x15e   : > { %v5835_v14 = vld [vmem:[#allocation2 + $0x128] sm:$0xff]  ;;  %583 = vst.msk [vmem:[#allocation2 + $0x139] sm:$0xff] %vm502_vm1, %v478_v61  ;;  %v882_v38 = vpop.f32.mrf.mxu1  ;;  %v629_v46 = vld [vmem:[#allocation2 + $0x130] sm:$0x3] }
 0x15f   : > { %8641 = vst [vmem:[#allocation31_spill] sm:$0xff] %v5835_v14  ;;  %4556 = vmatmul.msk.f32.gmra.mxu2 %vm502_vm1, %v5835_v14  ;;  %v756_v23 = vrot.slane %v5835_v14, 1  ;;  %v1193_v1 = vrot.slane %v5835_v14, 2  ;;  %v1060_v28 = vadd.f32 %v1059_v54, %v882_v38  ;;  %v758_v14 = vrot.slane %v629_v46, 1 }
 0x160   : > { %4532 = vmatmul.msk.f32.gmra.mxu0 %vm502_vm1, %v5617_v8  ;;  %v1195_v39 = vrot.slane %v629_v46, 2 }
 0x161   : > { %v5847_v57 = vsel %vm694_vm3, %v755_v48, %v756_v23  ;;  %v5850_v61 = vsel %vm1131_vm4, %v1192_v32, %v1193_v1  ;;  %v1062_v3 = vpop.f32.mrf.mxu2 }
 0x162   : > { %8642 = vst [vmem:[#allocation32_spill] sm:$0xff] %v5847_v57  ;;  %4523 = vmatmul.msk.f32.gmra.mxu1 %vm502_vm1, %v5847_v57  ;;  %4588 = vmatmul.msk.f32.gmra.mxu3 %vm502_vm1, %v5850_v61  ;;  %v5869_v38 = vsel %vm1131_vm4, %v1193_v1, %v1195_v39 }
 0x163   : > { %8643 = vst [vmem:[#allocation33_spill] sm:$0xff] %v5850_v61  ;;  %v5866_v61 = vsel %vm694_vm3, %v756_v23, %v758_v14 }
 0x164   : > { %v1319_v20 = vpop.f32.mrf.mxu3  ;;  %8646 = vst [vmem:[#allocation36_spill] sm:$0xff] %v5866_v61 }
 0x165   : > { %v5856_v37 = vadd.f32 %v1319_v20, %v1060_v28  ;;  %v481_v49 = vpop.f32.mrf.mxu0  ;;  %v5858_v48 = vld [vmem:[#allocation2 + $0x138] sm:$0xff]  ;;  %8647 = vst [vmem:[#allocation37_spill] sm:$0xff] %v5869_v38 }
 0x166   : > { %8645 = vst [vmem:[#allocation35_spill] sm:$0xff] %v5858_v48  ;;  %v885_v32 = vpop.f32.mrf.mxu1  ;;  %v760_v39 = vrot.slane %v5858_v48, 1  ;;  %v1197_v1 = vrot.slane %v5858_v48, 2 }
 0x167   : > { %8644 = vst [vmem:[#allocation34_spill] sm:$0xff] %v5856_v37  ;;  %4557 = vmatmul.msk.f32.gmra.mxu2 %vm502_vm1, %v5858_v48 }
 0x168   : > { %584 = vst.msk [vmem:[#allocation2 + $0x141] sm:$0xff] %vm502_vm1, %v481_v49  ;;  %4533 = vmatmul.msk.f32.gmra.mxu0 %vm502_vm1, %v5676_v52  ;;  %v1063_v49 = vadd.f32 %v1062_v3, %v885_v32 }
 0x169   : > { %v1065_v28 = vpop.f32.mrf.mxu2 }
 0x16a   : > { %4524 = vmatmul.msk.f32.gmra.mxu1 %vm502_vm1, %v5866_v61  ;;  %4589 = vmatmul.msk.f32.gmra.mxu3 %vm502_vm1, %v5869_v38 }
 0x16c   : > { %v1322_v20 = vpop.f32.mrf.mxu3 }
 0x16d   : > { %v5875_v46 = vadd.f32 %v1322_v20, %v1063_v49  ;;  %v484_v54 = vpop.f32.mrf.mxu0 }
 0x16e   : > { %585 = vst.msk [vmem:[#allocation2 + $0x151] sm:$0xff] %vm502_vm1, %v484_v54  ;;  %v888_v14 = vpop.f32.mrf.mxu1 }
 0x16f   : > { %8648 = vst [vmem:[#allocation38_spill] sm:$0xff] %v5875_v46  ;;  %v5877_v37 = vld [vmem:[#allocation2 + $0x140] sm:$0xff]  ;;  %v632_v54 = vld [vmem:[#allocation2 + $0x148] sm:$0x3]  ;;  %v1066_v46 = vadd.f32 %v1065_v28, %v888_v14 }
 0x170   : > { %8649 = vst [vmem:[#allocation39_spill] sm:$0xff] %v5877_v37  ;;  %4558 = vmatmul.msk.f32.gmra.mxu2 %vm502_vm1, %v5877_v37  ;;  %v761_v23 = vrot.slane %v5877_v37, 1  ;;  %v1198_v3 = vrot.slane %v5877_v37, 2  ;;  %4534 = vmatmul.msk.f32.gmra.mxu0 %vm502_vm1, %v5670_v33  ;;  %v763_v37 = vrot.slane %v632_v54, 1  ;;  %v1200_v38 = vrot.slane %v632_v54, 2 }
 0x171   : > { %v1068_v20 = vpop.f32.mrf.mxu2 }
 0x172   : > { %v5889_v32 = vsel %vm694_vm3, %v760_v39, %v761_v23  ;;  %v5892_v49 = vsel %vm1131_vm4, %v1197_v1, %v1198_v3  ;;  %v5911_v28 = vsel %vm1131_vm4, %v1198_v3, %v1200_v38 }
 0x173   : > { %8650 = vst [vmem:[#allocation40_spill] sm:$0xff] %v5889_v32  ;;  %4525 = vmatmul.msk.f32.gmra.mxu1 %vm502_vm1, %v5889_v32  ;;  %4590 = vmatmul.msk.f32.gmra.mxu3 %vm502_vm1, %v5892_v49 }
 0x174   : > { %8651 = vst [vmem:[#allocation41_spill] sm:$0xff] %v5892_v49  ;;  %v1325_v48 = vpop.f32.mrf.mxu3  ;;  %v5908_v49 = vsel %vm694_vm3, %v761_v23, %v763_v37  ;;  %v4761_v37 = vld [vmem:[%s8430_s2 + $0x40] sm:$0xff] }
 0x175   : > { %v5898_v61 = vadd.f32 %v1325_v48, %v1066_v46  ;;  %v487_v57 = vpop.f32.mrf.mxu0  ;;  %v5900_v39 = vld [vmem:[#allocation2 + $0x150] sm:$0xff]  ;;  %8654 = vst [vmem:[#allocation44_spill] sm:$0xff] %v5908_v49  ;;  %2225 = vmatpush.msra.mxu2 %v4761_v37  ;;  %v4728_v37 = vld [vmem:[%s8430_s2 + $0x38] sm:$0xff] }
 0x176   : > { %8653 = vst [vmem:[#allocation43_spill] sm:$0xff] %v5900_v39  ;;  %v891_v1 = vpop.f32.mrf.mxu1  ;;  %v765_v23 = vrot.slane %v5900_v39, 1  ;;  %2069 = vmatpush.msra.mxu1 %v4728_v37 }
 0x177   : > { %8652 = vst [vmem:[#allocation42_spill] sm:$0xff] %v5898_v61 }
 0x178   : > { %586 = vst.msk [vmem:[#allocation2 + $0x159] sm:$0xff] %vm502_vm1, %v487_v57  ;;  %4559 = vmatmul.msk.f32.gmra.mxu2 %vm502_vm1, %v5900_v39  ;;  %4535 = vmatmul.msk.f32.gmra.mxu0 %vm502_vm1, %v5729_v55  ;;  %v1069_v57 = vadd.f32 %v1068_v20, %v891_v1  ;;  %v1202_v20 = vrot.slane %v5900_v39, 2 }
 0x179   : > { %8655 = vst [vmem:[#allocation45_spill] sm:$0xff] %v5911_v28  ;;  %v1071_v48 = vpop.f32.mrf.mxu2 }
 0x17b   : > { %4526 = vmatmul.msk.f32.gmra.mxu1 %vm502_vm1, %v5908_v49  ;;  %4591 = vmatmul.msk.f32.gmra.mxu3 %vm502_vm1, %v5911_v28 }
 0x17c   : > { %v1328_v46 = vpop.f32.mrf.mxu3 }
 0x17d   : > { %v5917_v14 = vadd.f32 %v1328_v46, %v1069_v57  ;;  %v490_v54 = vpop.f32.mrf.mxu0 }
 0x17e   : > { %587 = vst.msk [vmem:[#allocation2 + $0x169] sm:$0xff] %vm502_vm1, %v490_v54  ;;  %v894_v38 = vpop.f32.mrf.mxu1 }
 0x17f   : > { %8656 = vst [vmem:[#allocation46_spill] sm:$0xff] %v5917_v14  ;;  %v5919_v61 = vld [vmem:[#allocation2 + $0x158] sm:$0xff]  ;;  %v635_v14 = vld [vmem:[#allocation2 + $0x160] sm:$0x3] }
 0x180   : > { %8657 = vst [vmem:[#allocation47_spill] sm:$0xff] %v5919_v61  ;;  %4560 = vmatmul.msk.f32.gmra.mxu2 %vm502_vm1, %v5919_v61  ;;  %v766_v3 = vrot.slane %v5919_v61, 1  ;;  %v1203_v1 = vrot.slane %v5919_v61, 2  ;;  %4536 = vmatmul.msk.f32.gmra.mxu0 %vm502_vm1, %v5723_v41  ;;  %v1072_v61 = vadd.f32 %v1071_v48, %v894_v38  ;;  %v1205_v28 = vrot.slane %v635_v14, 2 }
 0x181   : > { %v1074_v54 = vpop.f32.mrf.mxu2 }
 0x182   : > { %v5934_v57 = vsel %vm694_vm3, %v765_v23, %v766_v3  ;;  %v5937_v46 = vsel %vm1131_vm4, %v1202_v20, %v1203_v1  ;;  %v768_v23 = vrot.slane %v635_v14, 1  ;;  %v5959_v48 = vsel %vm1131_vm4, %v1203_v1, %v1205_v28 }
 0x183   : > { %8658 = vst [vmem:[#allocation48_spill] sm:$0xff] %v5934_v57  ;;  %4527 = vmatmul.msk.f32.gmra.mxu1 %vm502_vm1, %v5934_v57  ;;  %4592 = vmatmul.msk.f32.gmra.mxu3 %vm502_vm1, %v5937_v46  ;;  %v1133_v14 = vrot.slane %v5617_v8, 2 }
 0x184   : > { %8659 = vst [vmem:[#allocation49_spill] sm:$0xff] %v5937_v46  ;;  %v1331_v39 = vpop.f32.mrf.mxu3  ;;  %v5956_v37 = vsel %vm694_vm3, %v766_v3, %v768_v23 }
 0x185   : > { %v5946_v49 = vadd.f32 %v1331_v39, %v1072_v61  ;;  %v493_v20 = vpop.f32.mrf.mxu0  ;;  %v5948_v32 = vld [vmem:[#allocation2 + $0x168] sm:$0xff]  ;;  %8662 = vst [vmem:[#allocation52_spill] sm:$0xff] %v5956_v37  ;;  %v1132_v39 = vrot.slane %v5615_v5, 2 }
 0x186   : > { %8661 = vst [vmem:[#allocation51_spill] sm:$0xff] %v5948_v32  ;;  %v897_v57 = vpop.f32.mrf.mxu1  ;;  %v1207_v8 = vrot.slane %v5948_v32, 2 }
 0x187   : > { %8660 = vst [vmem:[#allocation50_spill] sm:$0xff] %v5946_v49  ;;  %v1075_v38 = vadd.f32 %v1074_v54, %v897_v57  ;;  %v1134_v28 = vsel %vm1131_vm4, %v1132_v39, %v1133_v14 }
 0x188   : > { %588 = vst.msk [vmem:[#allocation2 + $0x171] sm:$0xff] %vm502_vm1, %v493_v20  ;;  %4561 = vmatmul.msk.f32.gmra.mxu2 %vm502_vm1, %v5948_v32  ;;  %4537 = vmatmul.msk.f32.gmra.mxu0 %vm502_vm1, %v5783_v21 }
 0x189   : > { %8663 = vst [vmem:[#allocation53_spill] sm:$0xff] %v5959_v48  ;;  %v1077_v61 = vpop.f32.mrf.mxu2 }
 0x18b   : > { %4528 = vmatmul.msk.f32.gmra.mxu1 %vm502_vm1, %v5956_v37  ;;  %4593 = vmatmul.msk.f32.gmra.mxu3 %vm502_vm1, %v5959_v48  ;;  %v770_v48 = vrot.slane %v5948_v32, 1 }
 0x18c   : > { %v1334_v20 = vpop.f32.mrf.mxu3 }
 0x18d   : > { %v5967_v49 = vadd.f32 %v1334_v20, %v1075_v38  ;;  %v496_v3 = vpop.f32.mrf.mxu0  ;;  %v1135_v20 = vrot.slane %v5635_v19, 2 }
 0x18e   : > { %589 = vst.msk [vmem:[#allocation2 + $0x181] sm:$0xff] %vm502_vm1, %v496_v3  ;;  %v900_v1 = vpop.f32.mrf.mxu1 }
 0x18f   : > { %8664 = vst [vmem:[#allocation54_spill] sm:$0xff] %v5967_v49  ;;  %v5969_v23 = vld [vmem:[#allocation2 + $0x170] sm:$0xff]  ;;  %v638_v3 = vld [vmem:[#allocation2 + $0x178] sm:$0x3]  ;;  %v1078_v49 = vadd.f32 %v1077_v61, %v900_v1 }
 0x190   : > { %8665 = vst [vmem:[#allocation55_spill] sm:$0xff] %v5969_v23  ;;  %4562 = vmatmul.msk.f32.gmra.mxu2 %vm502_vm1, %v5969_v23  ;;  %v771_v5 = vrot.slane %v5969_v23, 1  ;;  %v1208_v57 = vrot.slane %v5969_v23, 2  ;;  %4564 = vmatmul.msk.f32.vlgmr.msrb.gmra.mxu0 %vm502_vm1, %v1134_v28  ;;  %v773_v32 = vrot.slane %v638_v3, 1  ;;  %v1210_v28 = vrot.slane %v638_v3, 2 }
 0x191   : > { %v1080_v38 = vpop.f32.mrf.mxu2 }
 0x192   : > { %v5981_v54 = vsel %vm694_vm3, %v770_v48, %v771_v5  ;;  %v5984_v39 = vsel %vm1131_vm4, %v1207_v8, %v1208_v57  ;;  %v1136_v8 = vsel %vm1131_vm4, %v1133_v14, %v1135_v20  ;;  %v5999_v19 = vsel %vm694_vm3, %v771_v5, %v773_v32 }
 0x193   : > { %8666 = vst [vmem:[#allocation56_spill] sm:$0xff] %v5981_v54  ;;  %4529 = vmatmul.msk.f32.gmra.mxu1 %vm502_vm1, %v5981_v54  ;;  %4594 = vmatmul.msk.f32.gmra.mxu3 %vm502_vm1, %v5984_v39  ;;  %v6002_v61 = vsel %vm1131_vm4, %v1208_v57, %v1210_v28  ;;  %v1137_v32 = vrot.slane %v5676_v52, 2 }
 0x194   : > { %8667 = vst [vmem:[#allocation57_spill] sm:$0xff] %v5984_v39  ;;  %v1337_v23 = vpop.f32.mrf.mxu3 }
 0x195   : > { %v5991_v46 = vadd.f32 %v1337_v23, %v1078_v49  ;;  %v499_v48 = vpop.f32.mrf.mxu0  ;;  %8668 = vst [vmem:[#allocation58_spill] sm:$0xff] %v5999_v19  ;;  %v1138_v23 = vrot.slane %v5670_v33, 2 }
 0x196   : > { %590 = vst.msk [vmem:[#allocation2 + $0x189] sm:$0xff] %vm502_vm1, %v499_v48  ;;  %v903_v37 = vpop.f32.mrf.mxu1 }
 0x197   : > { %v1081_v14 = vadd.f32 %v1080_v38, %v903_v37  ;;  %v1139_v57 = vsel %vm1131_vm4, %v1137_v32, %v1138_v23  ;;  %v1140_v38 = vrot.slane %v5700_v18, 2 }
 0x198   : > { %4630 = vmatmul.msk.f32.vlgmr.msrb.gmra.mxu2 %vm502_vm1, %v5690_v12  ;;  %4565 = vmatmul.msk.f32.gmra.mxu0 %vm502_vm1, %v1136_v8 }
 0x199   : > { %v1083_v49 = vpop.f32.mrf.mxu2 }
 0x19b   : > { %4530 = vmatmul.msk.f32.gmra.mxu1 %vm502_vm1, %v5999_v19  ;;  %4595 = vmatmul.msk.f32.gmra.mxu3 %vm502_vm1, %v6002_v61 }
 0x19c   : > { %v1340_v1 = vpop.f32.mrf.mxu3 }
 0x19d   : > { %v6009_v12 = vadd.f32 %v1340_v1, %v1081_v14  ;;  %v6011_v20 = vpop.f32.mrf.mxu0  ;;  %v1143_v1 = vrot.slane %v5723_v41, 2 }
 0x19e   : > { %v906_v5 = vpop.f32.mrf.mxu1 }
 0x19f   : > { %v1084_v37 = vadd.f32 %v1083_v49, %v906_v5 }
 0x1a0   : > { %4631 = vmatmul.msk.f32.gmra.mxu2 %vm502_vm1, %v5713_v36  ;;  %4566 = vmatmul.msk.f32.gmra.mxu0 %vm502_vm1, %v1139_v57  ;;  %v1141_v36 = vsel %vm1131_vm4, %v1138_v23, %v1140_v38 }
 0x1a1   : > { %v1086_v3 = vpop.f32.mrf.mxu2 }
 0x1a3   : > { %4597 = vmatmul.msk.f32.vlgmr.msrb.gmra.mxu1 %vm502_vm1, %v5676_v52  ;;  %4663 = vmatmul.msk.f32.vlgmr.msrb.gmra.mxu3 %vm502_vm1, %v1139_v57  ;;  %v4695_v52 = vld [vmem:[%s8430_s2 + $0x30] sm:$0xff]  ;;  %v1142_v57 = vrot.slane %v5729_v55, 2 }
 0x1a4   : > { %v1343_v28 = vpop.f32.mrf.mxu3  ;;  %1912 = vmatpush.msra.mxu0 %v4695_v52 }
 0x1a5   : > { %v6022_v48 = vadd.f32 %v1343_v28, %v1084_v37  ;;  %v6024_v8 = vpop.f32.mrf.mxu0  ;;  %v6045_v38 = vsel %vm1131_vm4, %v1142_v57, %v1143_v1  ;;  %v1145_v28 = vrot.slane %v5753_v60, 2 }
 0x1a6   : > { %v909_v14 = vpop.f32.mrf.mxu1 }
 0x1a7   : > { %v1087_v18 = vadd.f32 %v1086_v3, %v909_v14 }
 0x1a8   : > { %4632 = vmatmul.msk.f32.gmra.mxu2 %vm502_vm1, %v5743_v26  ;;  %4567 = vmatmul.msk.f32.gmra.mxu0 %vm502_vm1, %v1141_v36 }
 0x1a9   : > { %v1089_v49 = vpop.f32.mrf.mxu2 }
 0x1ab   : > { %4598 = vmatmul.msk.f32.gmra.mxu1 %vm502_vm1, %v5670_v33  ;;  %4664 = vmatmul.msk.f32.gmra.mxu3 %vm502_vm1, %v1141_v36 }
 0x1ac   : > { %v1346_v32 = vpop.f32.mrf.mxu3 }
 0x1ad   : > { %v6037_v5 = vadd.f32 %v1346_v32, %v1087_v18  ;;  %v6039_v23 = vpop.f32.mrf.mxu0  ;;  %v6061_v32 = vsel %vm1131_vm4, %v1143_v1, %v1145_v28  ;;  %v8670_v28 = vrot.slane %v5424_v43, 2 }
 0x1af   : > { %v912_v37 = vpop.f32.mrf.mxu1 }
 0x1b0   : > { %4633 = vmatmul.msk.f32.gmra.mxu2 %vm502_vm1, %v5769_v31  ;;  %4568 = vmatmul.msk.f32.gmra.mxu0 %vm502_vm1, %v6045_v38  ;;  %v1090_v3 = vadd.f32 %v1089_v49, %v912_v37 }
 0x1b2   : > { %v1092_v33 = vpop.f32.mrf.mxu2 }
 0x1b3   : > { %4599 = vmatmul.msk.f32.gmra.mxu1 %vm502_vm1, %v5729_v55  ;;  %4665 = vmatmul.msk.f32.gmra.mxu3 %vm502_vm1, %v6045_v38 }
 0x1b5   : > { %v1349_v14 = vpop.f32.mrf.mxu3  ;;  %v6056_v52 = vpop.f32.mrf.mxu0 }
 0x1b6   : > { %v6054_v36 = vadd.f32 %v1349_v14, %v1090_v3  ;;  %v1147_v14 = vrot.slane %v5783_v21, 2 }
 0x1b7   : > { %v915_v18 = vpop.f32.mrf.mxu1 }
 0x1b8   : > { %4634 = vmatmul.msk.f32.gmra.mxu2 %vm502_vm1, %v5798_v0  ;;  %4569 = vmatmul.msk.f32.gmra.mxu0 %vm502_vm1, %v6061_v32  ;;  %v1093_v60 = vadd.f32 %v1092_v33, %v915_v18  ;;  %v6079_v0 = vsel %vm1131_vm4, %v1147_v14, %v8670_v28 }
 0x1ba   : > { %v1095_v57 = vpop.f32.mrf.mxu2 }
 0x1bb   : > { %4600 = vmatmul.msk.f32.gmra.mxu1 %vm502_vm1, %v5723_v41  ;;  %4666 = vmatmul.msk.f32.gmra.mxu3 %vm502_vm1, %v6061_v32 }
 0x1bd   : > { %v1352_v49 = vpop.f32.mrf.mxu3  ;;  %v6071_v3 = vpop.f32.mrf.mxu0 }
 0x1be   : > { %v6069_v37 = vadd.f32 %v1352_v49, %v1093_v60 }
 0x1bf   : > { %v918_v1 = vpop.f32.mrf.mxu1 }
 0x1c0   : > { %8669 = vst [vmem:[#allocation59_spill] sm:$0xff] %v6069_v37  ;;  %4635 = vmatmul.msk.f32.gmra.mxu2 %vm502_vm1, %v5438_v50  ;;  %4570 = vmatmul.msk.f32.gmra.mxu0 %vm502_vm1, %v6079_v0  ;;  %v1096_v18 = vadd.f32 %v1095_v57, %v918_v1 }
 0x1c2   : > { %v1098_v33 = vpop.f32.mrf.mxu2 }
 0x1c3   : > { %4601 = vmatmul.msk.f32.gmra.mxu1 %vm502_vm1, %v5783_v21  ;;  %4667 = vmatmul.msk.f32.gmra.mxu3 %vm502_vm1, %v6079_v0 }
 0x1c5   : > { %v1355_v60 = vpop.f32.mrf.mxu3  ;;  %v6089_v50 = vpop.f32.mrf.mxu0 }
 0x1c6   : > { %v6087_v49 = vadd.f32 %v1355_v60, %v1096_v18 }
 0x1c7   : > { %v921_v37 = vpop.f32.mrf.mxu1 }
 0x1c8   : > { %4636 = vmatmul.msk.f32.gmra.mxu2 %vm502_vm1, %v5472_v62  ;;  %4696 = vmatmul.msk.f32.vlgmr.msra.gmra.mxu0 %vm502_vm1, %v5729_v55  ;;  %v1099_v57 = vadd.f32 %v1098_v33, %v921_v37 }
 0x1ca   : > { %v1101_v14 = vpop.f32.mrf.mxu2 }
 0x1cb   : > { %4602 = vmatmul.msk.f32.gmra.mxu1 %vm502_vm1, %v5424_v43  ;;  %4668 = vmatmul.msk.f32.gmra.mxu3 %vm502_vm1, %v5443_v51 }
 0x1cd   : > { %v1358_v1 = vpop.f32.mrf.mxu3  ;;  %v6101_v18 = vpop.f32.mrf.mxu0 }
 0x1ce   : > { %v6099_v28 = vadd.f32 %v1358_v1, %v1099_v57 }
 0x1cf   : > { %v924_v60 = vpop.f32.mrf.mxu1 }
 0x1d0   : > { %8671 = vst [vmem:[#allocation60_spill] sm:$0xff] %v6099_v28  ;;  %4637 = vmatmul.msk.f32.gmra.mxu2 %vm502_vm1, %v5491_v6  ;;  %4697 = vmatmul.msk.f32.gmra.mxu0 %vm502_vm1, %v5723_v41  ;;  %v1102_v37 = vadd.f32 %v1101_v14, %v924_v60 }
 0x1d2   : > { %v1104_v55 = vpop.f32.mrf.mxu2 }
 0x1d3   : > { %4603 = vmatmul.msk.f32.gmra.mxu1 %vm502_vm1, %v5449_v53  ;;  %4669 = vmatmul.msk.f32.gmra.mxu3 %vm502_vm1, %v5475_v63 }
 0x1d5   : > { %v1361_v33 = vpop.f32.mrf.mxu3  ;;  %v6113_v1 = vpop.f32.mrf.mxu0 }
 0x1d6   : > { %v6111_v57 = vadd.f32 %v1361_v33, %v1102_v37 }
 0x1d7   : > { %v927_v28 = vpop.f32.mrf.mxu1 }
 0x1d8   : > { %8672 = vst [vmem:[#allocation61_spill] sm:$0xff] %v6111_v57  ;;  %4638 = vmatmul.msk.f32.gmra.mxu2 %vm502_vm1, %v5514_v15  ;;  %4698 = vmatmul.msk.f32.gmra.mxu0 %vm502_vm1, %v5783_v21  ;;  %v1105_v14 = vadd.f32 %v1104_v55, %v927_v28 }
 0x1da   : > { %v1107_v41 = vpop.f32.mrf.mxu2 }
 0x1db   : > { %4604 = vmatmul.msk.f32.gmra.mxu1 %vm502_vm1, %v5458_v56  ;;  %4670 = vmatmul.msk.f32.gmra.mxu3 %vm502_vm1, %v5494_v7 }
 0x1dd   : > { %v1364_v60 = vpop.f32.mrf.mxu3  ;;  %v6125_v33 = vpop.f32.mrf.mxu0 }
 0x1de   : > { %v6123_v37 = vadd.f32 %v1364_v60, %v1105_v14 }
 0x1df   : > { %v930_v57 = vpop.f32.mrf.mxu1 }
 0x1e0   : > { %8673 = vst [vmem:[#allocation62_spill] sm:$0xff] %v6123_v37  ;;  %4639 = vmatmul.msk.f32.gmra.mxu2 %vm502_vm1, %v5533_v24  ;;  %4699 = vmatmul.msk.f32.gmra.mxu0 %vm502_vm1, %v5424_v43  ;;  %v1108_v28 = vadd.f32 %v1107_v41, %v930_v57 }
 0x1e2   : > { %v1110_v21 = vpop.f32.mrf.mxu2 }
 0x1e3   : > { %4605 = vmatmul.msk.f32.gmra.mxu1 %vm502_vm1, %v5481_v4  ;;  %4671 = vmatmul.msk.f32.gmra.mxu3 %vm502_vm1, %v5517_v16 }
 0x1e5   : > { %v1367_v55 = vpop.f32.mrf.mxu3  ;;  %v6137_v60 = vpop.f32.mrf.mxu0 }
 0x1e6   : > { %v6135_v14 = vadd.f32 %v1367_v55, %v1108_v28 }
 0x1e7   : > { %v933_v37 = vpop.f32.mrf.mxu1 }
 0x1e8   : > { %8674 = vst [vmem:[#allocation63_spill] sm:$0xff] %v6135_v14  ;;  %4640 = vmatmul.msk.f32.gmra.mxu2 %vm502_vm1, %v5556_v34  ;;  %4700 = vmatmul.msk.f32.gmra.mxu0 %vm502_vm1, %v5449_v53  ;;  %v1111_v57 = vadd.f32 %v1110_v21, %v933_v37 }
 0x1ea   : > { %v1113_v43 = vpop.f32.mrf.mxu2 }
 0x1eb   : > { %4606 = vmatmul.msk.f32.gmra.mxu1 %vm502_vm1, %v5500_v9  ;;  %4672 = vmatmul.msk.f32.gmra.mxu3 %vm502_vm1, %v5536_v25 }
 0x1ed   : > { %v1370_v41 = vpop.f32.mrf.mxu3  ;;  %v6149_v55 = vpop.f32.mrf.mxu0 }
 0x1ee   : > { %v6147_v28 = vadd.f32 %v1370_v41, %v1111_v57 }
 0x1f0   : > { %8675 = vst [vmem:[#allocation64_spill] sm:$0xff] %v6147_v28  ;;  %v936_v14 = vpop.f32.mrf.mxu1  ;;  %4641 = vmatmul.msk.f32.gmra.mxu2 %vm502_vm1, %v5575_v42  ;;  %4701 = vmatmul.msk.f32.gmra.mxu0 %vm502_vm1, %v5458_v56 }
 0x1f1   : > { %v1114_v37 = vadd.f32 %v1113_v43, %v936_v14 }
 0x1f3   : > { %v1116_v53 = vpop.f32.mrf.mxu2  ;;  %4607 = vmatmul.msk.f32.gmra.mxu1 %vm502_vm1, %v5523_v22  ;;  %4673 = vmatmul.msk.f32.gmra.mxu3 %vm502_vm1, %v5559_v35 }
 0x1f5   : > { %v6161_v41 = vpop.f32.mrf.mxu0 }
 0x1f6   : > { %v1373_v21 = vpop.f32.mrf.mxu3 }
 0x1f7   : > { %v6159_v57 = vadd.f32 %v1373_v21, %v1114_v37 }
 0x1f8   : > { %v939_v28 = vpop.f32.mrf.mxu1  ;;  %4642 = vmatmul.msk.f32.gmra.mxu2 %vm502_vm1, %v5598_v58  ;;  %4702 = vmatmul.msk.f32.gmra.mxu0 %vm502_vm1, %v5481_v4 }
 0x1f9   : > { %8676 = vst [vmem:[#allocation65_spill] sm:$0xff] %v6159_v57  ;;  %v1117_v14 = vadd.f32 %v1116_v53, %v939_v28 }
 0x1fb   : > { %v1119_v56 = vpop.f32.mrf.mxu2  ;;  %4608 = vmatmul.msk.f32.gmra.mxu1 %vm502_vm1, %v5542_v27  ;;  %4674 = vmatmul.msk.f32.gmra.mxu3 %vm502_vm1, %v5578_v44 }
 0x1fd   : > { %v6173_v21 = vpop.f32.mrf.mxu0 }
 0x1fe   : > { %v1376_v43 = vpop.f32.mrf.mxu3 }
 0x1ff   : > { %v6171_v37 = vadd.f32 %v1376_v43, %v1117_v14 }
 0x200   : > { %v942_v57 = vpop.f32.mrf.mxu1  ;;  %4643 = vmatmul.msk.f32.gmra.mxu2 %vm502_vm1, %v5621_v10  ;;  %4703 = vmatmul.msk.f32.gmra.mxu0 %vm502_vm1, %v5500_v9 }
 0x201   : > { %8677 = vst [vmem:[#allocation66_spill] sm:$0xff] %v6171_v37  ;;  %v1120_v28 = vadd.f32 %v1119_v56, %v942_v57  ;;  %v4794_v57 = vld [vmem:[%s8432_s4 + $0x4] sm:$0xf] }
 0x202   : > { %4795 = vmatpush.msk.msra.mxu3 %vm2761_vm5, %v4794_v57 }
 0x203   : > { %v1122_v4 = vpop.f32.mrf.mxu2  ;;  %4609 = vmatmul.msk.f32.gmra.mxu1 %vm502_vm1, %v5565_v40  ;;  %4675 = vmatmul.msk.f32.gmra.mxu3 %vm502_vm1, %v5601_v59 }
 0x205   : > { %v6185_v43 = vpop.f32.mrf.mxu0 }
 0x206   : > { %v1379_v53 = vpop.f32.mrf.mxu3 }
 0x207   : > { %v6183_v14 = vadd.f32 %v1379_v53, %v1120_v28 }
 0x208   : > { %v945_v37 = vpop.f32.mrf.mxu1  ;;  %4644 = vmatmul.msk.f32.gmra.mxu2 %vm502_vm1, %v5646_v29  ;;  %4704 = vmatmul.msk.f32.gmra.mxu0 %vm502_vm1, %v5523_v22 }
 0x209   : > { %8678 = vst [vmem:[#allocation67_spill] sm:$0xff] %v6183_v14  ;;  %v1123_v56 = vadd.f32 %v1122_v4, %v945_v37 }
 0x20b   : > { %v1125_v9 = vpop.f32.mrf.mxu2  ;;  %4610 = vmatmul.msk.f32.gmra.mxu1 %vm502_vm1, %v5584_v47  ;;  %4676 = vmatmul.msk.f32.gmra.mxu3 %vm502_vm1, %v5624_v11 }
 0x20d   : > { %v1295_v29 = vpop.f32.mrf.mxu0 }
 0x20e   : > { %v1382_v28 = vpop.f32.mrf.mxu3 }
 0x20f   : > { %v6199_v53 = vadd.f32 %v1382_v28, %v1123_v56  ;;  %v1036_v28 = vadd.f32 %v6113_v1, %v6011_v20  ;;  %v1039_v20 = vadd.f32 %v6125_v33, %v6024_v8  ;;  %v8684_v1 = vld [vmem:[#allocation6_spill] sm:$0xff] }
 0x210   : > { %v948_v22 = vpop.f32.mrf.mxu1  ;;  %4645 = vmatmul.msk.f32.gmra.mxu2 %vm502_vm1, %v5665_v45  ;;  %4705 = vmatmul.msk.f32.gmra.mxu0 %vm502_vm1, %v5542_v27  ;;  %v8688_v33 = vld [vmem:[#allocation14_spill] sm:$0xff] }
 0x211   : > { %8679 = vst [vmem:[#allocation68_spill] sm:$0xff] %v6199_v53  ;;  %v1126_v57 = vadd.f32 %v1125_v9, %v948_v22  ;;  %v8681_v53 = vld [vmem:[#allocation8_spill] sm:$0xff]  ;;  %v1391_v9 = vadd.f32 %v1295_v29, %v1036_v28  ;;  %v8685_v29 = vld [vmem:[#allocation11_spill] sm:$0xff] }
 0x213   : > { %v1128_v14 = vpop.f32.mrf.mxu2  ;;  %4611 = vmatmul.msk.f32.gmra.mxu1 %vm502_vm1, %v5607_v2  ;;  %4677 = vmatmul.msk.f32.gmra.mxu3 %vm502_vm1, %v5649_v30 }
 0x215   : > { %v1298_v45 = vpop.f32.mrf.mxu0 }
 0x216   : > { %v1385_v37 = vpop.f32.mrf.mxu3  ;;  %v1392_v28 = vadd.f32 %v1298_v45, %v1039_v20  ;;  %v1042_v45 = vadd.f32 %v6137_v60, %v6039_v23  ;;  %v1045_v60 = vadd.f32 %v6149_v55, %v6056_v52  ;;  %v1048_v55 = vadd.f32 %v6161_v41, %v6071_v3 }
 0x217   : > { %v6209_v4 = vadd.f32 %v1385_v37, %v1126_v57  ;;  %v1051_v41 = vadd.f32 %v6173_v21, %v6089_v50 }
 0x218   : > { %v951_v56 = vpop.f32.mrf.mxu1  ;;  %4646 = vmatmul.msk.f32.gmra.mxu2 %vm502_vm1, %v5695_v13  ;;  %4706 = vmatmul.msk.f32.gmra.mxu0 %vm502_vm1, %v5565_v40 }
 0x219   : > { %8680 = vst [vmem:[#allocation69_spill] sm:$0xff] %v6209_v4  ;;  %v1129_v22 = vadd.f32 %v1128_v14, %v951_v56  ;;  %v8683_v4 = vld [vmem:[#allocation13_spill] sm:$0xff] }
 0x21b   : > { %4612 = vmatmul.msk.f32.gmra.mxu1 %vm502_vm1, %v5632_v17  ;;  %v1605_v27 = vpop.f32.mrf.mxu2  ;;  %4678 = vmatmul.msk.f32.gmra.mxu3 %vm502_vm1, %v8681_v53 }
 0x21d   : > { %v1301_v56 = vpop.f32.mrf.mxu0 }
 0x21e   : > { %v1388_v57 = vpop.f32.mrf.mxu3 }
 0x21f   : > { %v6221_v37 = vadd.f32 %v1388_v57, %v1129_v22 }
 0x220   : > { %v1448_v13 = vpop.f32.mrf.mxu1  ;;  %4647 = vmatmul.msk.f32.gmra.mxu2 %vm502_vm1, %v8683_v4  ;;  %4707 = vmatmul.msk.f32.gmra.mxu0 %vm502_vm1, %v5584_v47  ;;  %v8687_v47 = vld [vmem:[#allocation9_spill] sm:$0xff] }
 0x221   : > { %8682 = vst [vmem:[#allocation70_spill] sm:$0xff] %v6221_v37  ;;  %v1544_v40 = vadd.f32 %v1448_v13, %v1391_v9  ;;  %v8686_v37 = vld [vmem:[#allocation16_spill] sm:$0xff] }
 0x223   : > { %4613 = vmatmul.msk.f32.gmra.mxu1 %vm502_vm1, %v8684_v1  ;;  %v1608_v53 = vpop.f32.mrf.mxu2  ;;  %4679 = vmatmul.msk.f32.gmra.mxu3 %vm502_vm1, %v8685_v29  ;;  %v1701_v14 = vadd.f32 %v1605_v27, %v1544_v40  ;;  %v1393_v40 = vadd.f32 %v1301_v56, %v1042_v45 }
 0x225   : > { %v1304_v9 = vpop.f32.mrf.mxu0 }
 0x226   : > { %v1761_v22 = vpop.f32.mrf.mxu3 }
 0x227   : > { %v6233_v57 = vadd.f32 %v1761_v22, %v1701_v14  ;;  %v8690_v22 = vld [vmem:[#allocation12_spill] sm:$0xff] }
 0x228   : > { %v1451_v4 = vpop.f32.mrf.mxu1  ;;  %4648 = vmatmul.msk.f32.gmra.mxu2 %vm502_vm1, %v8686_v37  ;;  %4708 = vmatmul.msk.f32.gmra.mxu0 %vm502_vm1, %v5607_v2 }
 0x229   : > { %v1545_v13 = vadd.f32 %v1451_v4, %v1392_v28  ;;  %v8689_v28 = vld [vmem:[#allocation19_spill] sm:$0xff] }
 0x22b   : > { %4614 = vmatmul.msk.f32.gmra.mxu1 %vm502_vm1, %v8687_v47  ;;  %v1611_v8 = vpop.f32.mrf.mxu2  ;;  %4680 = vmatmul.msk.f32.gmra.mxu3 %vm502_vm1, %v8688_v33  ;;  %v1702_v27 = vadd.f32 %v1608_v53, %v1545_v13  ;;  %v8691_v13 = vld [vmem:[#allocation17_spill] sm:$0xff] }
 0x22e   : > { %v1764_v20 = vpop.f32.mrf.mxu3 }
 0x22f   : > { %v6245_v14 = vadd.f32 %v1764_v20, %v1702_v27  ;;  %v1394_v27 = vadd.f32 %v1304_v9, %v1045_v60  ;;  %v1307_v20 = vpop.f32.mrf.mxu0 }
 0x230   : > { %v1454_v4 = vpop.f32.mrf.mxu1  ;;  %4649 = vmatmul.msk.f32.gmra.mxu2 %vm502_vm1, %v8689_v28  ;;  %4709 = vmatmul.msk.f32.gmra.mxu0 %vm502_vm1, %v5632_v17  ;;  %v8693_v28 = vld [vmem:[#allocation15_spill] sm:$0xff] }
 0x231   : > { %v1546_v2 = vadd.f32 %v1454_v4, %v1393_v40  ;;  %v8692_v4 = vld [vmem:[#allocation23_spill] sm:$0xff] }
 0x233   : > { %4615 = vmatmul.msk.f32.gmra.mxu1 %vm502_vm1, %v8690_v22  ;;  %v1614_v53 = vpop.f32.mrf.mxu2  ;;  %4681 = vmatmul.msk.f32.gmra.mxu3 %vm502_vm1, %v8691_v13  ;;  %v1703_v23 = vadd.f32 %v1611_v8, %v1546_v2  ;;  %v8694_v2 = vld [vmem:[#allocation20_spill] sm:$0xff] }
 0x236   : > { %v1767_v56 = vpop.f32.mrf.mxu3 }
 0x237   : > { %v6257_v45 = vadd.f32 %v1767_v56, %v1703_v23  ;;  %v1395_v23 = vadd.f32 %v1307_v20, %v1048_v55 }
 0x238   : > { %v1457_v40 = vpop.f32.mrf.mxu1  ;;  %4650 = vmatmul.msk.f32.gmra.mxu2 %vm502_vm1, %v8692_v4  ;;  %4710 = vmatmul.msk.f32.gmra.mxu0 %vm502_vm1, %v8684_v1  ;;  %v8696_v4 = vld [vmem:[#allocation18_spill] sm:$0xff] }
 0x239   : > { %v1547_v17 = vadd.f32 %v1457_v40, %v1394_v27  ;;  %v8695_v27 = vld [vmem:[#allocation28_spill] sm:$0xff]  ;;  %v1310_v40 = vpop.f32.mrf.mxu0 }
 0x23b   : > { %4616 = vmatmul.msk.f32.gmra.mxu1 %vm502_vm1, %v8693_v28  ;;  %v1617_v8 = vpop.f32.mrf.mxu2  ;;  %4682 = vmatmul.msk.f32.gmra.mxu3 %vm502_vm1, %v8694_v2  ;;  %v1704_v52 = vadd.f32 %v1614_v53, %v1547_v17  ;;  %v8697_v17 = vld [vmem:[#allocation24_spill] sm:$0xff] }
 0x23e   : > { %v1770_v9 = vpop.f32.mrf.mxu3 }
 0x23f   : > { %v6269_v60 = vadd.f32 %v1770_v9, %v1704_v52  ;;  %v1396_v52 = vadd.f32 %v1310_v40, %v1051_v41 }
 0x240   : > { %v1460_v56 = vpop.f32.mrf.mxu1  ;;  %4651 = vmatmul.msk.f32.gmra.mxu2 %vm502_vm1, %v8695_v27  ;;  %4711 = vmatmul.msk.f32.gmra.mxu0 %vm502_vm1, %v8687_v47 }
 0x241   : > { %v1548_v1 = vadd.f32 %v1460_v56, %v1395_v23  ;;  %v8699_v23 = vld [vmem:[#allocation32_spill] sm:$0xff]  ;;  %v8700_v56 = vld [vmem:[#allocation21_spill] sm:$0xff]  ;;  %v1313_v21 = vpop.f32.mrf.mxu0 }
 0x243   : > { %4617 = vmatmul.msk.f32.gmra.mxu1 %vm502_vm1, %v8696_v4  ;;  %v1620_v53 = vpop.f32.mrf.mxu2  ;;  %4683 = vmatmul.msk.f32.gmra.mxu3 %vm502_vm1, %v8697_v17  ;;  %v1705_v3 = vadd.f32 %v1617_v8, %v1548_v1  ;;  %v8701_v8 = vld [vmem:[#allocation29_spill] sm:$0xff]  ;;  %v1054_v1 = vadd.f32 %v6185_v43, %v6101_v18 }
 0x244   : > { %v8707_v18 = vld [vmem:[#allocation33_spill] sm:$0xff] }
 0x246   : > { %v1773_v20 = vpop.f32.mrf.mxu3 }
 0x247   : > { %v6281_v55 = vadd.f32 %v1773_v20, %v1705_v3  ;;  %v1397_v3 = vadd.f32 %v1313_v21, %v1054_v1  ;;  %v8708_v21 = vld [vmem:[#allocation30_spill] sm:$0xff] }
 0x248   : > { %v1463_v9 = vpop.f32.mrf.mxu1  ;;  %4652 = vmatmul.msk.f32.gmra.mxu2 %vm502_vm1, %v8699_v23  ;;  %4712 = vmatmul.msk.f32.gmra.mxu0 %vm502_vm1, %v8690_v22  ;;  %v8705_v23 = vld [vmem:[#allocation25_spill] sm:$0xff] }
 0x249   : > { %8698 = vst [vmem:[#allocation6_spill] sm:$0xff] %v6281_v55  ;;  %v1549_v47 = vadd.f32 %v1463_v9, %v1396_v52  ;;  %v8703_v52 = vld [vmem:[#allocation36_spill] sm:$0xff]  ;;  %v8704_v9 = vld [vmem:[#allocation27_spill] sm:$0xff] }
 0x24a   : > { %v1057_v55 = vadd.f32 %v8705_v23, %v8704_v9  ;;  %v8711_v23 = vld [vmem:[#allocation31_spill] sm:$0xff] }
 0x24b   : > { %4618 = vmatmul.msk.f32.gmra.mxu1 %vm502_vm1, %v8700_v56  ;;  %v1623_v27 = vpop.f32.mrf.mxu2  ;;  %4684 = vmatmul.msk.f32.gmra.mxu3 %vm502_vm1, %v8701_v8  ;;  %v1706_v50 = vadd.f32 %v1620_v53, %v1549_v47  ;;  %v8706_v53 = vld [vmem:[#allocation26_spill] sm:$0xff] }
 0x24c   : > { %v1398_v1 = vadd.f32 %v8708_v21, %v1057_v55  ;;  %v8714_v21 = vld [vmem:[#allocation44_spill] sm:$0xff] }
 0x24e   : > { %v1776_v40 = vpop.f32.mrf.mxu3 }
 0x24f   : > { %v6293_v41 = vadd.f32 %v1776_v40, %v1706_v50 }
 0x250   : > { %v1466_v20 = vpop.f32.mrf.mxu1  ;;  %4653 = vmatmul.msk.f32.gmra.mxu2 %vm502_vm1, %v8703_v52  ;;  %4713 = vmatmul.msk.f32.gmra.mxu0 %vm502_vm1, %v8693_v28  ;;  %v8712_v52 = vld [vmem:[#allocation37_spill] sm:$0xff] }
 0x251   : > { %8702 = vst [vmem:[#allocation11_spill] sm:$0xff] %v6293_v41  ;;  %v1550_v22 = vadd.f32 %v1466_v20, %v1397_v3  ;;  %v8710_v20 = vld [vmem:[#allocation40_spill] sm:$0xff]  ;;  %v8727_v41 = vld [vmem:[#allocation49_spill] sm:$0xff] }
 0x253   : > { %4619 = vmatmul.msk.f32.gmra.mxu1 %vm502_vm1, %v8706_v53  ;;  %v1626_v47 = vpop.f32.mrf.mxu2  ;;  %4685 = vmatmul.msk.f32.gmra.mxu3 %vm502_vm1, %v8707_v18  ;;  %v1707_v43 = vadd.f32 %v1623_v27, %v1550_v22  ;;  %v6316_v22 = vpop.f32.mrf.mxu0 }
 0x256   : > { %v1779_v50 = vpop.f32.mrf.mxu3 }
 0x257   : > { %v6306_v40 = vadd.f32 %v1779_v50, %v1707_v43 }
 0x258   : > { %v1469_v3 = vpop.f32.mrf.mxu1  ;;  %4654 = vmatmul.msk.f32.gmra.mxu2 %vm502_vm1, %v8710_v20  ;;  %4714 = vmatmul.msk.f32.gmra.mxu0 %vm502_vm1, %v8696_v4  ;;  %v8716_v4 = vld [vmem:[#allocation35_spill] sm:$0xff] }
 0x259   : > { %8709 = vst [vmem:[#allocation16_spill] sm:$0xff] %v6306_v40  ;;  %v1551_v28 = vadd.f32 %v1469_v3, %v1398_v1  ;;  %v8715_v1 = vld [vmem:[#allocation34_spill] sm:$0xff]  ;;  %v8717_v40 = vld [vmem:[#allocation41_spill] sm:$0xff] }
 0x25b   : > { %4620 = vmatmul.msk.f32.gmra.mxu1 %vm502_vm1, %v8711_v23  ;;  %v1629_v9 = vpop.f32.mrf.mxu2  ;;  %4686 = vmatmul.msk.f32.gmra.mxu3 %vm502_vm1, %v8712_v52  ;;  %v1708_v27 = vadd.f32 %v1626_v47, %v1551_v28  ;;  %v6331_v28 = vpop.f32.mrf.mxu0 }
 0x25e   : > { %v1782_v55 = vpop.f32.mrf.mxu3 }
 0x25f   : > { %v6318_v43 = vadd.f32 %v1782_v55, %v1708_v27  ;;  %v8719_v55 = vld [vmem:[#allocation48_spill] sm:$0xff] }
 0x260   : > { %v1472_v50 = vpop.f32.mrf.mxu1  ;;  %4655 = vmatmul.msk.f32.gmra.mxu2 %vm502_vm1, %v8714_v21  ;;  %4715 = vmatmul.msk.f32.gmra.mxu0 %vm502_vm1, %v8700_v56  ;;  %v8720_v21 = vld [vmem:[#allocation38_spill] sm:$0xff]  ;;  %v8721_v56 = vld [vmem:[#allocation39_spill] sm:$0xff] }
 0x261   : > { %8713 = vst [vmem:[#allocation9_spill] sm:$0xff] %v6318_v43  ;;  %v1552_v3 = vadd.f32 %v1472_v50, %v8715_v1  ;;  %v8722_v43 = vld [vmem:[#allocation45_spill] sm:$0xff] }
 0x263   : > { %4621 = vmatmul.msk.f32.gmra.mxu1 %vm502_vm1, %v8716_v4  ;;  %v1632_v20 = vpop.f32.mrf.mxu2  ;;  %4687 = vmatmul.msk.f32.gmra.mxu3 %vm502_vm1, %v8717_v40  ;;  %v6329_v47 = vadd.f32 %v1629_v9, %v1552_v3  ;;  %v6344_v3 = vpop.f32.mrf.mxu0  ;;  %v8724_v40 = vld [vmem:[#allocation52_spill] sm:$0xff] }
 0x265   : > { %8718 = vst [vmem:[#allocation14_spill] sm:$0xff] %v6329_v47 }
 0x268   : > { %v1475_v27 = vpop.f32.mrf.mxu1  ;;  %4656 = vmatmul.msk.f32.gmra.mxu2 %vm502_vm1, %v8719_v55  ;;  %4716 = vmatmul.msk.f32.gmra.mxu0 %vm502_vm1, %v8706_v53  ;;  %v8725_v55 = vld [vmem:[#allocation42_spill] sm:$0xff]  ;;  %v8726_v53 = vld [vmem:[#allocation43_spill] sm:$0xff] }
 0x269   : > { %v1553_v50 = vadd.f32 %v1475_v27, %v8720_v21 }
 0x26b   : > { %4622 = vmatmul.msk.f32.gmra.mxu1 %vm502_vm1, %v8721_v56  ;;  %v1635_v1 = vpop.f32.mrf.mxu2  ;;  %4688 = vmatmul.msk.f32.gmra.mxu3 %vm502_vm1, %v8722_v43  ;;  %v6342_v9 = vadd.f32 %v1632_v20, %v1553_v50  ;;  %v6360_v43 = vpop.f32.mrf.mxu0 }
 0x26d   : > { %8723 = vst [vmem:[#allocation12_spill] sm:$0xff] %v6342_v9  ;;  %v8729_v9 = vld [vmem:[#allocation46_spill] sm:$0xff] }
 0x270   : > { %v1478_v47 = vpop.f32.mrf.mxu1  ;;  %4657 = vmatmul.msk.f32.gmra.mxu2 %vm502_vm1, %v8724_v40  ;;  %4717 = vmatmul.msk.f32.gmra.mxu0 %vm502_vm1, %v8711_v23  ;;  %v8730_v23 = vld [vmem:[#allocation47_spill] sm:$0xff] }
 0x271   : > { %v1554_v21 = vadd.f32 %v1478_v47, %v8725_v55  ;;  %v8731_v55 = vld [vmem:[#allocation53_spill] sm:$0xff] }
 0x273   : > { %4623 = vmatmul.msk.f32.gmra.mxu1 %vm502_vm1, %v8726_v53  ;;  %v1638_v27 = vpop.f32.mrf.mxu2  ;;  %4689 = vmatmul.msk.f32.gmra.mxu3 %vm502_vm1, %v8727_v41  ;;  %v6355_v20 = vadd.f32 %v1635_v1, %v1554_v21 }
 0x275   : > { %8728 = vst [vmem:[#allocation17_spill] sm:$0xff] %v6355_v20 }
 0x278   : > { %v1481_v50 = vpop.f32.mrf.mxu1  ;;  %4658 = vmatmul.msk.f32.gmra.mxu2 %vm502_vm1, %v5981_v54  ;;  %4718 = vmatmul.msk.f32.gmra.mxu0 %vm502_vm1, %v8716_v4  ;;  %v639_v54 = vld [vmem:[#allocation2 + $0x180] sm:$0xff]  ;;  %v8734_v4 = vld [vmem:[#allocation51_spill] sm:$0xff] }
 0x279   : > { %v1555_v40 = vadd.f32 %v1481_v50, %v8729_v9  ;;  %v6372_v9 = vld [vmem:[#allocation2 + $0x188] sm:$0xff]  ;;  %v8733_v50 = vld [vmem:[#allocation50_spill] sm:$0xff] }
 0x27b   : > { %4624 = vmatmul.msk.f32.gmra.mxu1 %vm502_vm1, %v8730_v23  ;;  %v1641_v47 = vpop.f32.mrf.mxu2  ;;  %4690 = vmatmul.msk.f32.gmra.mxu3 %vm502_vm1, %v8731_v55  ;;  %v6368_v1 = vadd.f32 %v1638_v27, %v1555_v40  ;;  %v1577_v27 = vrot.slane %v639_v54, 1 }
 0x27d   : > { %8732 = vst [vmem:[#allocation15_spill] sm:$0xff] %v6368_v1  ;;  %v6384_v1 = vpop.f32.mrf.mxu0 }
 0x27e   : > { %8736 = vst [vmem:[#allocation18_spill] sm:$0xff] %v6384_v1  ;;  %v1733_v1 = vrot.slane %v639_v54, 2 }
 0x280   : > { %v1484_v21 = vpop.f32.mrf.mxu1  ;;  %4659 = vmatmul.msk.f32.gmra.mxu2 %vm502_vm1, %v5999_v19  ;;  %4719 = vmatmul.msk.f32.gmra.mxu0 %vm502_vm1, %v8721_v56  ;;  %v1578_v19 = vrot.slane %v6372_v9, 1  ;;  %v641_v56 = vld [vmem:[#allocation2 + $0x190] sm:$0x3] }
 0x281   : > { %v1556_v20 = vadd.f32 %v1484_v21, %v8733_v50  ;;  %v8738_v50 = vld [vmem:[#allocation54_spill] sm:$0xff] }
 0x282   : > { %v6387_v55 = vsel %vm694_vm3, %v1577_v27, %v1578_v19  ;;  %v1580_v27 = vrot.slane %v641_v56, 1 }
 0x283   : > { %4625 = vmatmul.msk.f32.gmra.mxu1 %vm502_vm1, %v8734_v4  ;;  %v1644_v41 = vpop.f32.mrf.mxu2  ;;  %4691 = vmatmul.msk.f32.gmra.mxu3 %vm502_vm1, %v5984_v39  ;;  %v6381_v40 = vadd.f32 %v1641_v47, %v1556_v20  ;;  %8737 = vst [vmem:[#allocation24_spill] sm:$0xff] %v6387_v55  ;;  %v8739_v20 = vld [vmem:[#allocation55_spill] sm:$0xff] }
 0x285   : > { %8735 = vst [vmem:[#allocation20_spill] sm:$0xff] %v6381_v40  ;;  %v6400_v39 = vpop.f32.mrf.mxu0 }
 0x288   : > { %v1487_v21 = vpop.f32.mrf.mxu1  ;;  %4660 = vmatmul.msk.f32.gmra.mxu2 %vm502_vm1, %v6387_v55  ;;  %4720 = vmatmul.msk.f32.gmra.mxu0 %vm502_vm1, %v8726_v53  ;;  %v1734_v55 = vrot.slane %v6372_v9, 2 }
 0x289   : > { %v1557_v52 = vadd.f32 %v1487_v21, %v8738_v50  ;;  %v6404_v21 = vsel %vm694_vm3, %v1578_v19, %v1580_v27  ;;  %v1736_v27 = vrot.slane %v641_v56, 2 }
 0x28a   : > { %8741 = vst [vmem:[#allocation29_spill] sm:$0xff] %v6404_v21 }
 0x28b   : > { %4626 = vmatmul.msk.f32.gmra.mxu1 %vm502_vm1, %v8739_v20  ;;  %v1647_v47 = vpop.f32.mrf.mxu2  ;;  %4692 = vmatmul.msk.f32.gmra.mxu3 %vm502_vm1, %v6002_v61  ;;  %v6398_v40 = vadd.f32 %v1644_v41, %v1557_v52  ;;  %v6412_v41 = vsel %vm1131_vm4, %v1733_v1, %v1734_v55 }
 0x28d   : > { %8740 = vst [vmem:[#allocation21_spill] sm:$0xff] %v6398_v40  ;;  %v6419_v40 = vpop.f32.mrf.mxu0 }
 0x290   : > { %v1490_v50 = vpop.f32.mrf.mxu1  ;;  %4661 = vmatmul.msk.f32.gmra.mxu2 %vm502_vm1, %v6404_v21  ;;  %4721 = vmatmul.msk.f32.gmra.mxu0 %vm502_vm1, %v8730_v23  ;;  %v6427_v23 = vsel %vm1131_vm4, %v1734_v55, %v1736_v27 }
 0x291   : > { %v1558_v53 = vadd.f32 %v1490_v50, %v5991_v46 }
 0x293   : > { %4627 = vmatmul.msk.f32.gmra.mxu1 %vm502_vm1, %v639_v54  ;;  %v1650_v52 = vpop.f32.mrf.mxu2  ;;  %4693 = vmatmul.msk.f32.gmra.mxu3 %vm502_vm1, %v6412_v41  ;;  %v6417_v19 = vadd.f32 %v1647_v47, %v1558_v53 }
 0x298   : > { %v1493_v21 = vpop.f32.mrf.mxu1  ;;  %4762 = vmatmul.msk.f32.vlgmr.msra.gmra.mxu2 %vm502_vm1, %v6045_v38  ;;  %4722 = vmatmul.msk.f32.gmra.mxu0 %vm502_vm1, %v8734_v4  ;;  %v6438_v38 = vpop.f32.mrf.mxu0 }
 0x299   : > { %v1559_v46 = vadd.f32 %v1493_v21, %v6009_v12 }
 0x29b   : > { %4628 = vmatmul.msk.f32.gmra.mxu1 %vm502_vm1, %v6372_v9  ;;  %v1653_v1 = vpop.f32.mrf.mxu2  ;;  %4694 = vmatmul.msk.f32.gmra.mxu3 %vm502_vm1, %v6427_v23  ;;  %v6433_v56 = vadd.f32 %v1650_v52, %v1559_v46  ;;  %v6467_v52 = vld [vmem:[#allocation2 + $0x198] sm:$0xff] }
 0x2a0   : > { %v1496_v47 = vpop.f32.mrf.mxu1  ;;  %4763 = vmatmul.msk.f32.gmra.mxu2 %vm502_vm1, %v6061_v32  ;;  %4723 = vmatmul.msk.f32.gmra.mxu0 %vm502_vm1, %v8739_v20  ;;  %v6454_v20 = vpop.f32.mrf.mxu0 }
 0x2a1   : > { %v1560_v12 = vadd.f32 %v1496_v47, %v6022_v48 }
 0x2a3   : > { %v1656_v55 = vpop.f32.mrf.mxu2  ;;  %4729 = vmatmul.msk.f32.vlgmr.msra.gmra.mxu1 %vm502_vm1, %v5743_v26  ;;  %v6444_v4 = vadd.f32 %v1653_v1, %v1560_v12  ;;  %v8744_v1 = vld [vmem:[#allocation4_spill] sm:$0xff] }
 0x2a4   : > { %v6480_v12 = vld [vmem:[#allocation2 + $0x1a0] sm:$0xff] }
 0x2a8   : > { %v1499_v21 = vpop.f32.mrf.mxu1  ;;  %4764 = vmatmul.msk.f32.gmra.mxu2 %vm502_vm1, %v6079_v0  ;;  %4724 = vmatmul.msk.f32.gmra.mxu0 %vm502_vm1, %v639_v54 }
 0x2a9   : > { %v1561_v50 = vadd.f32 %v1499_v21, %v6037_v5  ;;  %v8742_v5 = vld [vmem:[#allocation22_spill] sm:$0xff] }
 0x2ab   : > { %v1659_v48 = vpop.f32.mrf.mxu2  ;;  %4730 = vmatmul.msk.f32.gmra.mxu1 %vm502_vm1, %v5769_v31  ;;  %v6452_v32 = vadd.f32 %v1656_v55, %v1561_v50  ;;  %v6465_v31 = vpop.f32.mrf.mxu0 }
 0x2b0   : > { %v1502_v53 = vpop.f32.mrf.mxu1  ;;  %4765 = vmatmul.msk.f32.gmra.mxu2 %vm502_vm1, %v5443_v51  ;;  %4725 = vmatmul.msk.f32.gmra.mxu0 %vm502_vm1, %v6372_v9  ;;  %v8743_v51 = vld [vmem:[#allocation59_spill] sm:$0xff] }
 0x2b1   : > { %v1562_v26 = vadd.f32 %v1502_v53, %v6054_v36  ;;  %v6474_v36 = vpop.f32.mrf.mxu3 }
 0x2b3   : > { %v1662_v0 = vpop.f32.mrf.mxu2  ;;  %4731 = vmatmul.msk.f32.gmra.mxu1 %vm502_vm1, %v8742_v5  ;;  %v6463_v54 = vadd.f32 %v1659_v48, %v1562_v26  ;;  %v6482_v55 = vpop.f32.mrf.mxu0 }
 0x2b8   : > { %v1505_v27 = vpop.f32.mrf.mxu1  ;;  %4766 = vmatmul.msk.f32.gmra.mxu2 %vm502_vm1, %v5475_v63  ;;  %4726 = vmatmul.msk.f32.gmra.mxu0 %vm502_vm1, %v6467_v52 }
 0x2b9   : > { %v1563_v46 = vadd.f32 %v1505_v27, %v8743_v51  ;;  %v6493_v53 = vpop.f32.mrf.mxu3 }
 0x2bb   : > { %v1665_v9 = vpop.f32.mrf.mxu2  ;;  %4732 = vmatmul.msk.f32.gmra.mxu1 %vm502_vm1, %v8744_v1  ;;  %v6478_v47 = vadd.f32 %v1662_v0, %v1563_v46  ;;  %v8745_v0 = vld [vmem:[#allocation60_spill] sm:$0xff]  ;;  %v8747_v46 = vld [vmem:[#allocation61_spill] sm:$0xff] }
 0x2c0   : > { %v1508_v21 = vpop.f32.mrf.mxu1  ;;  %4767 = vmatmul.msk.f32.gmra.mxu2 %vm502_vm1, %v5494_v7  ;;  %4727 = vmatmul.msk.f32.gmra.mxu0 %vm502_vm1, %v6480_v12  ;;  %v6498_v7 = vpop.f32.mrf.mxu0 }
 0x2c1   : > { %v1564_v63 = vadd.f32 %v1508_v21, %v6087_v49  ;;  %v6504_v51 = vpop.f32.mrf.mxu3 }
 0x2c3   : > { %v1668_v50 = vpop.f32.mrf.mxu2  ;;  %4733 = vmatmul.msk.f32.gmra.mxu1 %vm502_vm1, %v5472_v62  ;;  %v6491_v48 = vadd.f32 %v1665_v9, %v1564_v63 }
 0x2c8   : > { %v1511_v26 = vpop.f32.mrf.mxu1  ;;  %4768 = vmatmul.msk.f32.gmra.mxu2 %vm502_vm1, %v5517_v16  ;;  %v6513_v21 = vpop.f32.mrf.mxu0 }
 0x2c9   : > { %v1565_v5 = vadd.f32 %v1511_v26, %v8745_v0 }
 0x2cb   : > { %v1671_v49 = vpop.f32.mrf.mxu2  ;;  %4734 = vmatmul.msk.f32.gmra.mxu1 %vm502_vm1, %v5491_v6  ;;  %v6502_v27 = vadd.f32 %v1668_v50, %v1565_v5  ;;  %v6517_v6 = vpop.f32.mrf.mxu3  ;;  %v8749_v50 = vld [vmem:[#allocation62_spill] sm:$0xff] }
 0x2cd   : > { %8746 = vst [vmem:[#allocation27_spill] sm:$0xff] %v6502_v27  ;;  %v8797_v27 = vld [vmem:[#allocation40_spill] sm:$0xff] }
 0x2d0   : > { %v1514_v62 = vpop.f32.mrf.mxu1  ;;  %4769 = vmatmul.msk.f32.gmra.mxu2 %vm502_vm1, %v5536_v25  ;;  %v6524_v5 = vpop.f32.mrf.mxu0 }
 0x2d1   : > { %v1566_v9 = vadd.f32 %v1514_v62, %v8747_v46 }
 0x2d3   : > { %v1674_v1 = vpop.f32.mrf.mxu2  ;;  %4735 = vmatmul.msk.f32.gmra.mxu1 %vm502_vm1, %v5514_v15  ;;  %v6511_v16 = vadd.f32 %v1671_v49, %v1566_v9  ;;  %v8751_v49 = vld [vmem:[#allocation63_spill] sm:$0xff]  ;;  %v6529_v46 = vpop.f32.mrf.mxu3 }
 0x2d5   : > { %8748 = vst [vmem:[#allocation25_spill] sm:$0xff] %v6511_v16  ;;  %v8783_v16 = vld [vmem:[#allocation37_spill] sm:$0xff] }
 0x2d8   : > { %v1517_v63 = vpop.f32.mrf.mxu1  ;;  %4770 = vmatmul.msk.f32.gmra.mxu2 %vm502_vm1, %v5559_v35 }
 0x2d9   : > { %v1567_v26 = vadd.f32 %v1517_v63, %v8749_v50  ;;  %v6535_v63 = vpop.f32.mrf.mxu0 }
 0x2db   : > { %v1677_v0 = vpop.f32.mrf.mxu2  ;;  %4736 = vmatmul.msk.f32.gmra.mxu1 %vm502_vm1, %v5533_v24  ;;  %v6522_v25 = vadd.f32 %v1674_v1, %v1567_v26  ;;  %v8753_v1 = vld [vmem:[#allocation64_spill] sm:$0xff] }
 0x2dd   : > { %8750 = vst [vmem:[#allocation26_spill] sm:$0xff] %v6522_v25 }
 0x2e0   : > { %v1520_v15 = vpop.f32.mrf.mxu1  ;;  %4771 = vmatmul.msk.f32.gmra.mxu2 %vm502_vm1, %v5578_v44 }
 0x2e1   : > { %v1568_v62 = vadd.f32 %v1520_v15, %v8751_v49  ;;  %v6544_v15 = vpop.f32.mrf.mxu3 }
 0x2e3   : > { %v1680_v35 = vpop.f32.mrf.mxu2  ;;  %4737 = vmatmul.msk.f32.gmra.mxu1 %vm502_vm1, %v5556_v34  ;;  %v6533_v9 = vadd.f32 %v1677_v0, %v1568_v62  ;;  %v8755_v34 = vld [vmem:[#allocation65_spill] sm:$0xff]  ;;  %v6549_v62 = vpop.f32.mrf.mxu0 }
 0x2e5   : > { %8752 = vst [vmem:[#allocation33_spill] sm:$0xff] %v6533_v9 }
 0x2e8   : > { %v1523_v24 = vpop.f32.mrf.mxu1  ;;  %4772 = vmatmul.msk.f32.gmra.mxu2 %vm502_vm1, %v5601_v59 }
 0x2e9   : > { %v1569_v50 = vadd.f32 %v1523_v24, %v8753_v1  ;;  %v6555_v24 = vpop.f32.mrf.mxu3 }
 0x2eb   : > { %v1683_v26 = vpop.f32.mrf.mxu2  ;;  %4738 = vmatmul.msk.f32.gmra.mxu1 %vm502_vm1, %v5575_v42  ;;  %v6542_v44 = vadd.f32 %v1680_v35, %v1569_v50  ;;  %v8757_v35 = vld [vmem:[#allocation66_spill] sm:$0xff] }
 0x2ed   : > { %8754 = vst [vmem:[#allocation30_spill] sm:$0xff] %v6542_v44  ;;  %v8768_v44 = vld [vmem:[#allocation10_spill] sm:$0xff] }
 0x2f0   : > { %v1526_v49 = vpop.f32.mrf.mxu1  ;;  %4773 = vmatmul.msk.f32.gmra.mxu2 %vm502_vm1, %v5624_v11 }
 0x2f1   : > { %v1570_v0 = vadd.f32 %v1526_v49, %v8755_v34  ;;  %v6564_v49 = vpop.f32.mrf.mxu0  ;;  %v8760_v34 = vmov 0.0  }
 0x2f2   : > { %2428 = vst.msk [vmem:[#allocation3 + $0x18] sm:$0xff] %vm2423_vm6, %v8760_v34 }
 0x2f3   : > { %v1686_v9 = vpop.f32.mrf.mxu2  ;;  %4739 = vmatmul.msk.f32.gmra.mxu1 %vm502_vm1, %v5598_v58  ;;  %v6553_v59 = vadd.f32 %v1683_v26, %v1570_v0  ;;  %v8759_v26 = vld [vmem:[#allocation8_spill] sm:$0xff]  ;;  %v6570_v0 = vpop.f32.mrf.mxu3  ;;  %2429 = vst.msk [vmem:[#allocation3 + $0x20] sm:$0xff] %vm2423_vm6, %v8760_v34 }
 0x2f4   : > { %2424 = vst.msk [vmem:[#allocation3] sm:$0xff] %vm2423_vm6, %v8760_v34 }
 0x2f5   : > { %8756 = vst [vmem:[#allocation31_spill] sm:$0xff] %v6553_v59 }
 0x2f6   : > { %2425 = vst.msk [vmem:[#allocation3 + $0x8] sm:$0xff] %vm2423_vm6, %v8760_v34 }
 0x2f7   : > { %2431 = vst.msk [vmem:[#allocation3 + $0x30] sm:$0xff] %vm2423_vm6, %v8760_v34 }
 0x2f8   : > { %v1529_v42 = vpop.f32.mrf.mxu1  ;;  %4774 = vmatmul.msk.f32.gmra.mxu2 %vm502_vm1, %v5649_v30  ;;  %v8761_v30 = vld [vmem:[#allocation67_spill] sm:$0xff]  ;;  %2432 = vst.msk [vmem:[#allocation3 + $0x38] sm:$0xff] %vm2423_vm6, %v8760_v34 }
 0x2f9   : > { %v1571_v1 = vadd.f32 %v1529_v42, %v8757_v35  ;;  %2434 = vst.msk [vmem:[#allocation3 + $0x48] sm:$0xff] %vm2423_vm6, %v8760_v34 }
 0x2fa   : > { %2435 = vst.msk [vmem:[#allocation3 + $0x50] sm:$0xff] %vm2423_vm6, %v8760_v34 }
 0x2fb   : > { %v1689_v50 = vpop.f32.mrf.mxu2  ;;  %4740 = vmatmul.msk.f32.gmra.mxu1 %vm502_vm1, %v5621_v10  ;;  %v6562_v11 = vadd.f32 %v1686_v9, %v1571_v1  ;;  %v8762_v9 = vld [vmem:[#allocation5_spill] sm:$0xff]  ;;  %v6587_v1 = vpop.f32.mrf.mxu0  ;;  %2437 = vst.msk [vmem:[#allocation3 + $0x60] sm:$0xff] %vm2423_vm6, %v8760_v34 }
 0x2fc   : > { %2438 = vst.msk [vmem:[#allocation3 + $0x68] sm:$0xff] %vm2423_vm6, %v8760_v34 }
 0x2fd   : > { %8758 = vst [vmem:[#allocation34_spill] sm:$0xff] %v6562_v11 }
 0x2fe   : > { %2440 = vst.msk [vmem:[#allocation3 + $0x78] sm:$0xff] %vm2423_vm6, %v8760_v34 }
 0x2ff   : > { %2441 = vst.msk [vmem:[#allocation3 + $0x80] sm:$0xff] %vm2423_vm6, %v8760_v34 }
 0x300   : > { %v1532_v58 = vpop.f32.mrf.mxu1  ;;  %4775 = vmatmul.msk.f32.gmra.mxu2 %vm502_vm1, %v8759_v26  ;;  %v8764_v26 = vld [vmem:[#allocation68_spill] sm:$0xff]  ;;  %2443 = vst.msk [vmem:[#allocation3 + $0x90] sm:$0xff] %vm2423_vm6, %v8760_v34 }
 0x301   : > { %v1572_v42 = vadd.f32 %v1532_v58, %v8761_v30  ;;  %v2566_v58 = vld [vmem:[%s8432_s4] sm:$0xf]  ;;  %2444 = vst.msk [vmem:[#allocation3 + $0x98] sm:$0xff] %vm2423_vm6, %v8760_v34 }
 0x302   : > { %4828 = vmatpush.msk.msrb.mxu0 %vm2761_vm5, %v2566_v58  ;;  %2446 = vst.msk [vmem:[#allocation3 + $0xa8] sm:$0xff] %vm2423_vm6, %v8760_v34 }
 0x303   : > { %v1692_v10 = vpop.f32.mrf.mxu2  ;;  %4741 = vmatmul.msk.f32.gmra.mxu1 %vm502_vm1, %v8762_v9  ;;  %v6579_v35 = vadd.f32 %v1689_v50, %v1572_v42  ;;  %v6604_v42 = vld [vmem:[#allocation3] sm:$0xff]  ;;  %v6610_v9 = vpop.f32.mrf.mxu3  ;;  %2447 = vst.msk [vmem:[#allocation3 + $0xb0] sm:$0xff] %vm2423_vm6, %v8760_v34 }
 0x304   : > { %4829 = vmatmul.msk.f32.vlgmr.msrb.gmra.mxu0 %vm2423_vm6, %v6604_v42  ;;  %2449 = vst.msk [vmem:[#allocation3 + $0xc0] sm:$0xff] %vm2423_vm6, %v8760_v34 }
 0x305   : > { %8763 = vst [vmem:[#allocation35_spill] sm:$0xff] %v6579_v35 }
 0x306   : > { %2450 = vst.msk [vmem:[#allocation3 + $0xc8] sm:$0xff] %vm2423_vm6, %v8760_v34 }
 0x307   : > { %2452 = vst.msk [vmem:[#allocation3 + $0xd8] sm:$0xff] %vm2423_vm6, %v8760_v34 }
 0x308   : > { %v1535_v50 = vpop.f32.mrf.mxu1  ;;  %4776 = vmatmul.msk.f32.gmra.mxu2 %vm502_vm1, %v8685_v29  ;;  %v8765_v29 = vld [vmem:[#allocation7_spill] sm:$0xff]  ;;  %2453 = vst.msk [vmem:[#allocation3 + $0xe0] sm:$0xff] %vm2423_vm6, %v8760_v34 }
 0x309   : > { %v1573_v30 = vadd.f32 %v1535_v50, %v8764_v26  ;;  %v2615_v50 = vrot.slane %v6604_v42, 1  ;;  %v6627_v26 = vld [vmem:[#allocation3 + $0x8] sm:$0xff]  ;;  %2455 = vst.msk [vmem:[#allocation3 + $0xf0] sm:$0xff] %vm2423_vm6, %v8760_v34 }
 0x30a   : > { %2456 = vst.msk [vmem:[#allocation3 + $0xf8] sm:$0xff] %vm2423_vm6, %v8760_v34 }
 0x30b   : > { %v1695_v58 = vpop.f32.mrf.mxu2  ;;  %4742 = vmatmul.msk.f32.gmra.mxu1 %vm502_vm1, %v8765_v29  ;;  %v6614_v35 = vadd.f32 %v1692_v10, %v1573_v30  ;;  %v6629_v10 = vpop.f32.mrf.mxu0  ;;  %v8525_v29 = vrot.slane %v6627_v26, 1  ;;  %2458 = vst.msk [vmem:[#allocation3 + $0x108] sm:$0xff] %vm2423_vm6, %v8760_v34 }
 0x30c   : > { %4830 = vmatmul.msk.f32.gmra.mxu0 %vm2423_vm6, %v6627_v26  ;;  %2459 = vst.msk [vmem:[#allocation3 + $0x110] sm:$0xff] %vm2423_vm6, %v8760_v34 }
 0x30d   : > { %8766 = vst [vmem:[#allocation38_spill] sm:$0xff] %v6614_v35  ;;  %v8767_v35 = vld [vmem:[#allocation69_spill] sm:$0xff] }
 0x30e   : > { %2461 = vst.msk [vmem:[#allocation3 + $0x120] sm:$0xff] %vm2423_vm6, %v8760_v34 }
 0x30f   : > { %2462 = vst.msk [vmem:[#allocation3 + $0x128] sm:$0xff] %vm2423_vm6, %v8760_v34 }
 0x310   : > { %v1538_v30 = vpop.f32.mrf.mxu1  ;;  %4777 = vmatmul.msk.f32.gmra.mxu2 %vm502_vm1, %v8688_v33  ;;  %v2617_v33 = vsel %vm694_vm3, %v2615_v50, %v8525_v29  ;;  %v4861_v50 = vld [vmem:[%s8432_s4 + $0x8] sm:$0xf]  ;;  %2464 = vst.msk [vmem:[#allocation3 + $0x138] sm:$0xff] %vm2423_vm6, %v8760_v34 }
 0x311   : > { %v1574_v11 = vadd.f32 %v1538_v30, %v8767_v35  ;;  %4796 = vmatmul.msk.f32.vlgmr.msra.gmra.mxu3 %vm2423_vm6, %v2617_v33  ;;  %v6655_v35 = vpop.f32.mrf.mxu3  ;;  %v8770_v30 = vld [vmem:[#allocation70_spill] sm:$0xff]  ;;  %4862 = vmatpush.msk.msrb.mxu1 %vm2761_vm5, %v4861_v50  ;;  %2465 = vst.msk [vmem:[#allocation3 + $0x140] sm:$0xff] %vm2423_vm6, %v8760_v34 }
 0x312   : > { %2467 = vst.msk [vmem:[#allocation3 + $0x150] sm:$0xff] %vm2423_vm6, %v8760_v34 }
 0x313   : > { %v1698_v59 = vpop.f32.mrf.mxu2  ;;  %4743 = vmatmul.msk.f32.gmra.mxu1 %vm502_vm1, %v8768_v44  ;;  %v6648_v25 = vadd.f32 %v1695_v58, %v1574_v11  ;;  %v4895_v44 = vld [vmem:[%s8432_s4 + $0xc] sm:$0xf]  ;;  %v4929_v11 = vld [vmem:[%s8432_s4 + $0x10] sm:$0xf]  ;;  %v6682_v29 = vpop.f32.mrf.mxu0  ;;  %2468 = vst.msk [vmem:[#allocation3 + $0x158] sm:$0xff] %vm2423_vm6, %v8760_v34 }
 0x314   : > { %4930 = vmatpush.msk.msrb.mxu3 %vm2761_vm5, %v4929_v11  ;;  %4896 = vmatpush.msk.msrb.mxu2 %vm2761_vm5, %v4895_v44  ;;  %2470 = vst.msk [vmem:[#allocation3 + $0x168] sm:$0xff] %vm2423_vm6, %v8760_v34  ;;  %v2010_v44 = vadd.f32 %v6316_v22, %v6233_v57 }
 0x315   : > { %8769 = vst [vmem:[#allocation39_spill] sm:$0xff] %v6648_v25 }
 0x316   : > { %2471 = vst.msk [vmem:[#allocation3 + $0x170] sm:$0xff] %vm2423_vm6, %v8760_v34 }
 0x317   : > { %2473 = vst.msk [vmem:[#allocation3 + $0x180] sm:$0xff] %vm2423_vm6, %v8760_v34 }
 0x318   : > { %v1541_v58 = vpop.f32.mrf.mxu1  ;;  %4778 = vmatmul.msk.f32.gmra.mxu2 %vm502_vm1, %v8691_v13  ;;  %v8771_v13 = vld [vmem:[#allocation13_spill] sm:$0xff]  ;;  %2474 = vst.msk [vmem:[#allocation3 + $0x188] sm:$0xff] %vm2423_vm6, %v8760_v34 }
 0x319   : > { %v1575_v33 = vadd.f32 %v1541_v58, %v8770_v30  ;;  %v6700_v58 = vpop.f32.mrf.mxu3  ;;  %v6711_v30 = vld [vmem:[%s8431_s3] ss:$0 sm:$0xff]  ;;  %2476 = vst.msk [vmem:[#allocation3 + $0x198] sm:$0xff] %vm2423_vm6, %v8760_v34 }
 0x31a   : > { %2477 = vst.msk [vmem:[#allocation3 + $0x1a0] sm:$0xff] %vm2423_vm6, %v8760_v34 }
 0x31b   : > { %4744 = vmatmul.msk.f32.gmra.mxu1 %vm502_vm1, %v8771_v13  ;;  %v2227_v11 = vpop.f32.mrf.mxu2  ;;  %v6688_v25 = vadd.f32 %v1698_v59, %v1575_v33  ;;  %v6721_v22 = vpop.f32.mrf.mxu0  ;;  %2430 = vst.msk [vmem:[#allocation3 + $0x28] sm:$0x3] %vm2426_vm7, %v8760_v34  ;;  %v2011_v13 = vadd.f32 %v6331_v28, %v6245_v14  ;;  %v8773_v28 = vld [vmem:[#allocation19_spill] sm:$0xff] }
 0x31c   : > { %2427 = vst.msk [vmem:[#allocation3 + $0x10] sm:$0x3] %vm2426_vm7, %v8760_v34 }
 0x31d   : > { %8772 = vst [vmem:[#allocation42_spill] sm:$0xff] %v6688_v25  ;;  %v8782_v25 = vld [vmem:[#allocation18_spill] sm:$0xff] }
 0x31e   : > { %2433 = vst.msk [vmem:[#allocation3 + $0x40] sm:$0x3] %vm2426_vm7, %v8760_v34 }
 0x31f   : > { %2436 = vst.msk [vmem:[#allocation3 + $0x58] sm:$0x3] %vm2426_vm7, %v8760_v34 }
 0x320   : > { %v2071_v59 = vpop.f32.mrf.mxu1  ;;  %4779 = vmatmul.msk.f32.gmra.mxu2 %vm502_vm1, %v8694_v2  ;;  %2439 = vst.msk [vmem:[#allocation3 + $0x70] sm:$0x3] %vm2426_vm7, %v8760_v34 }
 0x321   : > { %v2167_v50 = vadd.f32 %v2071_v59, %v2010_v44  ;;  %v6738_v44 = vpop.f32.mrf.mxu3  ;;  %2442 = vst.msk [vmem:[#allocation3 + $0x88] sm:$0x3] %vm2426_vm7, %v8760_v34 }
 0x322   : > { %2445 = vst.msk [vmem:[#allocation3 + $0xa0] sm:$0x3] %vm2426_vm7, %v8760_v34 }
 0x323   : > { %v2323_v57 = vadd.f32 %v2227_v11, %v2167_v50  ;;  %4745 = vmatmul.msk.f32.gmra.mxu1 %vm502_vm1, %v8686_v37  ;;  %v2230_v2 = vpop.f32.mrf.mxu2  ;;  %2448 = vst.msk [vmem:[#allocation3 + $0xb8] sm:$0x3] %vm2426_vm7, %v8760_v34 }
 0x324   : > { %2451 = vst.msk [vmem:[#allocation3 + $0xd0] sm:$0x3] %vm2426_vm7, %v8760_v34 }
 0x325   : > { %v2359_v33 = vadd.f32 %v6711_v30, %v2323_v57  ;;  %2454 = vst.msk [vmem:[#allocation3 + $0xe8] sm:$0x3] %vm2426_vm7, %v8760_v34 }
 0x326   : > { %2457 = vst.msk [vmem:[#allocation3 + $0x100] sm:$0x3] %vm2426_vm7, %v8760_v34 }
 0x327   : > { %v2391_v11 = vmax.f32 %v2359_v33, 0.0  ;;  %2460 = vst.msk [vmem:[#allocation3 + $0x118] sm:$0x3] %vm2426_vm7, %v8760_v34 }
 0x328   : > { %v2074_v37 = vpop.f32.mrf.mxu1  ;;  %4780 = vmatmul.msk.f32.gmra.mxu2 %vm502_vm1, %v8697_v17  ;;  %v6749_v17 = vld [vmem:[#allocation3 + $0x10] sm:$0x3]  ;;  %2463 = vst.msk [vmem:[#allocation3 + $0x130] sm:$0x3] %vm2426_vm7, %v8760_v34 }
 0x329   : > { %2480 = vst.msk [vmem:[#allocation3 + $0x19] sm:$0xff] %vm2423_vm6, %v2391_v11  ;;  %v2168_v59 = vadd.f32 %v2074_v37, %v2011_v13  ;;  %v2618_v33 = vrot.slane %v6749_v17, 1  ;;  %v2012_v13 = vadd.f32 %v6344_v3, %v6257_v45  ;;  %v8775_v37 = vrot.slane %v6627_v26, 1  ;;  %v6778_v3 = vpop.f32.mrf.mxu3 }
 0x32a   : > { %2466 = vst.msk [vmem:[#allocation3 + $0x148] sm:$0x3] %vm2426_vm7, %v8760_v34 }
 0x32b   : > { %v2324_v14 = vadd.f32 %v2230_v2, %v2168_v59  ;;  %4746 = vmatmul.msk.f32.gmra.mxu1 %vm502_vm1, %v8773_v28  ;;  %v2233_v50 = vpop.f32.mrf.mxu2  ;;  %v6755_v2 = vpop.f32.mrf.mxu0  ;;  %v2619_v59 = vsel %vm694_vm3, %v8775_v37, %v2618_v33  ;;  %2469 = vst.msk [vmem:[#allocation3 + $0x160] sm:$0x3] %vm2426_vm7, %v8760_v34 }
 0x32c   : > { %8774 = vst [vmem:[#allocation43_spill] sm:$0xff] %v6755_v2  ;;  %4797 = vmatmul.msk.f32.gmra.mxu3 %vm2423_vm6, %v2619_v59 }
 0x32d   : > { %v2360_v57 = vadd.f32 %v6711_v30, %v2324_v14  ;;  %2472 = vst.msk [vmem:[#allocation3 + $0x178] sm:$0x3] %vm2426_vm7, %v8760_v34 }
 0x32e   : > { %2475 = vst.msk [vmem:[#allocation3 + $0x190] sm:$0x3] %vm2426_vm7, %v8760_v34 }
 0x32f   : > { %v2392_v11 = vmax.f32 %v2360_v57, 0.0  ;;  %2478 = vst.msk [vmem:[#allocation3 + $0x1a8] sm:$0x3] %vm2426_vm7, %v8760_v34 }
 0x330   : > { %v2077_v14 = vpop.f32.mrf.mxu1  ;;  %4781 = vmatmul.msk.f32.gmra.mxu2 %vm502_vm1, %v8701_v8  ;;  %v6770_v28 = vld [vmem:[#allocation3 + $0x18] sm:$0xff]  ;;  %v8776_v8 = vld [vmem:[#allocation23_spill] sm:$0xff] }
 0x331   : > { %2481 = vst.msk [vmem:[#allocation3 + $0x21] sm:$0xff] %vm2423_vm6, %v2392_v11  ;;  %v2169_v45 = vadd.f32 %v2077_v14, %v2012_v13  ;;  %4831 = vmatmul.msk.f32.gmra.mxu0 %vm2423_vm6, %v6770_v28  ;;  %v2013_v11 = vadd.f32 %v6360_v43, %v6269_v60  ;;  %v8778_v43 = vld [vmem:[#allocation28_spill] sm:$0xff] }
 0x333   : > { %v2325_v57 = vadd.f32 %v2233_v50, %v2169_v45  ;;  %4747 = vmatmul.msk.f32.gmra.mxu1 %vm502_vm1, %v8776_v8  ;;  %v2236_v33 = vpop.f32.mrf.mxu2  ;;  %v6795_v37 = vpop.f32.mrf.mxu0  ;;  %v2620_v45 = vrot.slane %v6770_v28, 1 }
 0x334   : > { %8777 = vst [vmem:[#allocation46_spill] sm:$0xff] %v6795_v37 }
 0x335   : > { %v2361_v13 = vadd.f32 %v6711_v30, %v2325_v57 }
 0x337   : > { %v2393_v50 = vmax.f32 %v2361_v13, 0.0 }
 0x338   : > { %v2080_v59 = vpop.f32.mrf.mxu1  ;;  %4782 = vmatmul.msk.f32.gmra.mxu2 %vm502_vm1, %v8707_v18  ;;  %v6799_v14 = vld [vmem:[#allocation3 + $0x20] sm:$0xff]  ;;  %v6813_v18 = vld [vmem:[#allocation3 + $0x28] sm:$0x3] }
 0x339   : > { %2482 = vst.msk [vmem:[#allocation3 + $0x31] sm:$0xff] %vm2423_vm6, %v2393_v50  ;;  %v2170_v57 = vadd.f32 %v2080_v59, %v2013_v11  ;;  %v2621_v8 = vrot.slane %v6799_v14, 1  ;;  %4832 = vmatmul.msk.f32.gmra.mxu0 %vm2423_vm6, %v6799_v14  ;;  %v6815_v50 = vpop.f32.mrf.mxu3  ;;  %v8781_v59 = vld [vmem:[#allocation6_spill] sm:$0xff] }
 0x33a   : > { %8780 = vst [vmem:[#allocation50_spill] sm:$0xff] %v6815_v50  ;;  %v2014_v37 = vadd.f32 %v8782_v25, %v8781_v59  ;;  %v8785_v50 = vld [vmem:[#allocation32_spill] sm:$0xff]  ;;  %v8787_v59 = vld [vmem:[#allocation11_spill] sm:$0xff] }
 0x33b   : > { %v2326_v60 = vadd.f32 %v2236_v33, %v2170_v57  ;;  %4748 = vmatmul.msk.f32.gmra.mxu1 %vm502_vm1, %v8778_v43  ;;  %v2239_v34 = vpop.f32.mrf.mxu2  ;;  %v6809_v13 = vsel %vm694_vm3, %v2620_v45, %v2621_v8  ;;  %v2623_v57 = vrot.slane %v6813_v18, 1  ;;  %v6828_v2 = vpop.f32.mrf.mxu0 }
 0x33c   : > { %8779 = vst [vmem:[#allocation47_spill] sm:$0xff] %v6809_v13  ;;  %4798 = vmatmul.msk.f32.gmra.mxu3 %vm2423_vm6, %v6809_v13 }
 0x33d   : > { %v2362_v11 = vadd.f32 %v6711_v30, %v2326_v60  ;;  %8784 = vst [vmem:[#allocation51_spill] sm:$0xff] %v6828_v2 }
 0x33f   : > { %v2394_v33 = vmax.f32 %v2362_v11, 0.0  ;;  %v6833_v11 = vsel %vm694_vm3, %v2621_v8, %v2623_v57 }
 0x340   : > { %v2083_v43 = vpop.f32.mrf.mxu1  ;;  %4783 = vmatmul.msk.f32.gmra.mxu2 %vm502_vm1, %v8783_v16  ;;  %v6823_v45 = vld [vmem:[#allocation3 + $0x30] sm:$0xff]  ;;  %8786 = vst [vmem:[#allocation54_spill] sm:$0xff] %v6833_v11 }
 0x341   : > { %2483 = vst.msk [vmem:[#allocation3 + $0x39] sm:$0xff] %vm2423_vm6, %v2394_v33  ;;  %v2171_v13 = vadd.f32 %v2083_v43, %v2014_v37  ;;  %4833 = vmatmul.msk.f32.gmra.mxu0 %vm2423_vm6, %v6823_v45  ;;  %v2015_v37 = vadd.f32 %v6400_v39, %v8787_v59  ;;  %v6840_v33 = vpop.f32.mrf.mxu3 }
 0x342   : > { %8788 = vst [vmem:[#allocation55_spill] sm:$0xff] %v6840_v33  ;;  %v8795_v33 = vld [vmem:[#allocation45_spill] sm:$0xff] }
 0x343   : > { %v2327_v60 = vadd.f32 %v2239_v34, %v2171_v13  ;;  %4749 = vmatmul.msk.f32.gmra.mxu1 %vm502_vm1, %v8785_v50  ;;  %v2242_v25 = vpop.f32.mrf.mxu2  ;;  %v8789_v34 = vld [vmem:[#allocation41_spill] sm:$0xff]  ;;  %v2625_v50 = vrot.slane %v6823_v45, 1 }
 0x344   : > { %4799 = vmatmul.msk.f32.gmra.mxu3 %vm2423_vm6, %v6833_v11 }
 0x345   : > { %v2363_v16 = vadd.f32 %v6711_v30, %v2327_v60  ;;  %v8790_v60 = vld [vmem:[#allocation36_spill] sm:$0xff] }
 0x347   : > { %v2395_v43 = vmax.f32 %v2363_v16, 0.0 }
 0x348   : > { %v2086_v2 = vpop.f32.mrf.mxu1  ;;  %4784 = vmatmul.msk.f32.gmra.mxu2 %vm502_vm1, %v8789_v34  ;;  %v6844_v13 = vld [vmem:[#allocation3 + $0x38] sm:$0xff]  ;;  %v6856_v34 = vpop.f32.mrf.mxu0 }
 0x349   : > { %2484 = vst.msk [vmem:[#allocation3 + $0x49] sm:$0xff] %vm2423_vm6, %v2395_v43  ;;  %v2172_v8 = vadd.f32 %v2086_v2, %v2015_v37  ;;  %4834 = vmatmul.msk.f32.gmra.mxu0 %vm2423_vm6, %v6844_v13  ;;  %v2626_v57 = vrot.slane %v6844_v13, 1  ;;  %v6860_v2 = vld [vmem:[#allocation3 + $0x40] sm:$0x3]  ;;  %v8794_v43 = vld [vmem:[#allocation16_spill] sm:$0xff] }
 0x34a   : > { %8792 = vst [vmem:[#allocation59_spill] sm:$0xff] %v6856_v34  ;;  %v2016_v11 = vadd.f32 %v6419_v40, %v8794_v43  ;;  %v6870_v34 = vpop.f32.mrf.mxu3 }
 0x34b   : > { %v2328_v39 = vadd.f32 %v2242_v25, %v2172_v8  ;;  %4750 = vmatmul.msk.f32.gmra.mxu1 %vm502_vm1, %v8790_v60  ;;  %v2245_v16 = vpop.f32.mrf.mxu2  ;;  %v6854_v59 = vsel %vm694_vm3, %v2625_v50, %v2626_v57  ;;  %8793 = vst [vmem:[#allocation4_spill] sm:$0xff] %v6860_v2  ;;  %v2628_v8 = vrot.slane %v6860_v2, 1 }
 0x34c   : > { %8791 = vst [vmem:[#allocation22_spill] sm:$0xff] %v6854_v59  ;;  %4800 = vmatmul.msk.f32.gmra.mxu3 %vm2423_vm6, %v6854_v59 }
 0x34d   : > { %v2364_v37 = vadd.f32 %v6711_v30, %v2328_v39  ;;  %8796 = vst [vmem:[#allocation60_spill] sm:$0xff] %v6870_v34 }
 0x34f   : > { %v2396_v25 = vmax.f32 %v2364_v37, 0.0  ;;  %v6878_v37 = vsel %vm694_vm3, %v2626_v57, %v2628_v8 }
 0x350   : > { %v2089_v60 = vpop.f32.mrf.mxu1  ;;  %4785 = vmatmul.msk.f32.gmra.mxu2 %vm502_vm1, %v8795_v33  ;;  %v6868_v50 = vld [vmem:[#allocation3 + $0x48] sm:$0xff]  ;;  %8798 = vst [vmem:[#allocation61_spill] sm:$0xff] %v6878_v37  ;;  %v6883_v43 = vpop.f32.mrf.mxu0 }
 0x351   : > { %2485 = vst.msk [vmem:[#allocation3 + $0x51] sm:$0xff] %vm2423_vm6, %v2396_v25  ;;  %v2173_v59 = vadd.f32 %v2089_v60, %v2016_v11  ;;  %4835 = vmatmul.msk.f32.gmra.mxu0 %vm2423_vm6, %v6868_v50  ;;  %v8800_v25 = vld [vmem:[#allocation9_spill] sm:$0xff] }
 0x352   : > { %8799 = vst [vmem:[#allocation62_spill] sm:$0xff] %v6883_v43  ;;  %v2017_v11 = vadd.f32 %v6438_v38, %v8800_v25 }
 0x353   : > { %v2329_v39 = vadd.f32 %v2245_v16, %v2173_v59  ;;  %4751 = vmatmul.msk.f32.gmra.mxu1 %vm502_vm1, %v8797_v27  ;;  %v2248_v40 = vpop.f32.mrf.mxu2  ;;  %v8801_v16 = vld [vmem:[#allocation49_spill] sm:$0xff]  ;;  %v2630_v59 = vrot.slane %v6868_v50, 1 }
 0x354   : > { %4801 = vmatmul.msk.f32.gmra.mxu3 %vm2423_vm6, %v6878_v37 }
 0x355   : > { %v2365_v33 = vadd.f32 %v6711_v30, %v2329_v39  ;;  %v6896_v39 = vpop.f32.mrf.mxu3 }
 0x356   : > { %8802 = vst [vmem:[#allocation63_spill] sm:$0xff] %v6896_v39 }
 0x357   : > { %v2397_v60 = vmax.f32 %v2365_v33, 0.0  ;;  %v8803_v33 = vld [vmem:[#allocation44_spill] sm:$0xff] }
 0x358   : > { %v2092_v34 = vpop.f32.mrf.mxu1  ;;  %4786 = vmatmul.msk.f32.gmra.mxu2 %vm502_vm1, %v8801_v16  ;;  %v6889_v27 = vld [vmem:[#allocation3 + $0x50] sm:$0xff] }
 0x359   : > { %2486 = vst.msk [vmem:[#allocation3 + $0x61] sm:$0xff] %vm2423_vm6, %v2397_v60  ;;  %v2174_v57 = vadd.f32 %v2092_v34, %v2017_v11  ;;  %4836 = vmatmul.msk.f32.gmra.mxu0 %vm2423_vm6, %v6889_v27  ;;  %v2631_v8 = vrot.slane %v6889_v27, 1  ;;  %v6905_v34 = vld [vmem:[#allocation3 + $0x58] sm:$0x3]  ;;  %v8805_v11 = vld [vmem:[#allocation14_spill] sm:$0xff] }
 0x35a   : > { %v1865_v60 = vadd.f32 %v6474_v36, %v8805_v11  ;;  %v8810_v11 = vld [vmem:[#allocation12_spill] sm:$0xff] }
 0x35b   : > { %v2330_v38 = vadd.f32 %v2248_v40, %v2174_v57  ;;  %4752 = vmatmul.msk.f32.gmra.mxu1 %vm502_vm1, %v8803_v33  ;;  %v2251_v25 = vpop.f32.mrf.mxu2  ;;  %v6901_v16 = vsel %vm694_vm3, %v2630_v59, %v2631_v8  ;;  %v2633_v57 = vrot.slane %v6905_v34, 1  ;;  %v6912_v33 = vpop.f32.mrf.mxu0  ;;  %v8807_v59 = vld [vmem:[#allocation53_spill] sm:$0xff] }
 0x35c   : > { %8804 = vst [vmem:[#allocation64_spill] sm:$0xff] %v6901_v16  ;;  %4802 = vmatmul.msk.f32.gmra.mxu3 %vm2423_vm6, %v6901_v16  ;;  %v2018_v43 = vadd.f32 %v6454_v20, %v1865_v60  ;;  %v1866_v60 = vadd.f32 %v6493_v53, %v8810_v11 }
 0x35d   : > { %v2366_v37 = vadd.f32 %v6711_v30, %v2330_v38  ;;  %8806 = vst [vmem:[#allocation65_spill] sm:$0xff] %v6912_v33  ;;  %v8808_v38 = vld [vmem:[#allocation48_spill] sm:$0xff] }
 0x35f   : > { %v2398_v40 = vmax.f32 %v2366_v37, 0.0  ;;  %v6924_v37 = vsel %vm694_vm3, %v2631_v8, %v2633_v57 }
 0x360   : > { %v2095_v39 = vpop.f32.mrf.mxu1  ;;  %4787 = vmatmul.msk.f32.gmra.mxu2 %vm502_vm1, %v8807_v59  ;;  %v6916_v2 = vld [vmem:[#allocation3 + $0x60] sm:$0xff]  ;;  %8809 = vst [vmem:[#allocation66_spill] sm:$0xff] %v6924_v37  ;;  %v6930_v59 = vpop.f32.mrf.mxu3 }
 0x361   : > { %2487 = vst.msk [vmem:[#allocation3 + $0x69] sm:$0xff] %vm2423_vm6, %v2398_v40  ;;  %v2175_v16 = vadd.f32 %v2095_v39, %v2018_v43  ;;  %4837 = vmatmul.msk.f32.gmra.mxu0 %vm2423_vm6, %v6916_v2  ;;  %v2019_v39 = vadd.f32 %v6465_v31, %v1866_v60  ;;  %v8812_v40 = vld [vmem:[#allocation57_spill] sm:$0xff]  ;;  %v2635_v53 = vrot.slane %v6916_v2, 1 }
 0x362   : > { %8811 = vst [vmem:[#allocation8_spill] sm:$0xff] %v6930_v59 }
 0x363   : > { %v2331_v36 = vadd.f32 %v2251_v25, %v2175_v16  ;;  %4753 = vmatmul.msk.f32.gmra.mxu1 %vm502_vm1, %v8808_v38  ;;  %v2254_v20 = vpop.f32.mrf.mxu2  ;;  %v6945_v11 = vpop.f32.mrf.mxu0 }
 0x364   : > { %4803 = vmatmul.msk.f32.gmra.mxu3 %vm2423_vm6, %v6924_v37  ;;  %8813 = vst [vmem:[#allocation67_spill] sm:$0xff] %v6945_v11  ;;  %v8817_v11 = vrot.slane %v6480_v12, 2 }
 0x365   : > { %v2367_v43 = vadd.f32 %v6711_v30, %v2331_v36  ;;  %v2199_v36 = vrot.slane %v6467_v52, 2 }
 0x367   : > { %v2399_v25 = vmax.f32 %v2367_v43, 0.0  ;;  %v8814_v43 = vld [vmem:[#allocation52_spill] sm:$0xff] }
 0x368   : > { %v2098_v16 = vpop.f32.mrf.mxu1  ;;  %4788 = vmatmul.msk.f32.gmra.mxu2 %vm502_vm1, %v8812_v40  ;;  %v6936_v38 = vld [vmem:[#allocation3 + $0x68] sm:$0xff] }
 0x369   : > { %2488 = vst.msk [vmem:[#allocation3 + $0x79] sm:$0xff] %vm2423_vm6, %v2399_v25  ;;  %v2176_v8 = vadd.f32 %v2098_v16, %v2019_v39  ;;  %4838 = vmatmul.msk.f32.gmra.mxu0 %vm2423_vm6, %v6936_v38  ;;  %v2636_v57 = vrot.slane %v6936_v38, 1  ;;  %v6954_v25 = vld [vmem:[#allocation3 + $0x70] sm:$0x3]  ;;  %v8816_v16 = vld [vmem:[#allocation17_spill] sm:$0xff] }
 0x36a   : > { %v1867_v37 = vadd.f32 %v6504_v51, %v8816_v16  ;;  %v2638_v33 = vrot.slane %v6954_v25, 1  ;;  %v8539_v16 = vrot.slane %v6480_v12, 1 }
 0x36b   : > { %v2332_v60 = vadd.f32 %v2254_v20, %v2176_v8  ;;  %4754 = vmatmul.msk.f32.gmra.mxu1 %vm502_vm1, %v8814_v43  ;;  %v2257_v40 = vpop.f32.mrf.mxu2  ;;  %v6950_v39 = vsel %vm694_vm3, %v2635_v53, %v2636_v57  ;;  %v6962_v20 = vsel %vm1131_vm4, %v2199_v36, %v8817_v11  ;;  %v6965_v43 = vpop.f32.mrf.mxu3  ;;  %v8818_v11 = vld [vmem:[#allocation56_spill] sm:$0xff] }
 0x36c   : > { %8815 = vst [vmem:[#allocation5_spill] sm:$0xff] %v6950_v39  ;;  %4804 = vmatmul.msk.f32.gmra.mxu3 %vm2423_vm6, %v6950_v39  ;;  %v2020_v8 = vadd.f32 %v6482_v55, %v1867_v37  ;;  %v6978_v37 = vsel %vm694_vm3, %v2636_v57, %v2638_v33 }
 0x36d   : > { %v2368_v31 = vadd.f32 %v6711_v30, %v2332_v60  ;;  %8819 = vst [vmem:[#allocation68_spill] sm:$0xff] %v6978_v37 }
 0x36f   : > { %v2400_v53 = vmax.f32 %v2368_v31, 0.0  ;;  %v6980_v31 = vpop.f32.mrf.mxu0 }
 0x370   : > { %v2101_v39 = vpop.f32.mrf.mxu1  ;;  %4789 = vmatmul.msk.f32.gmra.mxu2 %vm502_vm1, %v6002_v61  ;;  %v6970_v59 = vld [vmem:[#allocation3 + $0x78] sm:$0xff]  ;;  %v8820_v61 = vld [vmem:[#allocation15_spill] sm:$0xff] }
 0x371   : > { %2489 = vst.msk [vmem:[#allocation3 + $0x81] sm:$0xff] %vm2423_vm6, %v2400_v53  ;;  %v2177_v51 = vadd.f32 %v2101_v39, %v2020_v8  ;;  %4839 = vmatmul.msk.f32.gmra.mxu0 %vm2423_vm6, %v6970_v59  ;;  %v1868_v60 = vadd.f32 %v6517_v6, %v8820_v61  ;;  %v2043_v39 = vrot.slane %v6467_v52, 1  ;;  %v2640_v52 = vrot.slane %v6970_v59, 1 }
 0x373   : > { %v2333_v36 = vadd.f32 %v2257_v40, %v2177_v51  ;;  %4755 = vmatmul.msk.f32.gmra.mxu1 %vm502_vm1, %v8818_v11  ;;  %v2260_v55 = vpop.f32.mrf.mxu2  ;;  %v2021_v8 = vadd.f32 %v6498_v7, %v1868_v60  ;;  %v6994_v57 = vpop.f32.mrf.mxu3  ;;  %v7004_v7 = vsel %vm694_vm3, %v2043_v39, %v8539_v16  ;;  %v8821_v11 = vld [vmem:[#allocation58_spill] sm:$0xff] }
 0x374   : > { %4805 = vmatmul.msk.f32.gmra.mxu3 %vm2423_vm6, %v6978_v37 }
 0x375   : > { %v2369_v40 = vadd.f32 %v6711_v30, %v2333_v36 }
 0x377   : > { %v2401_v53 = vmax.f32 %v2369_v40, 0.0  ;;  %v7018_v39 = vpop.f32.mrf.mxu0 }
 0x378   : > { %v2104_v51 = vpop.f32.mrf.mxu1  ;;  %4790 = vmatmul.msk.f32.gmra.mxu2 %vm502_vm1, %v6412_v41  ;;  %v6992_v33 = vld [vmem:[#allocation3 + $0x80] sm:$0xff]  ;;  %v7013_v40 = vld [vmem:[#allocation3 + $0x88] sm:$0x3] }
 0x379   : > { %2490 = vst.msk [vmem:[#allocation3 + $0x91] sm:$0xff] %vm2423_vm6, %v2401_v53  ;;  %v2178_v6 = vadd.f32 %v2104_v51, %v2021_v8  ;;  %4840 = vmatmul.msk.f32.gmra.mxu0 %vm2423_vm6, %v6992_v33  ;;  %v2641_v36 = vrot.slane %v6992_v33, 1  ;;  %v8823_v8 = vld [vmem:[#allocation20_spill] sm:$0xff] }
 0x37a   : > { %v1869_v53 = vadd.f32 %v6529_v46, %v8823_v8  ;;  %v8824_v8 = vld [vmem:[#allocation24_spill] sm:$0xff] }
 0x37b   : > { %v2334_v41 = vadd.f32 %v2260_v55, %v2178_v6  ;;  %4756 = vmatmul.msk.f32.gmra.mxu1 %vm502_vm1, %v8821_v11  ;;  %v2263_v61 = vpop.f32.mrf.mxu2  ;;  %v7009_v60 = vsel %vm694_vm3, %v2640_v52, %v2641_v36  ;;  %v2643_v11 = vrot.slane %v7013_v40, 1  ;;  %v7029_v46 = vpop.f32.mrf.mxu3 }
 0x37c   : > { %8822 = vst [vmem:[#allocation7_spill] sm:$0xff] %v7009_v60  ;;  %4806 = vmatmul.msk.f32.gmra.mxu3 %vm2423_vm6, %v7009_v60  ;;  %v2022_v55 = vadd.f32 %v6513_v21, %v1869_v53 }
 0x37d   : > { %v2370_v51 = vadd.f32 %v6711_v30, %v2334_v41  ;;  %v7034_v53 = vsel %vm694_vm3, %v2641_v36, %v2643_v11 }
 0x37e   : > { %8825 = vst [vmem:[#allocation69_spill] sm:$0xff] %v7034_v53 }
 0x37f   : > { %v2402_v6 = vmax.f32 %v2370_v51, 0.0  ;;  %v7044_v37 = vpop.f32.mrf.mxu0 }
 0x380   : > { %v2107_v16 = vpop.f32.mrf.mxu1  ;;  %4791 = vmatmul.msk.f32.gmra.mxu2 %vm502_vm1, %v6427_v23  ;;  %v7024_v52 = vld [vmem:[#allocation3 + $0x90] sm:$0xff]  ;;  %v8826_v23 = vld [vmem:[#allocation21_spill] sm:$0xff]  ;;  %8827 = vst [vmem:[#allocation10_spill] sm:$0xff] %v7044_v37 }
 0x381   : > { %2491 = vst.msk [vmem:[#allocation3 + $0x99] sm:$0xff] %vm2423_vm6, %v2402_v6  ;;  %v2179_v60 = vadd.f32 %v2107_v16, %v2022_v55  ;;  %4841 = vmatmul.msk.f32.gmra.mxu0 %vm2423_vm6, %v7024_v52  ;;  %v1870_v51 = vadd.f32 %v6544_v15, %v8826_v23  ;;  %v3058_v16 = vrot.slane %v6604_v42, 2  ;;  %v8546_v55 = vrot.slane %v6627_v26, 2 }
 0x382   : > { %v2645_v42 = vrot.slane %v7024_v52, 1 }
 0x383   : > { %v2335_v41 = vadd.f32 %v2263_v61, %v2179_v60  ;;  %4757 = vmatmul.msk.f32.gmra.mxu1 %vm502_vm1, %v8824_v8  ;;  %v2266_v21 = vpop.f32.mrf.mxu2  ;;  %v644_v61 = vld [vmem:[#allocation2 + $0x1a8] sm:$0x3]  ;;  %v2023_v60 = vadd.f32 %v6524_v5, %v1870_v51 }
 0x384   : > { %4807 = vmatmul.msk.f32.gmra.mxu3 %vm2423_vm6, %v7034_v53  ;;  %v2202_v53 = vrot.slane %v644_v61, 2  ;;  %v8828_v51 = vld [vmem:[#allocation29_spill] sm:$0xff] }
 0x385   : > { %v2371_v6 = vadd.f32 %v6711_v30, %v2335_v41  ;;  %v3060_v41 = vsel %vm1131_vm4, %v3058_v16, %v8546_v55 }
 0x387   : > { %v2403_v8 = vmax.f32 %v2371_v6, 0.0 }
 0x388   : > { %v2110_v36 = vpop.f32.mrf.mxu1  ;;  %4792 = vmatmul.msk.f32.gmra.mxu2 %vm502_vm1, %v6962_v20  ;;  %v7048_v11 = vld [vmem:[#allocation3 + $0x98] sm:$0xff] }
 0x389   : > { %2492 = vst.msk [vmem:[#allocation3 + $0xa9] sm:$0xff] %vm2423_vm6, %v2403_v8  ;;  %v2180_v15 = vadd.f32 %v2110_v36, %v2023_v60  ;;  %4842 = vmatmul.msk.f32.gmra.mxu0 %vm2423_vm6, %v7048_v11  ;;  %v2646_v5 = vrot.slane %v7048_v11, 1  ;;  %v7065_v60 = vld [vmem:[#allocation3 + $0xa0] sm:$0x3]  ;;  %v1871_v8 = vadd.f32 %v6555_v24, %v6417_v19  ;;  %v7069_v36 = vpop.f32.mrf.mxu3  ;;  %v7083_v24 = vpop.f32.mrf.mxu0 }
 0x38a   : > { %v2648_v55 = vrot.slane %v7065_v60, 1 }
 0x38b   : > { %v2336_v23 = vadd.f32 %v2266_v21, %v2180_v15  ;;  %4758 = vmatmul.msk.f32.gmra.mxu1 %vm502_vm1, %v8828_v51  ;;  %v2269_v20 = vpop.f32.mrf.mxu2  ;;  %v7061_v6 = vsel %vm694_vm3, %v2645_v42, %v2646_v5  ;;  %v8830_v21 = vrot.slane %v6480_v12, 2  ;;  %v2024_v51 = vadd.f32 %v6535_v63, %v1871_v8 }
 0x38c   : > { %8829 = vst [vmem:[#allocation70_spill] sm:$0xff] %v7061_v6  ;;  %4808 = vmatmul.msk.f32.gmra.mxu3 %vm2423_vm6, %v7061_v6  ;;  %v2046_v8 = vrot.slane %v644_v61, 1 }
 0x38d   : > { %v2372_v16 = vadd.f32 %v6711_v30, %v2336_v23  ;;  %v2203_v15 = vsel %vm1131_vm4, %v8830_v21, %v2202_v53  ;;  %v7088_v53 = vsel %vm694_vm3, %v2646_v5, %v2648_v55  ;;  %v8832_v55 = vrot.slane %v6480_v12, 1 }
 0x38e   : > { %8831 = vst [vmem:[#allocation13_spill] sm:$0xff] %v7088_v53 }
 0x38f   : > { %v2404_v42 = vmax.f32 %v2372_v16, 0.0  ;;  %v2047_v61 = vsel %vm694_vm3, %v8832_v55, %v2046_v8  ;;  %v1873_v8 = vadd.f32 %v6610_v9, %v6444_v4 }
 0x390   : > { %v2113_v37 = vpop.f32.mrf.mxu1  ;;  %4793 = vmatmul.msk.f32.gmra.mxu2 %vm502_vm1, %v2203_v15  ;;  %v7078_v6 = vld [vmem:[#allocation3 + $0xa8] sm:$0xff] }
 0x391   : > { %2493 = vst.msk [vmem:[#allocation3 + $0xb1] sm:$0xff] %vm2423_vm6, %v2404_v42  ;;  %v2181_v19 = vadd.f32 %v2113_v37, %v2024_v51  ;;  %4843 = vmatmul.msk.f32.gmra.mxu0 %vm2423_vm6, %v7078_v6  ;;  %v1872_v37 = vadd.f32 %v6570_v0, %v6433_v56  ;;  %v7096_v15 = vpop.f32.mrf.mxu3  ;;  %v7110_v5 = vpop.f32.mrf.mxu0 }
 0x392   : > { %8833 = vst [vmem:[#allocation19_spill] sm:$0xff] %v7110_v5 }
 0x393   : > { %v2337_v23 = vadd.f32 %v2269_v20, %v2181_v19  ;;  %4759 = vmatmul.msk.f32.gmra.mxu1 %vm502_vm1, %v7004_v7  ;;  %v2272_v63 = vpop.f32.mrf.mxu2  ;;  %v2025_v21 = vadd.f32 %v6549_v62, %v1872_v37  ;;  %v2650_v62 = vrot.slane %v7078_v6, 1 }
 0x394   : > { %4809 = vmatmul.msk.f32.gmra.mxu3 %vm2423_vm6, %v7088_v53 }
 0x395   : > { %v2373_v16 = vadd.f32 %v6711_v30, %v2337_v23 }
 0x397   : > { %v2405_v20 = vmax.f32 %v2373_v16, 0.0  ;;  %v2026_v16 = vadd.f32 %v6564_v49, %v1873_v8 }
 0x398   : > { %v2116_v51 = vpop.f32.mrf.mxu1  ;;  %4897 = vmatmul.msk.f32.vlgmr.msrb.gmra.mxu2 %vm2423_vm6, %v6770_v28  ;;  %v7100_v7 = vld [vmem:[#allocation3 + $0xb0] sm:$0xff]  ;;  %v7118_v23 = vld [vmem:[#allocation3 + $0xb8] sm:$0x3] }
 0x399   : > { %2494 = vst.msk [vmem:[#allocation3 + $0xc1] sm:$0xff] %vm2423_vm6, %v2405_v20  ;;  %v2182_v56 = vadd.f32 %v2116_v51, %v2025_v21  ;;  %4844 = vmatmul.msk.f32.gmra.mxu0 %vm2423_vm6, %v7100_v7  ;;  %v2651_v0 = vrot.slane %v7100_v7, 1  ;;  %v7129_v55 = vpop.f32.mrf.mxu3 }
 0x39b   : > { %v2338_v42 = vadd.f32 %v2272_v63, %v2182_v56  ;;  %4760 = vmatmul.msk.f32.gmra.mxu1 %vm502_vm1, %v2047_v61  ;;  %v2275_v19 = vpop.f32.mrf.mxu2  ;;  %v7114_v12 = vsel %vm694_vm3, %v2650_v62, %v2651_v0  ;;  %v2653_v63 = vrot.slane %v7118_v23, 1  ;;  %v2965_v56 = vpop.f32.mrf.mxu0  ;;  %v3061_v62 = vrot.slane %v6749_v17, 2 }
 0x39c   : > { %8834 = vst [vmem:[#allocation23_spill] sm:$0xff] %v7114_v12  ;;  %4810 = vmatmul.msk.f32.gmra.mxu3 %vm2423_vm6, %v7114_v12 }
 0x39d   : > { %v2374_v37 = vadd.f32 %v6711_v30, %v2338_v42  ;;  %v7136_v49 = vsel %vm694_vm3, %v2651_v0, %v2653_v63  ;;  %v1874_v42 = vadd.f32 %v6655_v35, %v6452_v32  ;;  %v8836_v0 = vrot.slane %v6627_v26, 2 }
 0x39e   : > { %8835 = vst [vmem:[#allocation28_spill] sm:$0xff] %v7136_v49 }
 0x39f   : > { %v2406_v21 = vmax.f32 %v2374_v37, 0.0  ;;  %v2027_v37 = vadd.f32 %v6587_v1, %v1874_v42  ;;  %v3064_v42 = vrot.slane %v6799_v14, 2 }
 0x3a0   : > { %v2119_v20 = vpop.f32.mrf.mxu1  ;;  %4898 = vmatmul.msk.f32.gmra.mxu2 %vm2423_vm6, %v6799_v14  ;;  %v7127_v51 = vld [vmem:[#allocation3 + $0xc0] sm:$0xff] }
 0x3a1   : > { %2495 = vst.msk [vmem:[#allocation3 + $0xc9] sm:$0xff] %vm2423_vm6, %v2406_v21  ;;  %v2183_v61 = vadd.f32 %v2119_v20, %v2026_v16  ;;  %4845 = vmatmul.msk.f32.gmra.mxu0 %vm2423_vm6, %v7127_v51  ;;  %v3062_v21 = vsel %vm1131_vm4, %v8836_v0, %v3061_v62  ;;  %v2655_v32 = vrot.slane %v7127_v51, 1  ;;  %v7157_v35 = vpop.f32.mrf.mxu3 }
 0x3a2   : > { %8837 = vst [vmem:[#allocation6_spill] sm:$0xff] %v7157_v35 }
 0x3a3   : > { %v2339_v4 = vadd.f32 %v2275_v19, %v2183_v61  ;;  %v2278_v9 = vpop.f32.mrf.mxu2  ;;  %4863 = vmatmul.msk.f32.vlgmr.msrb.gmra.mxu1 %vm2423_vm6, %v3060_v41 }
 0x3a4   : > { %4811 = vmatmul.msk.f32.gmra.mxu3 %vm2423_vm6, %v7136_v49 }
 0x3a5   : > { %v2375_v8 = vadd.f32 %v6711_v30, %v2339_v4  ;;  %v1875_v4 = vadd.f32 %v6700_v58, %v6463_v54 }
 0x3a7   : > { %v2407_v19 = vmax.f32 %v2375_v8, 0.0 }
 0x3a8   : > { %v2122_v16 = vpop.f32.mrf.mxu1  ;;  %4899 = vmatmul.msk.f32.gmra.mxu2 %vm2423_vm6, %v6823_v45  ;;  %v7147_v41 = vld [vmem:[#allocation3 + $0xc8] sm:$0xff]  ;;  %v7165_v61 = vld [vmem:[#allocation3 + $0xd0] sm:$0x3] }
 0x3a9   : > { %2496 = vst.msk [vmem:[#allocation3 + $0xd9] sm:$0xff] %vm2423_vm6, %v2407_v19  ;;  %v2184_v17 = vadd.f32 %v2122_v16, %v2027_v37  ;;  %4846 = vmatmul.msk.f32.gmra.mxu0 %vm2423_vm6, %v7147_v41  ;;  %v2656_v1 = vrot.slane %v7147_v41, 1  ;;  %v2658_v19 = vrot.slane %v7165_v61, 1  ;;  %v3063_v16 = vrot.slane %v6770_v28, 2 }
 0x3ab   : > { %v2340_v63 = vadd.f32 %v2278_v9, %v2184_v17  ;;  %v2281_v20 = vpop.f32.mrf.mxu2  ;;  %4864 = vmatmul.msk.f32.gmra.mxu1 %vm2423_vm6, %v3062_v21  ;;  %v7161_v26 = vsel %vm694_vm3, %v2655_v32, %v2656_v1  ;;  %v2028_v9 = vadd.f32 %v6629_v10, %v1875_v4  ;;  %v7182_v58 = vsel %vm1131_vm4, %v3063_v16, %v3064_v42 }
 0x3ac   : > { %8838 = vst [vmem:[#allocation18_spill] sm:$0xff] %v7161_v26  ;;  %4812 = vmatmul.msk.f32.gmra.mxu3 %vm2423_vm6, %v7161_v26  ;;  %v7187_v28 = vsel %vm694_vm3, %v2656_v1, %v2658_v19 }
 0x3ad   : > { %v2376_v62 = vadd.f32 %v6711_v30, %v2340_v63  ;;  %8839 = vst [vmem:[#allocation37_spill] sm:$0xff] %v7187_v28  ;;  %v1876_v63 = vadd.f32 %v6738_v44, %v6478_v47 }
 0x3ae   : > { %v2968_v8 = vpop.f32.mrf.mxu0 }
 0x3af   : > { %v2408_v37 = vmax.f32 %v2376_v62, 0.0  ;;  %v2785_v17 = vpop.f32.mrf.mxu3 }
 0x3b0   : > { %v2125_v0 = vpop.f32.mrf.mxu1  ;;  %4900 = vmatmul.msk.f32.gmra.mxu2 %vm2423_vm6, %v6844_v13  ;;  %v7176_v21 = vld [vmem:[#allocation3 + $0xd8] sm:$0xff]  ;;  %v7191_v32 = vadd.f32 %v2965_v56, %v2785_v17 }
 0x3b1   : > { %2497 = vst.msk [vmem:[#allocation3 + $0xe1] sm:$0xff] %vm2423_vm6, %v2408_v37  ;;  %v2185_v54 = vadd.f32 %v2125_v0, %v2028_v9  ;;  %4847 = vmatmul.msk.f32.gmra.mxu0 %vm2423_vm6, %v7176_v21  ;;  %v2029_v9 = vadd.f32 %v6682_v29, %v1876_v63  ;;  %v2660_v47 = vrot.slane %v7176_v21, 1 }
 0x3b3   : > { %v2341_v10 = vadd.f32 %v2281_v20, %v2185_v54  ;;  %v2284_v14 = vpop.f32.mrf.mxu2  ;;  %4865 = vmatmul.msk.f32.gmra.mxu1 %vm2423_vm6, %v7182_v58  ;;  %v3066_v20 = vrot.slane %v6813_v18, 2 }
 0x3b4   : > { %4813 = vmatmul.msk.f32.gmra.mxu3 %vm2423_vm6, %v7187_v28 }
 0x3b5   : > { %v2377_v4 = vadd.f32 %v6711_v30, %v2341_v10  ;;  %v7208_v18 = vsel %vm1131_vm4, %v3064_v42, %v3066_v20  ;;  %v1877_v10 = vadd.f32 %v6778_v3, %v6491_v48  ;;  %v3068_v48 = vrot.slane %v6823_v45, 2  ;;  %v8843_v45 = vld [vmem:[#allocation27_spill] sm:$0xff] }
 0x3b6   : > { %v2971_v62 = vpop.f32.mrf.mxu0 }
 0x3b7   : > { %v2409_v37 = vmax.f32 %v2377_v4, 0.0  ;;  %v2030_v63 = vadd.f32 %v6721_v22, %v1877_v10 }
 0x3b8   : > { %v2128_v16 = vpop.f32.mrf.mxu1  ;;  %4901 = vmatmul.msk.f32.gmra.mxu2 %vm2423_vm6, %v6868_v50  ;;  %v7200_v1 = vld [vmem:[#allocation3 + $0xe0] sm:$0xff]  ;;  %v7217_v54 = vld [vmem:[#allocation3 + $0xe8] sm:$0x3] }
 0x3b9   : > { %2498 = vst.msk [vmem:[#allocation3 + $0xf1] sm:$0xff] %vm2423_vm6, %v2409_v37  ;;  %v2186_v56 = vadd.f32 %v2128_v16, %v2029_v9  ;;  %4848 = vmatmul.msk.f32.gmra.mxu0 %vm2423_vm6, %v7200_v1  ;;  %v2661_v44 = vrot.slane %v7200_v1, 1  ;;  %v2663_v9 = vrot.slane %v7217_v54, 1 }
 0x3bb   : > { %v2342_v29 = vadd.f32 %v2284_v14, %v2186_v56  ;;  %v2287_v19 = vpop.f32.mrf.mxu2  ;;  %4866 = vmatmul.msk.f32.gmra.mxu1 %vm2423_vm6, %v7208_v18  ;;  %v7213_v0 = vsel %vm694_vm3, %v2660_v47, %v2661_v44  ;;  %v3069_v14 = vrot.slane %v6844_v13, 2  ;;  %v7241_v47 = vsel %vm694_vm3, %v2661_v44, %v2663_v9 }
 0x3bc   : > { %8840 = vst [vmem:[#allocation32_spill] sm:$0xff] %v7213_v0  ;;  %4814 = vmatmul.msk.f32.gmra.mxu3 %vm2423_vm6, %v7213_v0 }
 0x3bd   : > { %v2378_v17 = vadd.f32 %v6711_v30, %v2342_v29  ;;  %v7236_v22 = vsel %vm1131_vm4, %v3068_v48, %v3069_v14  ;;  %8842 = vst [vmem:[#allocation41_spill] sm:$0xff] %v7241_v47  ;;  %v8844_v29 = vld [vmem:[#allocation50_spill] sm:$0xff] }
 0x3be   : > { %v2974_v42 = vpop.f32.mrf.mxu0  ;;  %8841 = vst [vmem:[#allocation11_spill] sm:$0xff] %v7236_v22  ;;  %v1878_v10 = vadd.f32 %v8844_v29, %v8843_v45 }
 0x3bf   : > { %v2410_v4 = vmax.f32 %v2378_v17, 0.0  ;;  %v2788_v20 = vpop.f32.mrf.mxu3 }
 0x3c0   : > { %v7225_v37 = vadd.f32 %v2968_v8, %v2788_v20  ;;  %v2131_v16 = vpop.f32.mrf.mxu1  ;;  %4902 = vmatmul.msk.f32.gmra.mxu2 %vm2423_vm6, %v6889_v27  ;;  %v7229_v56 = vld [vmem:[#allocation3 + $0xf0] sm:$0xff] }
 0x3c1   : > { %2499 = vst.msk [vmem:[#allocation3 + $0xf9] sm:$0xff] %vm2423_vm6, %v2410_v4  ;;  %v2187_v3 = vadd.f32 %v2131_v16, %v2030_v63  ;;  %4849 = vmatmul.msk.f32.gmra.mxu0 %vm2423_vm6, %v7229_v56  ;;  %v8845_v4 = vld [vmem:[#allocation4_spill] sm:$0xff]  ;;  %v8846_v16 = vld [vmem:[#allocation43_spill] sm:$0xff] }
 0x3c2   : > { %v3071_v20 = vrot.slane %v8845_v4, 2  ;;  %v8849_v4 = vld [vmem:[#allocation25_spill] sm:$0xff] }
 0x3c3   : > { %v2343_v13 = vadd.f32 %v2287_v19, %v2187_v3  ;;  %v2290_v8 = vpop.f32.mrf.mxu2  ;;  %4867 = vmatmul.msk.f32.gmra.mxu1 %vm2423_vm6, %v7236_v22  ;;  %v2031_v19 = vadd.f32 %v8846_v16, %v1878_v10  ;;  %v8850_v16 = vld [vmem:[#allocation55_spill] sm:$0xff] }
 0x3c4   : > { %4815 = vmatmul.msk.f32.gmra.mxu3 %vm2423_vm6, %v7241_v47  ;;  %v7262_v29 = vsel %vm1131_vm4, %v3069_v14, %v3071_v20  ;;  %v8851_v20 = vld [vmem:[#allocation46_spill] sm:$0xff] }
 0x3c5   : > { %v2379_v17 = vadd.f32 %v6711_v30, %v2343_v13  ;;  %v2665_v13 = vrot.slane %v7229_v56, 1  ;;  %8847 = vst [vmem:[#allocation36_spill] sm:$0xff] %v7262_v29 }
 0x3c6   : > { %v2977_v63 = vpop.f32.mrf.mxu0 }
 0x3c7   : > { %v2411_v48 = vmax.f32 %v2379_v17, 0.0  ;;  %v2791_v3 = vpop.f32.mrf.mxu3 }
 0x3c8   : > { %v7250_v0 = vadd.f32 %v2971_v62, %v2791_v3  ;;  %v2134_v5 = vpop.f32.mrf.mxu1  ;;  %4903 = vmatmul.msk.f32.gmra.mxu2 %vm2423_vm6, %v6916_v2  ;;  %v7254_v44 = vld [vmem:[#allocation3 + $0xf8] sm:$0xff] }
 0x3c9   : > { %2500 = vst.msk [vmem:[#allocation3 + $0x109] sm:$0xff] %vm2423_vm6, %v2411_v48  ;;  %v2188_v9 = vadd.f32 %v2134_v5, %v2031_v19  ;;  %4850 = vmatmul.msk.f32.gmra.mxu0 %vm2423_vm6, %v7254_v44  ;;  %v2666_v45 = vrot.slane %v7254_v44, 1  ;;  %v7271_v5 = vld [vmem:[#allocation3 + $0x100] sm:$0x3]  ;;  %v1879_v19 = vadd.f32 %v8850_v16, %v8849_v4  ;;  %v3073_v4 = vrot.slane %v6868_v50, 2 }
 0x3ca   : > { %v8854_v50 = vld [vmem:[#allocation26_spill] sm:$0xff] }
 0x3cb   : > { %v2344_v62 = vadd.f32 %v2290_v8, %v2188_v9  ;;  %v2293_v10 = vpop.f32.mrf.mxu2  ;;  %4868 = vmatmul.msk.f32.gmra.mxu1 %vm2423_vm6, %v7262_v29  ;;  %v7267_v17 = vsel %vm694_vm3, %v2665_v13, %v2666_v45  ;;  %v3074_v8 = vrot.slane %v6889_v27, 2  ;;  %v2032_v3 = vadd.f32 %v8851_v20, %v1879_v19  ;;  %v8855_v19 = vld [vmem:[#allocation60_spill] sm:$0xff] }
 0x3cc   : > { %8848 = vst [vmem:[#allocation16_spill] sm:$0xff] %v7267_v17  ;;  %4816 = vmatmul.msk.f32.gmra.mxu3 %vm2423_vm6, %v7267_v17  ;;  %v2668_v13 = vrot.slane %v7271_v5, 1 }
 0x3cd   : > { %v2380_v48 = vadd.f32 %v6711_v30, %v2344_v62  ;;  %v7290_v27 = vsel %vm1131_vm4, %v3073_v4, %v3074_v8 }
 0x3ce   : > { %v2980_v14 = vpop.f32.mrf.mxu0  ;;  %8852 = vst [vmem:[#allocation45_spill] sm:$0xff] %v7290_v27 }
 0x3cf   : > { %v2412_v9 = vmax.f32 %v2380_v48, 0.0  ;;  %v2794_v47 = vpop.f32.mrf.mxu3 }
 0x3d0   : > { %v7279_v35 = vadd.f32 %v2974_v42, %v2794_v47  ;;  %v2137_v28 = vpop.f32.mrf.mxu1  ;;  %4904 = vmatmul.msk.f32.gmra.mxu2 %vm2423_vm6, %v6936_v38  ;;  %v7283_v17 = vld [vmem:[#allocation3 + $0x108] sm:$0xff]  ;;  %v7295_v47 = vsel %vm694_vm3, %v2666_v45, %v2668_v13 }
 0x3d1   : > { %2501 = vst.msk [vmem:[#allocation3 + $0x111] sm:$0xff] %vm2423_vm6, %v2412_v9  ;;  %v2189_v62 = vadd.f32 %v2137_v28, %v2032_v3  ;;  %4851 = vmatmul.msk.f32.gmra.mxu0 %vm2423_vm6, %v7283_v17  ;;  %v1880_v28 = vadd.f32 %v8855_v19, %v8854_v50  ;;  %v3076_v3 = vrot.slane %v6905_v34, 2  ;;  %v8856_v9 = vld [vmem:[#allocation51_spill] sm:$0xff]  ;;  %v2670_v34 = vrot.slane %v7283_v17, 1 }
 0x3d2   : > { %8853 = vst [vmem:[#allocation40_spill] sm:$0xff] %v7295_v47 }
 0x3d3   : > { %v2345_v16 = vadd.f32 %v2293_v10, %v2189_v62  ;;  %v2296_v42 = vpop.f32.mrf.mxu2  ;;  %4869 = vmatmul.msk.f32.gmra.mxu1 %vm2423_vm6, %v7290_v27  ;;  %v2033_v10 = vadd.f32 %v8856_v9, %v1880_v28  ;;  %v7316_v50 = vsel %vm1131_vm4, %v3074_v8, %v3076_v3  ;;  %v8861_v9 = vld [vmem:[#allocation63_spill] sm:$0xff] }
 0x3d4   : > { %4817 = vmatmul.msk.f32.gmra.mxu3 %vm2423_vm6, %v7295_v47  ;;  %8857 = vst [vmem:[#allocation9_spill] sm:$0xff] %v7316_v50  ;;  %v8862_v3 = vld [vmem:[#allocation59_spill] sm:$0xff] }
 0x3d5   : > { %v2381_v48 = vadd.f32 %v6711_v30, %v2345_v16 }
 0x3d6   : > { %v2983_v20 = vpop.f32.mrf.mxu0 }
 0x3d7   : > { %v2413_v4 = vmax.f32 %v2381_v48, 0.0  ;;  %v2797_v62 = vpop.f32.mrf.mxu3  ;;  %v8860_v48 = vld [vmem:[#allocation33_spill] sm:$0xff] }
 0x3d8   : > { %v7304_v26 = vadd.f32 %v2977_v63, %v2797_v62  ;;  %v2140_v49 = vpop.f32.mrf.mxu1  ;;  %4905 = vmatmul.msk.f32.gmra.mxu2 %vm2423_vm6, %v6970_v59  ;;  %v7308_v45 = vld [vmem:[#allocation3 + $0x110] sm:$0xff] }
 0x3d9   : > { %2502 = vst.msk [vmem:[#allocation3 + $0x121] sm:$0xff] %vm2423_vm6, %v2413_v4  ;;  %v2190_v13 = vadd.f32 %v2140_v49, %v2033_v10  ;;  %4852 = vmatmul.msk.f32.gmra.mxu0 %vm2423_vm6, %v7308_v45  ;;  %v2671_v16 = vrot.slane %v7308_v45, 1  ;;  %v7325_v49 = vld [vmem:[#allocation3 + $0x118] sm:$0x3]  ;;  %v1881_v10 = vadd.f32 %v8861_v9, %v8860_v48  ;;  %v3078_v48 = vrot.slane %v6916_v2, 2  ;;  %v8865_v2 = vld [vmem:[#allocation30_spill] sm:$0xff] }
 0x3da   : > { %8859 = vst [vmem:[#allocation44_spill] sm:$0xff] %v7325_v49 }
 0x3db   : > { %v2346_v63 = vadd.f32 %v2296_v42, %v2190_v13  ;;  %v2299_v19 = vpop.f32.mrf.mxu2  ;;  %4870 = vmatmul.msk.f32.gmra.mxu1 %vm2423_vm6, %v7316_v50  ;;  %v7321_v28 = vsel %vm694_vm3, %v2670_v34, %v2671_v16  ;;  %v3079_v42 = vrot.slane %v6936_v38, 2  ;;  %v2034_v62 = vadd.f32 %v8862_v3, %v1881_v10  ;;  %v8866_v10 = vld [vmem:[#allocation8_spill] sm:$0xff] }
 0x3dc   : > { %8858 = vst [vmem:[#allocation49_spill] sm:$0xff] %v7321_v28  ;;  %4818 = vmatmul.msk.f32.gmra.mxu3 %vm2423_vm6, %v7321_v28  ;;  %v2673_v34 = vrot.slane %v7325_v49, 1 }
 0x3dd   : > { %v2382_v4 = vadd.f32 %v6711_v30, %v2346_v63  ;;  %v7344_v38 = vsel %vm1131_vm4, %v3078_v48, %v3079_v42 }
 0x3de   : > { %v2986_v8 = vpop.f32.mrf.mxu0  ;;  %8863 = vst [vmem:[#allocation14_spill] sm:$0xff] %v7344_v38 }
 0x3df   : > { %v2414_v13 = vmax.f32 %v2382_v4, 0.0  ;;  %v2800_v47 = vpop.f32.mrf.mxu3 }
 0x3e0   : > { %v7333_v12 = vadd.f32 %v2980_v14, %v2800_v47  ;;  %v2143_v53 = vpop.f32.mrf.mxu1  ;;  %4906 = vmatmul.msk.f32.gmra.mxu2 %vm2423_vm6, %v6992_v33  ;;  %v7337_v28 = vld [vmem:[#allocation3 + $0x120] sm:$0xff]  ;;  %v7349_v47 = vsel %vm694_vm3, %v2671_v16, %v2673_v34 }
 0x3e1   : > { %2503 = vst.msk [vmem:[#allocation3 + $0x129] sm:$0xff] %vm2423_vm6, %v2414_v13  ;;  %v2191_v63 = vadd.f32 %v2143_v53, %v2034_v62  ;;  %4853 = vmatmul.msk.f32.gmra.mxu0 %vm2423_vm6, %v7337_v28  ;;  %v1882_v53 = vadd.f32 %v8866_v10, %v8865_v2  ;;  %v3081_v62 = vrot.slane %v6954_v25, 2  ;;  %v8867_v13 = vld [vmem:[#allocation62_spill] sm:$0xff] }
 0x3e2   : > { %8864 = vst [vmem:[#allocation53_spill] sm:$0xff] %v7349_v47 }
 0x3e3   : > { %v2347_v9 = vadd.f32 %v2299_v19, %v2191_v63  ;;  %v2302_v14 = vpop.f32.mrf.mxu2  ;;  %4871 = vmatmul.msk.f32.gmra.mxu1 %vm2423_vm6, %v7344_v38  ;;  %v2035_v19 = vadd.f32 %v8867_v13, %v1882_v53  ;;  %v8871_v53 = vld [vmem:[#allocation31_spill] sm:$0xff]  ;;  %v3084_v13 = vrot.slane %v6992_v33, 2 }
 0x3e4   : > { %4819 = vmatmul.msk.f32.gmra.mxu3 %vm2423_vm6, %v7349_v47 }
 0x3e5   : > { %v2383_v4 = vadd.f32 %v6711_v30, %v2347_v9  ;;  %v2675_v30 = vrot.slane %v7337_v28, 1  ;;  %v7370_v9 = vsel %vm1131_vm4, %v3079_v42, %v3081_v62  ;;  %v7386_v42 = vld [vmem:[%s8431_s3] ss:$0 sm:$0xff] }
 0x3e6   : > { %v2989_v3 = vpop.f32.mrf.mxu0  ;;  %8868 = vst [vmem:[#allocation48_spill] sm:$0xff] %v7370_v9 }
 0x3e7   : > { %v2415_v48 = vmax.f32 %v2383_v4, 0.0  ;;  %v2803_v63 = vpop.f32.mrf.mxu3  ;;  %v1883_v4 = vadd.f32 %v6965_v43, %v8871_v53  ;;  %v3083_v53 = vrot.slane %v6970_v59, 2  ;;  %v8875_v59 = vld [vmem:[#allocation34_spill] sm:$0xff] }
 0x3e8   : > { %v7358_v49 = vadd.f32 %v2983_v20, %v2803_v63  ;;  %v2146_v38 = vpop.f32.mrf.mxu1  ;;  %4907 = vmatmul.msk.f32.gmra.mxu2 %vm2423_vm6, %v7024_v52  ;;  %v7362_v16 = vld [vmem:[#allocation3 + $0x128] sm:$0xff] }
 0x3e9   : > { %2504 = vst.msk [vmem:[#allocation3 + $0x139] sm:$0xff] %vm2423_vm6, %v2415_v48  ;;  %v2192_v34 = vadd.f32 %v2146_v38, %v2035_v19  ;;  %4854 = vmatmul.msk.f32.gmra.mxu0 %vm2423_vm6, %v7362_v16  ;;  %v2676_v25 = vrot.slane %v7362_v16, 1  ;;  %v7379_v38 = vld [vmem:[#allocation3 + $0x130] sm:$0x3]  ;;  %v8872_v19 = vld [vmem:[#allocation65_spill] sm:$0xff]  ;;  %v7403_v33 = vsel %vm1131_vm4, %v3083_v53, %v3084_v13 }
 0x3ea   : > { %8870 = vst [vmem:[#allocation57_spill] sm:$0xff] %v7379_v38  ;;  %v2036_v48 = vadd.f32 %v8872_v19, %v1883_v4 }
 0x3eb   : > { %v2348_v20 = vadd.f32 %v2302_v14, %v2192_v34  ;;  %v2305_v2 = vpop.f32.mrf.mxu2  ;;  %4872 = vmatmul.msk.f32.gmra.mxu1 %vm2423_vm6, %v7370_v9  ;;  %v7375_v10 = vsel %vm694_vm3, %v2675_v30, %v2676_v25  ;;  %v2678_v30 = vrot.slane %v7379_v38, 1  ;;  %8873 = vst [vmem:[#allocation52_spill] sm:$0xff] %v7403_v33 }
 0x3ec   : > { %8869 = vst [vmem:[#allocation12_spill] sm:$0xff] %v7375_v10  ;;  %4820 = vmatmul.msk.f32.gmra.mxu3 %vm2423_vm6, %v7375_v10 }
 0x3ed   : > { %v2384_v14 = vadd.f32 %v7386_v42, %v2348_v20 }
 0x3ee   : > { %v2992_v62 = vpop.f32.mrf.mxu0 }
 0x3ef   : > { %v2416_v63 = vmax.f32 %v2384_v14, 0.0  ;;  %v2806_v34 = vpop.f32.mrf.mxu3  ;;  %v7408_v14 = vsel %vm694_vm3, %v2676_v25, %v2678_v30 }
 0x3f0   : > { %v7392_v10 = vadd.f32 %v2986_v8, %v2806_v34  ;;  %v2149_v47 = vpop.f32.mrf.mxu1  ;;  %4908 = vmatmul.msk.f32.gmra.mxu2 %vm2423_vm6, %v7048_v11  ;;  %v7396_v43 = vld [vmem:[#allocation3 + $0x138] sm:$0xff]  ;;  %8874 = vst [vmem:[#allocation17_spill] sm:$0xff] %v7408_v14  ;;  %v8876_v34 = vld [vmem:[#allocation67_spill] sm:$0xff] }
 0x3f1   : > { %2505 = vst.msk [vmem:[#allocation3 + $0x141] sm:$0xff] %vm2423_vm6, %v2416_v63  ;;  %v2193_v20 = vadd.f32 %v2149_v47, %v2036_v48  ;;  %4855 = vmatmul.msk.f32.gmra.mxu0 %vm2423_vm6, %v7396_v43  ;;  %v1884_v47 = vadd.f32 %v6994_v57, %v8875_v59  ;;  %v3086_v63 = vrot.slane %v7013_v40, 2  ;;  %v2680_v40 = vrot.slane %v7396_v43, 1 }
 0x3f3   : > { %v2349_v4 = vadd.f32 %v2305_v2, %v2193_v20  ;;  %v2308_v8 = vpop.f32.mrf.mxu2  ;;  %4873 = vmatmul.msk.f32.gmra.mxu1 %vm2423_vm6, %v7403_v33  ;;  %v2037_v2 = vadd.f32 %v8876_v34, %v1884_v47 }
 0x3f4   : > { %4821 = vmatmul.msk.f32.gmra.mxu3 %vm2423_vm6, %v7408_v14 }
 0x3f5   : > { %v2385_v19 = vadd.f32 %v7386_v42, %v2349_v4  ;;  %v7429_v4 = vsel %vm1131_vm4, %v3084_v13, %v3086_v63 }
 0x3f6   : > { %v2995_v48 = vpop.f32.mrf.mxu0  ;;  %8877 = vst [vmem:[#allocation56_spill] sm:$0xff] %v7429_v4 }
 0x3f7   : > { %v2417_v53 = vmax.f32 %v2385_v19, 0.0  ;;  %v2809_v20 = vpop.f32.mrf.mxu3  ;;  %v8879_v19 = vld [vmem:[#allocation35_spill] sm:$0xff] }
 0x3f8   : > { %v7417_v38 = vadd.f32 %v2989_v3, %v2809_v20  ;;  %v2152_v33 = vpop.f32.mrf.mxu1  ;;  %4909 = vmatmul.msk.f32.gmra.mxu2 %vm2423_vm6, %v7078_v6  ;;  %v7421_v25 = vld [vmem:[#allocation3 + $0x140] sm:$0xff]  ;;  %v1885_v34 = vadd.f32 %v7029_v46, %v8879_v19  ;;  %v3088_v46 = vrot.slane %v7024_v52, 2 }
 0x3f9   : > { %2506 = vst.msk [vmem:[#allocation3 + $0x151] sm:$0xff] %vm2423_vm6, %v2417_v53  ;;  %v2194_v57 = vadd.f32 %v2152_v33, %v2037_v2  ;;  %4856 = vmatmul.msk.f32.gmra.mxu0 %vm2423_vm6, %v7421_v25  ;;  %v2681_v30 = vrot.slane %v7421_v25, 1  ;;  %v7438_v33 = vld [vmem:[#allocation3 + $0x148] sm:$0x3] }
 0x3fa   : > { %v2038_v63 = vadd.f32 %v6980_v31, %v1885_v34  ;;  %v4963_v31 = vld [vmem:[%s8432_s4 + $0x14] sm:$0xf] }
 0x3fb   : > { %v2350_v3 = vadd.f32 %v2308_v8, %v2194_v57  ;;  %v2311_v59 = vpop.f32.mrf.mxu2  ;;  %4874 = vmatmul.msk.f32.gmra.mxu1 %vm2423_vm6, %v7429_v4  ;;  %v7434_v47 = vsel %vm694_vm3, %v2680_v40, %v2681_v30  ;;  %v3089_v8 = vrot.slane %v7048_v11, 2  ;;  %v2683_v57 = vrot.slane %v7438_v33, 1  ;;  %4964 = vmatpush.msk.msra.mxu0 %vm2761_vm5, %v4963_v31 }
 0x3fc   : > { %8878 = vst [vmem:[#allocation15_spill] sm:$0xff] %v7434_v47  ;;  %4822 = vmatmul.msk.f32.gmra.mxu3 %vm2423_vm6, %v7434_v47 }
 0x3fd   : > { %v2386_v2 = vadd.f32 %v7386_v42, %v2350_v3  ;;  %v7460_v11 = vsel %vm1131_vm4, %v3088_v46, %v3089_v8  ;;  %v7466_v52 = vsel %vm694_vm3, %v2681_v30, %v2683_v57 }
 0x3fe   : > { %v2998_v13 = vpop.f32.mrf.mxu0  ;;  %8880 = vst [vmem:[#allocation58_spill] sm:$0xff] %v7460_v11 }
 0x3ff   : > { %v2418_v53 = vmax.f32 %v2386_v2, 0.0  ;;  %v2812_v20 = vpop.f32.mrf.mxu3  ;;  %8881 = vst [vmem:[#allocation20_spill] sm:$0xff] %v7466_v52 }
 0x400   : > { %v7446_v40 = vadd.f32 %v2992_v62, %v2812_v20  ;;  %v2155_v14 = vpop.f32.mrf.mxu1  ;;  %4910 = vmatmul.msk.f32.gmra.mxu2 %vm2423_vm6, %v7100_v7  ;;  %v7450_v47 = vld [vmem:[#allocation3 + $0x150] sm:$0xff] }
 0x401   : > { %2507 = vst.msk [vmem:[#allocation3 + $0x159] sm:$0xff] %vm2423_vm6, %v2418_v53  ;;  %v2195_v3 = vadd.f32 %v2155_v14, %v2038_v63  ;;  %4857 = vmatmul.msk.f32.gmra.mxu0 %vm2423_vm6, %v7450_v47  ;;  %v8882_v14 = vld [vmem:[#allocation38_spill] sm:$0xff]  ;;  %v3091_v53 = vrot.slane %v7065_v60, 2  ;;  %v2685_v60 = vrot.slane %v7450_v47, 1 }
 0x402   : > { %v1886_v34 = vadd.f32 %v7069_v36, %v8882_v14 }
 0x403   : > { %v2351_v62 = vadd.f32 %v2311_v59, %v2195_v3  ;;  %v2314_v19 = vpop.f32.mrf.mxu2  ;;  %4875 = vmatmul.msk.f32.gmra.mxu1 %vm2423_vm6, %v7460_v11  ;;  %v7490_v57 = vsel %vm1131_vm4, %v3089_v8, %v3091_v53  ;;  %v5065_v8 = vld [vmem:[%s8432_s4 + $0x20] sm:$0xf]  ;;  %v8886_v53 = vld [vmem:[#allocation39_spill] sm:$0xff] }
 0x404   : > { %4823 = vmatmul.msk.f32.gmra.mxu3 %vm2423_vm6, %v7466_v52  ;;  %v2039_v59 = vadd.f32 %v7018_v39, %v1886_v34  ;;  %8883 = vst [vmem:[#allocation24_spill] sm:$0xff] %v7490_v57 }
 0x405   : > { %v2387_v2 = vadd.f32 %v7386_v42, %v2351_v62  ;;  %5066 = vmatpush.msk.msra.mxu3 %vm2761_vm5, %v5065_v8 }
 0x406   : > { %v3001_v63 = vpop.f32.mrf.mxu0 }
 0x407   : > { %v2419_v20 = vmax.f32 %v2387_v2, 0.0  ;;  %v2815_v46 = vpop.f32.mrf.mxu3 }
 0x408   : > { %v7475_v3 = vadd.f32 %v2995_v48, %v2815_v46  ;;  %v2158_v31 = vpop.f32.mrf.mxu1  ;;  %4911 = vmatmul.msk.f32.gmra.mxu2 %vm2423_vm6, %v7127_v51  ;;  %v7479_v30 = vld [vmem:[#allocation3 + $0x158] sm:$0xff]  ;;  %v5031_v48 = vld [vmem:[%s8432_s4 + $0x1c] sm:$0xf]  ;;  %v7500_v2 = vld [vmem:[#allocation3 + $0x160] sm:$0x3]  ;;  %v3094_v46 = vrot.slane %v7100_v7, 2 }
 0x409   : > { %2508 = vst.msk [vmem:[#allocation3 + $0x169] sm:$0xff] %vm2423_vm6, %v2419_v20  ;;  %v2196_v36 = vadd.f32 %v2158_v31, %v2039_v59  ;;  %4858 = vmatmul.msk.f32.gmra.mxu0 %vm2423_vm6, %v7479_v30  ;;  %v2686_v39 = vrot.slane %v7479_v30, 1  ;;  %5032 = vmatpush.msk.msra.mxu2 %vm2761_vm5, %v5031_v48  ;;  %v1887_v59 = vadd.f32 %v7096_v15, %v8886_v53  ;;  %v4997_v31 = vld [vmem:[%s8432_s4 + $0x18] sm:$0xf]  ;;  %v2688_v52 = vrot.slane %v7500_v2, 1 }
 0x40a   : > { %8885 = vst [vmem:[#allocation29_spill] sm:$0xff] %v7500_v2  ;;  %4998 = vmatpush.msk.msra.mxu1 %vm2761_vm5, %v4997_v31  ;;  %v3093_v7 = vrot.slane %v7078_v6, 2  ;;  %v8890_v6 = vld [vmem:[#allocation42_spill] sm:$0xff] }
 0x40b   : > { %v2352_v62 = vadd.f32 %v2314_v19, %v2196_v36  ;;  %v2317_v14 = vpop.f32.mrf.mxu2  ;;  %4876 = vmatmul.msk.f32.gmra.mxu1 %vm2423_vm6, %v7490_v57  ;;  %v7496_v34 = vsel %vm694_vm3, %v2685_v60, %v2686_v39  ;;  %v8887_v36 = vld [vmem:[#allocation10_spill] sm:$0xff]  ;;  %v1888_v31 = vadd.f32 %v7129_v55, %v8890_v6 }
 0x40c   : > { %8884 = vst [vmem:[#allocation21_spill] sm:$0xff] %v7496_v34  ;;  %4824 = vmatmul.msk.f32.gmra.mxu3 %vm2423_vm6, %v7496_v34  ;;  %v2040_v60 = vadd.f32 %v8887_v36, %v1887_v59  ;;  %v7527_v59 = vsel %vm1131_vm4, %v3093_v7, %v3094_v46 }
 0x40d   : > { %v2388_v19 = vadd.f32 %v7386_v42, %v2352_v62  ;;  %8888 = vst [vmem:[#allocation27_spill] sm:$0xff] %v7527_v59 }
 0x40e   : > { %v3004_v20 = vpop.f32.mrf.mxu0 }
 0x40f   : > { %v2420_v48 = vmax.f32 %v2388_v19, 0.0  ;;  %v2818_v34 = vpop.f32.mrf.mxu3 }
 0x410   : > { %v7516_v15 = vadd.f32 %v2998_v13, %v2818_v34  ;;  %v2161_v62 = vpop.f32.mrf.mxu1  ;;  %4912 = vmatmul.msk.f32.gmra.mxu2 %vm2423_vm6, %v7147_v41  ;;  %v7520_v8 = vld [vmem:[#allocation3 + $0x168] sm:$0xff]  ;;  %v7532_v34 = vsel %vm694_vm3, %v2686_v39, %v2688_v52 }
 0x411   : > { %2509 = vst.msk [vmem:[#allocation3 + $0x171] sm:$0xff] %vm2423_vm6, %v2420_v48  ;;  %v2197_v53 = vadd.f32 %v2161_v62, %v2040_v60  ;;  %4859 = vmatmul.msk.f32.gmra.mxu0 %vm2423_vm6, %v7520_v8  ;;  %v3096_v48 = vrot.slane %v7118_v23, 2  ;;  %v2690_v23 = vrot.slane %v7520_v8, 1 }
 0x412   : > { %8889 = vst [vmem:[#allocation50_spill] sm:$0xff] %v7532_v34 }
 0x413   : > { %v2353_v19 = vadd.f32 %v2317_v14, %v2197_v53  ;;  %v2320_v13 = vpop.f32.mrf.mxu2  ;;  %4877 = vmatmul.msk.f32.gmra.mxu1 %vm2423_vm6, %v7527_v59  ;;  %v2041_v14 = vadd.f32 %v7083_v24, %v1888_v31  ;;  %v7553_v39 = vsel %vm1131_vm4, %v3094_v46, %v3096_v48  ;;  %v3099_v46 = vrot.slane %v7147_v41, 2 }
 0x414   : > { %4825 = vmatmul.msk.f32.gmra.mxu3 %vm2423_vm6, %v7532_v34  ;;  %8891 = vst [vmem:[#allocation4_spill] sm:$0xff] %v7553_v39 }
 0x415   : > { %v2389_v36 = vadd.f32 %v7386_v42, %v2353_v19 }
 0x416   : > { %v3007_v60 = vpop.f32.mrf.mxu0 }
 0x417   : > { %v2421_v62 = vmax.f32 %v2389_v36, 0.0  ;;  %v2821_v7 = vpop.f32.mrf.mxu3 }
 0x418   : > { %v7541_v53 = vadd.f32 %v3001_v63, %v2821_v7  ;;  %v2164_v2 = vpop.f32.mrf.mxu1  ;;  %4913 = vmatmul.msk.f32.gmra.mxu2 %vm2423_vm6, %v7176_v21  ;;  %v7545_v52 = vld [vmem:[#allocation3 + $0x170] sm:$0xff] }
 0x419   : > { %2510 = vst.msk [vmem:[#allocation3 + $0x181] sm:$0xff] %vm2423_vm6, %v2421_v62  ;;  %v2198_v55 = vadd.f32 %v2164_v2, %v2041_v14  ;;  %4860 = vmatmul.msk.f32.gmra.mxu0 %vm2423_vm6, %v7545_v52  ;;  %v2691_v24 = vrot.slane %v7545_v52, 1  ;;  %v7564_v2 = vld [vmem:[#allocation3 + $0x178] sm:$0x3] }
 0x41a   : > { %v2693_v14 = vrot.slane %v7564_v2, 1 }
 0x41b   : > { %v2354_v63 = vadd.f32 %v2320_v13, %v2198_v55  ;;  %4878 = vmatmul.msk.f32.gmra.mxu1 %vm2423_vm6, %v7553_v39  ;;  %v7557_v19 = vpop.f32.mrf.mxu2  ;;  %v7560_v6 = vsel %vm694_vm3, %v2690_v23, %v2691_v24  ;;  %v3098_v55 = vrot.slane %v7127_v51, 2  ;;  %v3101_v51 = vrot.slane %v7165_v61, 2 }
 0x41c   : > { %8892 = vst [vmem:[#allocation43_spill] sm:$0xff] %v7560_v6  ;;  %4826 = vmatmul.msk.f32.gmra.mxu3 %vm2423_vm6, %v7560_v6 }
 0x41d   : > { %v2390_v31 = vadd.f32 %v7386_v42, %v2354_v63  ;;  %v7580_v41 = vsel %vm1131_vm4, %v3098_v55, %v3099_v46  ;;  %v3104_v55 = vrot.slane %v7200_v1, 2 }
 0x41e   : > { %v3010_v36 = vpop.f32.mrf.mxu0  ;;  %8893 = vst [vmem:[#allocation25_spill] sm:$0xff] %v7580_v41 }
 0x41f   : > { %v2422_v48 = vmax.f32 %v2390_v31, 0.0  ;;  %v2824_v13 = vpop.f32.mrf.mxu3 }
 0x420   : > { %v7569_v62 = vadd.f32 %v3004_v20, %v2824_v13  ;;  %v7571_v7 = vpop.f32.mrf.mxu1  ;;  %4914 = vmatmul.msk.f32.gmra.mxu2 %vm2423_vm6, %v7200_v1  ;;  %v7585_v20 = vsel %vm694_vm3, %v2691_v24, %v2693_v14  ;;  %v7598_v24 = vsel %vm1131_vm4, %v3099_v46, %v3101_v51  ;;  %v8898_v51 = vld [vmem:[#allocation54_spill] sm:$0xff] }
 0x421   : > { %2511 = vst.msk [vmem:[#allocation3 + $0x189] sm:$0xff] %vm2423_vm6, %v2422_v48  ;;  %4965 = vmatmul.msk.f32.vlgmr.msra.gmra.mxu0 %vm2423_vm6, %v7182_v58 }
 0x422   : > { %8894 = vst [vmem:[#allocation55_spill] sm:$0xff] %v7585_v20 }
 0x423   : > { %4879 = vmatmul.msk.f32.gmra.mxu1 %vm2423_vm6, %v7580_v41  ;;  %v3383_v42 = vpop.f32.mrf.mxu2  ;;  %8895 = vst [vmem:[#allocation46_spill] sm:$0xff] %v7598_v24 }
 0x424   : > { %4827 = vmatmul.msk.f32.gmra.mxu3 %vm2423_vm6, %v7585_v20  ;;  %v8905_v20 = vld [vmem:[#allocation44_spill] sm:$0xff] }
 0x426   : > { %v3013_v23 = vpop.f32.mrf.mxu0 }
 0x427   : > { %v2827_v63 = vpop.f32.mrf.mxu3 }
 0x428   : > { %v7590_v31 = vadd.f32 %v3007_v60, %v2827_v63  ;;  %v3227_v58 = vpop.f32.mrf.mxu1  ;;  %4915 = vmatmul.msk.f32.gmra.mxu2 %vm2423_vm6, %v7229_v56  ;;  %v8896_v60 = vld [vmem:[#allocation47_spill] sm:$0xff] }
 0x429   : > { %v3321_v48 = vadd.f32 %v3227_v58, %v7191_v32  ;;  %4966 = vmatmul.msk.f32.gmra.mxu0 %vm2423_vm6, %v7208_v18  ;;  %v3103_v18 = vrot.slane %v7176_v21, 2  ;;  %v3106_v21 = vrot.slane %v7217_v54, 2 }
 0x42b   : > { %4880 = vmatmul.msk.f32.gmra.mxu1 %vm2423_vm6, %v7598_v24  ;;  %v3386_v13 = vpop.f32.mrf.mxu2  ;;  %v7602_v61 = vadd.f32 %v3383_v42, %v3321_v48  ;;  %v7616_v42 = vsel %vm1131_vm4, %v3103_v18, %v3104_v55 }
 0x42c   : > { %4931 = vmatmul.msk.f32.vlgmr.msrb.gmra.mxu3 %vm2423_vm6, %v8896_v60  ;;  %8897 = vst [vmem:[#allocation26_spill] sm:$0xff] %v7616_v42 }
 0x42e   : > { %v3016_v14 = vpop.f32.mrf.mxu0 }
 0x42f   : > { %v2830_v63 = vpop.f32.mrf.mxu3 }
 0x430   : > { %v7607_v32 = vadd.f32 %v3010_v36, %v2830_v63  ;;  %v3230_v58 = vpop.f32.mrf.mxu1  ;;  %4916 = vmatmul.msk.f32.gmra.mxu2 %vm2423_vm6, %v7254_v44 }
 0x431   : > { %v3322_v46 = vadd.f32 %v3230_v58, %v7225_v37  ;;  %4967 = vmatmul.msk.f32.gmra.mxu0 %vm2423_vm6, %v7236_v22 }
 0x433   : > { %4881 = vmatmul.msk.f32.gmra.mxu1 %vm2423_vm6, %v7616_v42  ;;  %v3389_v1 = vpop.f32.mrf.mxu2  ;;  %v7620_v36 = vadd.f32 %v3386_v13, %v3322_v46  ;;  %v7633_v13 = vsel %vm1131_vm4, %v3104_v55, %v3106_v21  ;;  %v3108_v55 = vrot.slane %v7229_v56, 2  ;;  %v3111_v56 = vrot.slane %v7271_v5, 2 }
 0x434   : > { %4932 = vmatmul.msk.f32.gmra.mxu3 %vm2423_vm6, %v8898_v51  ;;  %v3109_v51 = vrot.slane %v7254_v44, 2 }
 0x436   : > { %v3019_v48 = vpop.f32.mrf.mxu0 }
 0x437   : > { %v2833_v60 = vpop.f32.mrf.mxu3 }
 0x438   : > { %v7625_v37 = vadd.f32 %v3013_v23, %v2833_v60  ;;  %v3233_v63 = vpop.f32.mrf.mxu1  ;;  %4917 = vmatmul.msk.f32.gmra.mxu2 %vm2423_vm6, %v7283_v17  ;;  %v8899_v23 = vld [vmem:[#allocation22_spill] sm:$0xff] }
 0x439   : > { %v3323_v58 = vadd.f32 %v3233_v63, %v7250_v0  ;;  %4968 = vmatmul.msk.f32.gmra.mxu0 %vm2423_vm6, %v7262_v29 }
 0x43b   : > { %4882 = vmatmul.msk.f32.gmra.mxu1 %vm2423_vm6, %v7633_v13  ;;  %v3392_v18 = vpop.f32.mrf.mxu2  ;;  %v7637_v54 = vadd.f32 %v3389_v1, %v3323_v58  ;;  %v7651_v1 = vsel %vm1131_vm4, %v3108_v55, %v3109_v51  ;;  %v8900_v58 = vld [vmem:[#allocation61_spill] sm:$0xff] }
 0x43c   : > { %4933 = vmatmul.msk.f32.gmra.mxu3 %vm2423_vm6, %v8899_v23 }
 0x43e   : > { %v3022_v46 = vpop.f32.mrf.mxu0 }
 0x43f   : > { %v2836_v60 = vpop.f32.mrf.mxu3 }
 0x440   : > { %v7642_v0 = vadd.f32 %v3016_v14, %v2836_v60  ;;  %v3236_v63 = vpop.f32.mrf.mxu1  ;;  %4918 = vmatmul.msk.f32.gmra.mxu2 %vm2423_vm6, %v7308_v45 }
 0x441   : > { %v3324_v21 = vadd.f32 %v3236_v63, %v7279_v35  ;;  %4969 = vmatmul.msk.f32.gmra.mxu0 %vm2423_vm6, %v7290_v27  ;;  %v3114_v27 = vrot.slane %v7308_v45, 2 }
 0x443   : > { %4883 = vmatmul.msk.f32.gmra.mxu1 %vm2423_vm6, %v7651_v1  ;;  %v3395_v44 = vpop.f32.mrf.mxu2  ;;  %v7655_v14 = vadd.f32 %v3392_v18, %v3324_v21  ;;  %v7668_v18 = vsel %vm1131_vm4, %v3109_v51, %v3111_v56  ;;  %v3113_v51 = vrot.slane %v7283_v17, 2  ;;  %v3116_v17 = vrot.slane %v8905_v20, 2 }
 0x444   : > { %4934 = vmatmul.msk.f32.gmra.mxu3 %vm2423_vm6, %v8900_v58 }
 0x446   : > { %v3025_v60 = vpop.f32.mrf.mxu0 }
 0x447   : > { %v2839_v29 = vpop.f32.mrf.mxu3 }
 0x448   : > { %v7660_v35 = vadd.f32 %v3019_v48, %v2839_v29  ;;  %v3239_v63 = vpop.f32.mrf.mxu1  ;;  %4919 = vmatmul.msk.f32.gmra.mxu2 %vm2423_vm6, %v7337_v28  ;;  %v8901_v29 = vld [vmem:[#allocation64_spill] sm:$0xff] }
 0x449   : > { %v3325_v55 = vadd.f32 %v3239_v63, %v7304_v26  ;;  %4970 = vmatmul.msk.f32.gmra.mxu0 %vm2423_vm6, %v7316_v50  ;;  %v8902_v50 = vld [vmem:[#allocation14_spill] sm:$0xff] }
 0x44b   : > { %4884 = vmatmul.msk.f32.gmra.mxu1 %vm2423_vm6, %v7668_v18  ;;  %v3398_v21 = vpop.f32.mrf.mxu2  ;;  %v7672_v5 = vadd.f32 %v3395_v44, %v3325_v55  ;;  %v7686_v44 = vsel %vm1131_vm4, %v3113_v51, %v3114_v27 }
 0x44c   : > { %4935 = vmatmul.msk.f32.gmra.mxu3 %vm2423_vm6, %v8901_v29 }
 0x44e   : > { %v3028_v48 = vpop.f32.mrf.mxu0 }
 0x44f   : > { %v2842_v22 = vpop.f32.mrf.mxu3 }
 0x450   : > { %v7677_v26 = vadd.f32 %v3022_v46, %v2842_v22  ;;  %v3242_v63 = vpop.f32.mrf.mxu1  ;;  %4920 = vmatmul.msk.f32.gmra.mxu2 %vm2423_vm6, %v7362_v16  ;;  %v8904_v46 = vld [vmem:[#allocation66_spill] sm:$0xff] }
 0x451   : > { %v3326_v56 = vadd.f32 %v3242_v63, %v7333_v12  ;;  %4971 = vmatmul.msk.f32.gmra.mxu0 %vm2423_vm6, %v8902_v50  ;;  %v3119_v50 = vrot.slane %v7362_v16, 2 }
 0x453   : > { %4885 = vmatmul.msk.f32.gmra.mxu1 %vm2423_vm6, %v7686_v44  ;;  %v3401_v45 = vpop.f32.mrf.mxu2  ;;  %v7690_v22 = vadd.f32 %v3398_v21, %v3326_v56  ;;  %v7703_v21 = vsel %vm1131_vm4, %v3114_v27, %v3116_v17  ;;  %v3118_v27 = vrot.slane %v7337_v28, 2 }
 0x454   : > { %4936 = vmatmul.msk.f32.gmra.mxu3 %vm2423_vm6, %v8904_v46 }
 0x455   : > { %8903 = vst [vmem:[#allocation60_spill] sm:$0xff] %v7690_v22 }
 0x456   : > { %v3031_v55 = vpop.f32.mrf.mxu0 }
 0x457   : > { %v2845_v6 = vpop.f32.mrf.mxu3 }
 0x458   : > { %v7695_v12 = vadd.f32 %v3025_v60, %v2845_v6  ;;  %v3245_v63 = vpop.f32.mrf.mxu1  ;;  %4921 = vmatmul.msk.f32.gmra.mxu2 %vm2423_vm6, %v7396_v43  ;;  %v8907_v6 = vld [vmem:[#allocation5_spill] sm:$0xff] }
 0x459   : > { %v3327_v51 = vadd.f32 %v3245_v63, %v7358_v49  ;;  %4972 = vmatmul.msk.f32.gmra.mxu0 %vm2423_vm6, %v7370_v9  ;;  %v8908_v9 = vld [vmem:[#allocation52_spill] sm:$0xff] }
 0x45b   : > { %4886 = vmatmul.msk.f32.gmra.mxu1 %vm2423_vm6, %v7703_v21  ;;  %v3404_v56 = vpop.f32.mrf.mxu2  ;;  %v7707_v20 = vadd.f32 %v3401_v45, %v3327_v51  ;;  %v7721_v45 = vsel %vm1131_vm4, %v3118_v27, %v3119_v50 }
 0x45c   : > { %4937 = vmatmul.msk.f32.gmra.mxu3 %vm2423_vm6, %v8907_v6 }
 0x45d   : > { %8906 = vst [vmem:[#allocation51_spill] sm:$0xff] %v7707_v20  ;;  %v8911_v20 = vld [vmem:[#allocation57_spill] sm:$0xff] }
 0x45e   : > { %v3034_v60 = vpop.f32.mrf.mxu0  ;;  %v3121_v28 = vrot.slane %v8911_v20, 2 }
 0x45f   : > { %v2848_v34 = vpop.f32.mrf.mxu3 }
 0x460   : > { %v7712_v49 = vadd.f32 %v3028_v48, %v2848_v34  ;;  %v3248_v63 = vpop.f32.mrf.mxu1  ;;  %4922 = vmatmul.msk.f32.gmra.mxu2 %vm2423_vm6, %v7421_v25  ;;  %v8910_v48 = vld [vmem:[#allocation68_spill] sm:$0xff] }
 0x461   : > { %v3328_v17 = vadd.f32 %v3248_v63, %v7392_v10  ;;  %4973 = vmatmul.msk.f32.gmra.mxu0 %vm2423_vm6, %v8908_v9  ;;  %v3124_v9 = vrot.slane %v7421_v25, 2 }
 0x463   : > { %4887 = vmatmul.msk.f32.gmra.mxu1 %vm2423_vm6, %v7721_v45  ;;  %v3407_v16 = vpop.f32.mrf.mxu2  ;;  %v7725_v34 = vadd.f32 %v3404_v56, %v3328_v17  ;;  %v7738_v56 = vsel %vm1131_vm4, %v3119_v50, %v3121_v28  ;;  %v3123_v50 = vrot.slane %v7396_v43, 2  ;;  %v3126_v43 = vrot.slane %v7438_v33, 2 }
 0x464   : > { %4938 = vmatmul.msk.f32.gmra.mxu3 %vm2423_vm6, %v8910_v48 }
 0x465   : > { %8909 = vst [vmem:[#allocation33_spill] sm:$0xff] %v7725_v34 }
 0x466   : > { %v3037_v51 = vpop.f32.mrf.mxu0 }
 0x467   : > { %v2851_v22 = vpop.f32.mrf.mxu3 }
 0x468   : > { %v7730_v10 = vadd.f32 %v3031_v55, %v2851_v22  ;;  %v3251_v63 = vpop.f32.mrf.mxu1  ;;  %4923 = vmatmul.msk.f32.gmra.mxu2 %vm2423_vm6, %v7450_v47  ;;  %v8912_v22 = vld [vmem:[#allocation7_spill] sm:$0xff] }
 0x469   : > { %v3329_v27 = vadd.f32 %v3251_v63, %v7417_v38  ;;  %4974 = vmatmul.msk.f32.gmra.mxu0 %vm2423_vm6, %v7429_v4 }
 0x46b   : > { %4888 = vmatmul.msk.f32.gmra.mxu1 %vm2423_vm6, %v7738_v56  ;;  %v3410_v17 = vpop.f32.mrf.mxu2  ;;  %v7742_v20 = vadd.f32 %v3407_v16, %v3329_v27  ;;  %v7756_v16 = vsel %vm1131_vm4, %v3123_v50, %v3124_v9 }
 0x46c   : > { %4939 = vmatmul.msk.f32.gmra.mxu3 %vm2423_vm6, %v8912_v22 }
 0x46e   : > { %v3040_v55 = vpop.f32.mrf.mxu0 }
 0x46f   : > { %v2854_v34 = vpop.f32.mrf.mxu3 }
 0x470   : > { %v7747_v38 = vadd.f32 %v3034_v60, %v2854_v34  ;;  %v3254_v63 = vpop.f32.mrf.mxu1  ;;  %4924 = vmatmul.msk.f32.gmra.mxu2 %vm2423_vm6, %v7479_v30  ;;  %v8914_v34 = vld [vmem:[#allocation69_spill] sm:$0xff] }
 0x471   : > { %v3330_v28 = vadd.f32 %v3254_v63, %v7446_v40  ;;  %4975 = vmatmul.msk.f32.gmra.mxu0 %vm2423_vm6, %v7460_v11  ;;  %v3129_v11 = vrot.slane %v7479_v30, 2 }
 0x473   : > { %4889 = vmatmul.msk.f32.gmra.mxu1 %vm2423_vm6, %v7756_v16  ;;  %v3413_v25 = vpop.f32.mrf.mxu2  ;;  %v7760_v60 = vadd.f32 %v3410_v17, %v3330_v28  ;;  %v7773_v17 = vsel %vm1131_vm4, %v3124_v9, %v3126_v43  ;;  %v3128_v9 = vrot.slane %v7450_v47, 2 }
 0x474   : > { %4940 = vmatmul.msk.f32.gmra.mxu3 %vm2423_vm6, %v8914_v34 }
 0x475   : > { %8913 = vst [vmem:[#allocation63_spill] sm:$0xff] %v7760_v60 }
 0x476   : > { %v3043_v27 = vpop.f32.mrf.mxu0 }
 0x477   : > { %v2857_v4 = vpop.f32.mrf.mxu3 }
 0x478   : > { %v7765_v40 = vadd.f32 %v3037_v51, %v2857_v4  ;;  %v3257_v63 = vpop.f32.mrf.mxu1  ;;  %4925 = vmatmul.msk.f32.gmra.mxu2 %vm2423_vm6, %v7520_v8  ;;  %v8916_v4 = vld [vmem:[#allocation70_spill] sm:$0xff] }
 0x479   : > { %v3331_v50 = vadd.f32 %v3257_v63, %v7475_v3  ;;  %4976 = vmatmul.msk.f32.gmra.mxu0 %vm2423_vm6, %v7490_v57  ;;  %v8919_v57 = vld [vmem:[#allocation29_spill] sm:$0xff] }
 0x47a   : > { %v3131_v47 = vrot.slane %v8919_v57, 2 }
 0x47b   : > { %4890 = vmatmul.msk.f32.gmra.mxu1 %vm2423_vm6, %v7773_v17  ;;  %v3416_v28 = vpop.f32.mrf.mxu2  ;;  %v7777_v33 = vadd.f32 %v3413_v25, %v3331_v50  ;;  %v7791_v25 = vsel %vm1131_vm4, %v3128_v9, %v3129_v11 }
 0x47c   : > { %4941 = vmatmul.msk.f32.gmra.mxu3 %vm2423_vm6, %v8916_v4 }
 0x47d   : > { %8915 = vst [vmem:[#allocation59_spill] sm:$0xff] %v7777_v33 }
 0x47e   : > { %v3046_v51 = vpop.f32.mrf.mxu0 }
 0x47f   : > { %v2860_v60 = vpop.f32.mrf.mxu3 }
 0x480   : > { %v7782_v3 = vadd.f32 %v3040_v55, %v2860_v60  ;;  %v3260_v63 = vpop.f32.mrf.mxu1  ;;  %4926 = vmatmul.msk.f32.gmra.mxu2 %vm2423_vm6, %v7545_v52  ;;  %v8918_v60 = vld [vmem:[#allocation13_spill] sm:$0xff] }
 0x481   : > { %v3332_v43 = vadd.f32 %v3260_v63, %v7516_v15  ;;  %4977 = vmatmul.msk.f32.gmra.mxu0 %vm2423_vm6, %v7527_v59  ;;  %v7800_v15 = vld [vmem:[#allocation3 + $0x180] sm:$0xff] }
 0x482   : > { %8920 = vst [vmem:[#allocation8_spill] sm:$0xff] %v7800_v15 }
 0x483   : > { %4891 = vmatmul.msk.f32.gmra.mxu1 %vm2423_vm6, %v7791_v25  ;;  %v3419_v30 = vpop.f32.mrf.mxu2  ;;  %v7795_v55 = vadd.f32 %v3416_v28, %v3332_v43  ;;  %v7810_v28 = vsel %vm1131_vm4, %v3129_v11, %v3131_v47  ;;  %v3133_v11 = vrot.slane %v7520_v8, 2 }
 0x484   : > { %4942 = vmatmul.msk.f32.gmra.mxu3 %vm2423_vm6, %v8918_v60  ;;  %8921 = vst [vmem:[#allocation62_spill] sm:$0xff] %v7810_v28 }
 0x485   : > { %8917 = vst [vmem:[#allocation30_spill] sm:$0xff] %v7795_v55 }
 0x486   : > { %v3049_v50 = vpop.f32.mrf.mxu0 }
 0x487   : > { %v2863_v33 = vpop.f32.mrf.mxu3 }
 0x488   : > { %v7802_v63 = vadd.f32 %v3043_v27, %v2863_v33  ;;  %v3263_v59 = vpop.f32.mrf.mxu1  ;;  %4927 = vmatmul.msk.f32.gmra.mxu2 %vm2423_vm6, %v7800_v15  ;;  %v8923_v27 = vld [vmem:[#allocation23_spill] sm:$0xff]  ;;  %v3134_v33 = vrot.slane %v7545_v52, 2 }
 0x489   : > { %v3333_v9 = vadd.f32 %v3263_v59, %v7541_v53  ;;  %4978 = vmatmul.msk.f32.gmra.mxu0 %vm2423_vm6, %v7553_v39  ;;  %v7819_v59 = vld [vmem:[#allocation3 + $0x188] sm:$0xff] }
 0x48a   : > { %v7830_v47 = vsel %vm1131_vm4, %v3133_v11, %v3134_v33 }
 0x48b   : > { %4892 = vmatmul.msk.f32.gmra.mxu1 %vm2423_vm6, %v7810_v28  ;;  %v3422_v57 = vpop.f32.mrf.mxu2  ;;  %v7814_v43 = vadd.f32 %v3419_v30, %v3333_v9  ;;  %8924 = vst [vmem:[#allocation65_spill] sm:$0xff] %v7830_v47  ;;  %v3136_v9 = vrot.slane %v7564_v2, 2 }
 0x48c   : > { %4943 = vmatmul.msk.f32.gmra.mxu3 %vm2423_vm6, %v8923_v27 }
 0x48d   : > { %8922 = vst [vmem:[#allocation31_spill] sm:$0xff] %v7814_v43 }
 0x48e   : > { %v3052_v55 = vpop.f32.mrf.mxu0 }
 0x48f   : > { %v2866_v15 = vpop.f32.mrf.mxu3 }
 0x490   : > { %v7821_v53 = vadd.f32 %v3046_v51, %v2866_v15  ;;  %v3266_v39 = vpop.f32.mrf.mxu1  ;;  %4928 = vmatmul.msk.f32.gmra.mxu2 %vm2423_vm6, %v7819_v59  ;;  %v8925_v15 = vld [vmem:[#allocation28_spill] sm:$0xff] }
 0x491   : > { %v3334_v30 = vadd.f32 %v3266_v39, %v7569_v62  ;;  %4979 = vmatmul.msk.f32.gmra.mxu0 %vm2423_vm6, %v7580_v41 }
 0x493   : > { %4893 = vmatmul.msk.f32.gmra.mxu1 %vm2423_vm6, %v7830_v47  ;;  %v3425_v52 = vpop.f32.mrf.mxu2  ;;  %v7834_v51 = vadd.f32 %v3422_v57, %v3334_v30  ;;  %v7847_v57 = vsel %vm1131_vm4, %v3134_v33, %v3136_v9 }
 0x494   : > { %4944 = vmatmul.msk.f32.gmra.mxu3 %vm2423_vm6, %v8925_v15  ;;  %8926 = vst [vmem:[#allocation34_spill] sm:$0xff] %v7847_v57 }
 0x496   : > { %v3055_v62 = vpop.f32.mrf.mxu0 }
 0x497   : > { %v2869_v8 = vpop.f32.mrf.mxu3 }
 0x498   : > { %v7839_v43 = vadd.f32 %v3049_v50, %v2869_v8  ;;  %v3269_v39 = vpop.f32.mrf.mxu1  ;;  %5033 = vmatmul.msk.f32.vlgmr.msra.gmra.mxu2 %vm2423_vm6, %v8899_v23  ;;  %v8928_v50 = vld [vmem:[#allocation18_spill] sm:$0xff] }
 0x499   : > { %v3335_v11 = vadd.f32 %v3269_v39, %v7590_v31  ;;  %4980 = vmatmul.msk.f32.gmra.mxu0 %vm2423_vm6, %v7598_v24  ;;  %v5118_v39 = vld [vmem:[#allocation3 + $0x30] sm:$0xff]  ;;  %v8931_v24 = vld [vmem:[#allocation19_spill] sm:$0xff] }
 0x49b   : > { %4894 = vmatmul.msk.f32.gmra.mxu1 %vm2423_vm6, %v7847_v57  ;;  %v3428_v2 = vpop.f32.mrf.mxu2  ;;  %v7851_v30 = vadd.f32 %v3425_v52, %v3335_v11  ;;  %v8929_v11 = vld [vmem:[#allocation37_spill] sm:$0xff] }
 0x49c   : > { %4945 = vmatmul.msk.f32.gmra.mxu3 %vm2423_vm6, %v8928_v50 }
 0x49d   : > { %8927 = vst [vmem:[#allocation67_spill] sm:$0xff] %v7851_v30 }
 0x49e   : > { %v3699_v33 = vpop.f32.mrf.mxu0 }
 0x49f   : > { %v2872_v8 = vpop.f32.mrf.mxu3 }
 0x4a0   : > { %v7855_v23 = vadd.f32 %v3052_v55, %v2872_v8  ;;  %v3272_v41 = vpop.f32.mrf.mxu1  ;;  %5034 = vmatmul.msk.f32.gmra.mxu2 %vm2423_vm6, %v8900_v58  ;;  %v8930_v8 = vld [vmem:[#allocation6_spill] sm:$0xff] }
 0x4a1   : > { %v3336_v31 = vadd.f32 %v3272_v41, %v7607_v32  ;;  %4981 = vmatmul.msk.f32.gmra.mxu0 %vm2423_vm6, %v7616_v42  ;;  %v2963_v30 = vadd.f32 %v8931_v24, %v8930_v8  ;;  %v8932_v24 = vld [vmem:[#allocation32_spill] sm:$0xff] }
 0x4a3   : > { %v3431_v9 = vpop.f32.mrf.mxu2  ;;  %4999 = vmatmul.msk.f32.vlgmr.msra.gmra.mxu1 %vm2423_vm6, %v5118_v39  ;;  %v7863_v52 = vadd.f32 %v3428_v2, %v3336_v31  ;;  %v3320_v2 = vadd.f32 %v7571_v7, %v2963_v30  ;;  %v5119_v39 = vld [vmem:[#allocation3 + $0x38] sm:$0xff] }
 0x4a4   : > { %4946 = vmatmul.msk.f32.gmra.mxu3 %vm2423_vm6, %v8929_v11 }
 0x4a7   : > { %v2875_v55 = vpop.f32.mrf.mxu3 }
 0x4a8   : > { %v7869_v58 = vadd.f32 %v3055_v62, %v2875_v55  ;;  %v3275_v41 = vpop.f32.mrf.mxu1  ;;  %5035 = vmatmul.msk.f32.gmra.mxu2 %vm2423_vm6, %v8901_v29  ;;  %v3702_v62 = vpop.f32.mrf.mxu0  ;;  %v3476_v55 = vadd.f32 %v7557_v19, %v3320_v2  ;;  %v8933_v19 = vld [vmem:[#allocation41_spill] sm:$0xff] }
 0x4a9   : > { %v3337_v32 = vadd.f32 %v3275_v41, %v7625_v37  ;;  %4982 = vmatmul.msk.f32.gmra.mxu0 %vm2423_vm6, %v7633_v13  ;;  %v5120_v41 = vld [vmem:[#allocation3 + $0x48] sm:$0xff] }
 0x4ab   : > { %v3434_v31 = vpop.f32.mrf.mxu2  ;;  %5000 = vmatmul.msk.f32.gmra.mxu1 %vm2423_vm6, %v5119_v39  ;;  %v7878_v42 = vadd.f32 %v3431_v9, %v3337_v32 }
 0x4ac   : > { %4947 = vmatmul.msk.f32.gmra.mxu3 %vm2423_vm6, %v8932_v24 }
 0x4af   : > { %v3540_v29 = vpop.f32.mrf.mxu3 }
 0x4b0   : > { %v3636_v8 = vadd.f32 %v3540_v29, %v3476_v55  ;;  %v3278_v37 = vpop.f32.mrf.mxu1  ;;  %5036 = vmatmul.msk.f32.gmra.mxu2 %vm2423_vm6, %v8904_v46  ;;  %v3705_v2 = vpop.f32.mrf.mxu0  ;;  %v5121_v29 = vld [vmem:[#allocation3 + $0x50] sm:$0xff] }
 0x4b1   : > { %v3338_v7 = vadd.f32 %v3278_v37, %v7642_v0  ;;  %4983 = vmatmul.msk.f32.gmra.mxu0 %vm2423_vm6, %v7651_v1  ;;  %v8934_v37 = vld [vmem:[#allocation16_spill] sm:$0xff] }
 0x4b2   : > { %v7888_v30 = vadd.f32 %v3699_v33, %v3636_v8 }
 0x4b3   : > { %v3437_v9 = vpop.f32.mrf.mxu2  ;;  %5001 = vmatmul.msk.f32.gmra.mxu1 %vm2423_vm6, %v5120_v41  ;;  %v7891_v32 = vadd.f32 %v3434_v31, %v3338_v7 }
 0x4b4   : > { %4948 = vmatmul.msk.f32.gmra.mxu3 %vm2423_vm6, %v8933_v19 }
 0x4b7   : > { %v3543_v39 = vpop.f32.mrf.mxu3 }
 0x4b8   : > { %v3637_v46 = vadd.f32 %v3543_v39, %v7602_v61  ;;  %v3281_v55 = vpop.f32.mrf.mxu1  ;;  %5037 = vmatmul.msk.f32.gmra.mxu2 %vm2423_vm6, %v8907_v6  ;;  %v5122_v39 = vld [vmem:[#allocation3 + $0x60] sm:$0xff] }
 0x4b9   : > { %v3339_v0 = vadd.f32 %v3281_v55, %v7660_v35  ;;  %4984 = vmatmul.msk.f32.gmra.mxu0 %vm2423_vm6, %v7668_v18  ;;  %v3708_v35 = vpop.f32.mrf.mxu0  ;;  %v8935_v55 = vld [vmem:[#allocation40_spill] sm:$0xff] }
 0x4ba   : > { %v7901_v33 = vadd.f32 %v3702_v62, %v3637_v46 }
 0x4bb   : > { %v3440_v31 = vpop.f32.mrf.mxu2  ;;  %5002 = vmatmul.msk.f32.gmra.mxu1 %vm2423_vm6, %v5121_v29  ;;  %v7904_v8 = vadd.f32 %v3437_v9, %v3339_v0 }
 0x4bc   : > { %4949 = vmatmul.msk.f32.gmra.mxu3 %vm2423_vm6, %v8934_v37 }
 0x4bf   : > { %v3546_v61 = vpop.f32.mrf.mxu3 }
 0x4c0   : > { %v3638_v7 = vadd.f32 %v3546_v61, %v7620_v36  ;;  %v3284_v6 = vpop.f32.mrf.mxu1  ;;  %5038 = vmatmul.msk.f32.gmra.mxu2 %vm2423_vm6, %v8910_v48  ;;  %v5123_v61 = vld [vmem:[#allocation3 + $0x68] sm:$0xff] }
 0x4c1   : > { %v3340_v62 = vadd.f32 %v3284_v6, %v7677_v26  ;;  %4985 = vmatmul.msk.f32.gmra.mxu0 %vm2423_vm6, %v7686_v44  ;;  %v3711_v29 = vpop.f32.mrf.mxu0  ;;  %v8936_v6 = vld [vmem:[#allocation49_spill] sm:$0xff] }
 0x4c2   : > { %v7914_v41 = vadd.f32 %v3705_v2, %v3638_v7 }
 0x4c3   : > { %v3443_v9 = vpop.f32.mrf.mxu2  ;;  %5003 = vmatmul.msk.f32.gmra.mxu1 %vm2423_vm6, %v5122_v39  ;;  %v7917_v46 = vadd.f32 %v3440_v31, %v3340_v62 }
 0x4c4   : > { %4950 = vmatmul.msk.f32.gmra.mxu3 %vm2423_vm6, %v8935_v55 }
 0x4c7   : > { %v3549_v36 = vpop.f32.mrf.mxu3 }
 0x4c8   : > { %v3639_v48 = vadd.f32 %v3549_v36, %v7637_v54  ;;  %v3287_v0 = vpop.f32.mrf.mxu1  ;;  %5039 = vmatmul.msk.f32.gmra.mxu2 %vm2423_vm6, %v8912_v22 }
 0x4c9   : > { %v3341_v26 = vadd.f32 %v3287_v0, %v7695_v12  ;;  %4986 = vmatmul.msk.f32.gmra.mxu0 %vm2423_vm6, %v7703_v21 }
 0x4ca   : > { %v7927_v2 = vadd.f32 %v3708_v35, %v3639_v48  ;;  %v8937_v48 = vld [vmem:[#allocation53_spill] sm:$0xff] }
 0x4cb   : > { %v3446_v31 = vpop.f32.mrf.mxu2  ;;  %5004 = vmatmul.msk.f32.gmra.mxu1 %vm2423_vm6, %v5123_v61  ;;  %v7930_v7 = vadd.f32 %v3443_v9, %v3341_v26  ;;  %v5124_v9 = vld [vmem:[#allocation3 + $0x78] sm:$0xff]  ;;  %v5125_v61 = vld [vmem:[#allocation3 + $0x80] sm:$0xff] }
 0x4cc   : > { %4951 = vmatmul.msk.f32.gmra.mxu3 %vm2423_vm6, %v8936_v6 }
 0x4cf   : > { %v3552_v54 = vpop.f32.mrf.mxu3 }
 0x4d0   : > { %v3640_v22 = vadd.f32 %v3552_v54, %v7655_v14  ;;  %v3290_v62 = vpop.f32.mrf.mxu1  ;;  %5040 = vmatmul.msk.f32.gmra.mxu2 %vm2423_vm6, %v8914_v34  ;;  %v3714_v14 = vpop.f32.mrf.mxu0 }
 0x4d1   : > { %v3342_v12 = vadd.f32 %v3290_v62, %v7712_v49  ;;  %4987 = vmatmul.msk.f32.gmra.mxu0 %vm2423_vm6, %v7721_v45 }
 0x4d2   : > { %v7940_v35 = vadd.f32 %v3711_v29, %v3640_v22  ;;  %v8938_v22 = vld [vmem:[#allocation12_spill] sm:$0xff] }
 0x4d3   : > { %v3449_v39 = vpop.f32.mrf.mxu2  ;;  %5005 = vmatmul.msk.f32.gmra.mxu1 %vm2423_vm6, %v5124_v9  ;;  %v7943_v36 = vadd.f32 %v3446_v31, %v3342_v12  ;;  %v8939_v12 = vld [vmem:[#allocation60_spill] sm:$0xff] }
 0x4d4   : > { %4952 = vmatmul.msk.f32.gmra.mxu3 %vm2423_vm6, %v8937_v48 }
 0x4d7   : > { %v3555_v0 = vpop.f32.mrf.mxu3 }
 0x4d8   : > { %v3641_v34 = vadd.f32 %v3555_v0, %v7672_v5  ;;  %v3293_v26 = vpop.f32.mrf.mxu1  ;;  %5041 = vmatmul.msk.f32.gmra.mxu2 %vm2423_vm6, %v8916_v4  ;;  %v3717_v5 = vpop.f32.mrf.mxu0  ;;  %v5126_v0 = vld [vmem:[#allocation3 + $0x90] sm:$0xff] }
 0x4d9   : > { %v3343_v49 = vadd.f32 %v3293_v26, %v7730_v10  ;;  %4988 = vmatmul.msk.f32.gmra.mxu0 %vm2423_vm6, %v7738_v56  ;;  %v8940_v26 = vld [vmem:[#allocation17_spill] sm:$0xff] }
 0x4da   : > { %v7953_v29 = vadd.f32 %v3714_v14, %v3641_v34 }
 0x4db   : > { %v3452_v31 = vpop.f32.mrf.mxu2  ;;  %5006 = vmatmul.msk.f32.gmra.mxu1 %vm2423_vm6, %v5125_v61  ;;  %v7956_v54 = vadd.f32 %v3449_v39, %v3343_v49  ;;  %v8941_v61 = vld [vmem:[#allocation51_spill] sm:$0xff] }
 0x4dc   : > { %4953 = vmatmul.msk.f32.gmra.mxu3 %vm2423_vm6, %v8938_v22 }
 0x4df   : > { %v3558_v62 = vpop.f32.mrf.mxu3 }
 0x4e0   : > { %v3642_v4 = vadd.f32 %v3558_v62, %v8939_v12  ;;  %v3296_v9 = vpop.f32.mrf.mxu1  ;;  %5042 = vmatmul.msk.f32.gmra.mxu2 %vm2423_vm6, %v8918_v60 }
 0x4e1   : > { %v3344_v10 = vadd.f32 %v3296_v9, %v7747_v38  ;;  %4989 = vmatmul.msk.f32.gmra.mxu0 %vm2423_vm6, %v7756_v16  ;;  %v3720_v38 = vpop.f32.mrf.mxu0 }
 0x4e2   : > { %v7966_v14 = vadd.f32 %v3717_v5, %v3642_v4  ;;  %v5127_v4 = vld [vmem:[#allocation3 + $0x98] sm:$0xff] }
 0x4e3   : > { %v3455_v39 = vpop.f32.mrf.mxu2  ;;  %5007 = vmatmul.msk.f32.gmra.mxu1 %vm2423_vm6, %v5126_v0  ;;  %v7969_v34 = vadd.f32 %v3452_v31, %v3344_v10  ;;  %v8942_v10 = vld [vmem:[#allocation15_spill] sm:$0xff] }
 0x4e4   : > { %4954 = vmatmul.msk.f32.gmra.mxu3 %vm2423_vm6, %v8940_v26 }
 0x4e7   : > { %v3561_v49 = vpop.f32.mrf.mxu3 }
 0x4e8   : > { %v3643_v62 = vadd.f32 %v3561_v49, %v8941_v61  ;;  %v3299_v60 = vpop.f32.mrf.mxu1  ;;  %5043 = vmatmul.msk.f32.gmra.mxu2 %vm2423_vm6, %v8923_v27  ;;  %v8943_v49 = vld [vmem:[#allocation33_spill] sm:$0xff] }
 0x4e9   : > { %v3345_v5 = vadd.f32 %v3299_v60, %v7765_v40  ;;  %4990 = vmatmul.msk.f32.gmra.mxu0 %vm2423_vm6, %v7773_v17  ;;  %v5128_v60 = vld [vmem:[#allocation3 + $0xa8] sm:$0xff] }
 0x4ea   : > { %v7979_v12 = vadd.f32 %v3720_v38, %v3643_v62  ;;  %v8944_v38 = vld [vmem:[#allocation20_spill] sm:$0xff] }
 0x4eb   : > { %v3458_v31 = vpop.f32.mrf.mxu2  ;;  %5008 = vmatmul.msk.f32.gmra.mxu1 %vm2423_vm6, %v5127_v4  ;;  %v7982_v9 = vadd.f32 %v3455_v39, %v3345_v5 }
 0x4ec   : > { %4955 = vmatmul.msk.f32.gmra.mxu3 %vm2423_vm6, %v8942_v10 }
 0x4ef   : > { %v3564_v0 = vpop.f32.mrf.mxu3 }
 0x4f0   : > { %v7987_v27 = vadd.f32 %v3564_v0, %v8943_v49  ;;  %v3302_v61 = vpop.f32.mrf.mxu1  ;;  %5044 = vmatmul.msk.f32.gmra.mxu2 %vm2423_vm6, %v8925_v15  ;;  %v5129_v49 = vld [vmem:[#allocation3 + $0xb0] sm:$0xff] }
 0x4f1   : > { %v3346_v40 = vadd.f32 %v3302_v61, %v7782_v3  ;;  %4991 = vmatmul.msk.f32.gmra.mxu0 %vm2423_vm6, %v7791_v25  ;;  %v8946_v61 = vld [vmem:[#allocation21_spill] sm:$0xff] }
 0x4f3   : > { %v3461_v62 = vpop.f32.mrf.mxu2  ;;  %5009 = vmatmul.msk.f32.gmra.mxu1 %vm2423_vm6, %v5128_v60  ;;  %v7995_v39 = vadd.f32 %v3458_v31, %v3346_v40  ;;  %v8947_v40 = vld [vmem:[#allocation63_spill] sm:$0xff] }
 0x4f4   : > { %4956 = vmatmul.msk.f32.gmra.mxu3 %vm2423_vm6, %v8944_v38 }
 0x4f7   : > { %v3567_v5 = vpop.f32.mrf.mxu3 }
 0x4f8   : > { %v8000_v4 = vadd.f32 %v3567_v5, %v7742_v20  ;;  %v3305_v0 = vpop.f32.mrf.mxu1  ;;  %5045 = vmatmul.msk.f32.gmra.mxu2 %vm2423_vm6, %v8928_v50 }
 0x4f9   : > { %v3347_v3 = vadd.f32 %v3305_v0, %v7802_v63  ;;  %4992 = vmatmul.msk.f32.gmra.mxu0 %vm2423_vm6, %v7810_v28  ;;  %v5130_v0 = vld [vmem:[#allocation3 + $0xc0] sm:$0xff] }
 0x4fa   : > { %8945 = vst [vmem:[#allocation35_spill] sm:$0xff] %v8000_v4 }
 0x4fb   : > { %v3464_v15 = vpop.f32.mrf.mxu2  ;;  %5010 = vmatmul.msk.f32.gmra.mxu1 %vm2423_vm6, %v5129_v49  ;;  %v8008_v31 = vadd.f32 %v3461_v62, %v3347_v3  ;;  %v8949_v3 = vld [vmem:[#allocation50_spill] sm:$0xff] }
 0x4fc   : > { %4957 = vmatmul.msk.f32.gmra.mxu3 %vm2423_vm6, %v8946_v61 }
 0x4ff   : > { %v3570_v20 = vpop.f32.mrf.mxu3 }
 0x500   : > { %v8013_v60 = vadd.f32 %v3570_v20, %v8947_v40  ;;  %v3308_v5 = vpop.f32.mrf.mxu1  ;;  %5046 = vmatmul.msk.f32.gmra.mxu2 %vm2423_vm6, %v8929_v11  ;;  %v8950_v20 = vld [vmem:[#allocation59_spill] sm:$0xff] }
 0x501   : > { %v3348_v63 = vadd.f32 %v3308_v5, %v7821_v53  ;;  %4993 = vmatmul.msk.f32.gmra.mxu0 %vm2423_vm6, %v7830_v47  ;;  %v5131_v5 = vld [vmem:[#allocation3 + $0xc8] sm:$0xff] }
 0x502   : > { %8948 = vst [vmem:[#allocation38_spill] sm:$0xff] %v8013_v60 }
 0x503   : > { %v3467_v50 = vpop.f32.mrf.mxu2  ;;  %5011 = vmatmul.msk.f32.gmra.mxu1 %vm2423_vm6, %v5130_v0  ;;  %v8021_v62 = vadd.f32 %v3464_v15, %v3348_v63  ;;  %v3669_v63 = vrot.slane %v7819_v59, 2  ;;  %v8952_v0 = vld [vmem:[#allocation43_spill] sm:$0xff] }
 0x504   : > { %4958 = vmatmul.msk.f32.gmra.mxu3 %vm2423_vm6, %v8949_v3 }
 0x507   : > { %v3573_v49 = vpop.f32.mrf.mxu3 }
 0x508   : > { %v8026_v40 = vadd.f32 %v3573_v49, %v8950_v20  ;;  %v3311_v60 = vpop.f32.mrf.mxu1  ;;  %5047 = vmatmul.msk.f32.gmra.mxu2 %vm2423_vm6, %v8932_v24  ;;  %v8953_v49 = vld [vmem:[#allocation8_spill] sm:$0xff]  ;;  %v8954_v24 = vld [vmem:[#allocation30_spill] sm:$0xff] }
 0x509   : > { %v3349_v53 = vadd.f32 %v3311_v60, %v7839_v43  ;;  %4994 = vmatmul.msk.f32.gmra.mxu0 %vm2423_vm6, %v7847_v57  ;;  %v3668_v20 = vrot.slane %v8953_v49, 2  ;;  %v5132_v57 = vld [vmem:[#allocation3 + $0xd8] sm:$0xff] }
 0x50a   : > { %8951 = vst [vmem:[#allocation39_spill] sm:$0xff] %v8026_v40 }
 0x50b   : > { %v3470_v11 = vpop.f32.mrf.mxu2  ;;  %5012 = vmatmul.msk.f32.gmra.mxu1 %vm2423_vm6, %v5131_v5  ;;  %v8034_v15 = vadd.f32 %v3467_v50, %v3349_v53  ;;  %v8046_v60 = vsel %vm1131_vm4, %v3668_v20, %v3669_v63  ;;  %v2562_v53 = vld [vmem:[#allocation3 + $0x190] sm:$0x3] }
 0x50c   : > { %4959 = vmatmul.msk.f32.gmra.mxu3 %vm2423_vm6, %v8952_v0  ;;  %8956 = vst [vmem:[#allocation42_spill] sm:$0xff] %v8046_v60 }
 0x50f   : > { %v3576_v40 = vpop.f32.mrf.mxu3 }
 0x510   : > { %v8041_v47 = vadd.f32 %v3576_v40, %v8954_v24  ;;  %v3314_v43 = vpop.f32.mrf.mxu1  ;;  %5048 = vmatmul.msk.f32.gmra.mxu2 %vm2423_vm6, %v8933_v19  ;;  %v8957_v40 = vld [vmem:[#allocation55_spill] sm:$0xff]  ;;  %v3671_v24 = vrot.slane %v2562_v53, 2  ;;  %v3510_v19 = vrot.slane %v7819_v59, 1 }
 0x511   : > { %v3350_v50 = vadd.f32 %v3314_v43, %v7855_v23  ;;  %4995 = vmatmul.msk.f32.gmra.mxu0 %vm2423_vm6, %v8046_v60 }
 0x512   : > { %8955 = vst [vmem:[#allocation10_spill] sm:$0xff] %v8041_v47  ;;  %v8958_v47 = vld [vmem:[#allocation31_spill] sm:$0xff]  ;;  %v8063_v43 = vsel %vm1131_vm4, %v3669_v63, %v3671_v24  ;;  %v3512_v63 = vrot.slane %v2562_v53, 1 }
 0x513   : > { %v3473_v5 = vpop.f32.mrf.mxu2  ;;  %5013 = vmatmul.msk.f32.gmra.mxu1 %vm2423_vm6, %v5132_v57  ;;  %v8052_v28 = vadd.f32 %v3470_v11, %v3350_v50  ;;  %v3509_v57 = vrot.slane %v8953_v49, 1  ;;  %v5133_v50 = vld [vmem:[#allocation3 + $0xe0] sm:$0xff]  ;;  %v8960_v53 = vld [vmem:[#allocation67_spill] sm:$0xff] }
 0x514   : > { %4960 = vmatmul.msk.f32.gmra.mxu3 %vm2423_vm6, %v8957_v40 }
 0x517   : > { %v3579_v20 = vpop.f32.mrf.mxu3 }
 0x518   : > { %v8058_v4 = vadd.f32 %v3579_v20, %v8958_v47  ;;  %v3317_v23 = vpop.f32.mrf.mxu1  ;;  %5049 = vmatmul.msk.f32.gmra.mxu2 %vm2423_vm6, %v8934_v37  ;;  %v8071_v47 = vsel %vm694_vm3, %v3509_v57, %v3510_v19 }
 0x519   : > { %v3351_v11 = vadd.f32 %v3317_v23, %v7869_v58  ;;  %4996 = vmatmul.msk.f32.gmra.mxu0 %vm2423_vm6, %v8063_v43 }
 0x51b   : > { %5014 = vmatmul.msk.f32.gmra.mxu1 %vm2423_vm6, %v5133_v50  ;;  %v4015_v60 = vpop.f32.mrf.mxu2  ;;  %v8073_v20 = vadd.f32 %v3473_v5, %v3351_v11  ;;  %v5134_v50 = vld [vmem:[#allocation3 + $0xf0] sm:$0xff]  ;;  %v8085_v5 = vsel %vm694_vm3, %v3510_v19, %v3512_v63 }
 0x51c   : > { %4961 = vmatmul.msk.f32.gmra.mxu3 %vm2423_vm6, %v8071_v47 }
 0x51f   : > { %v3582_v37 = vpop.f32.mrf.mxu3 }
 0x520   : > { %v8078_v24 = vadd.f32 %v3582_v37, %v7834_v51  ;;  %v3855_v58 = vpop.f32.mrf.mxu1  ;;  %5050 = vmatmul.msk.f32.gmra.mxu2 %vm2423_vm6, %v8935_v55  ;;  %v5135_v55 = vld [vmem:[#allocation3 + $0xf8] sm:$0xff] }
 0x521   : > { %v3951_v23 = vadd.f32 %v3855_v58, %v7888_v30 }
 0x522   : > { %8959 = vst [vmem:[#allocation47_spill] sm:$0xff] %v8078_v24 }
 0x523   : > { %5015 = vmatmul.msk.f32.gmra.mxu1 %vm2423_vm6, %v5134_v50  ;;  %v4018_v57 = vpop.f32.mrf.mxu2  ;;  %v8087_v11 = vadd.f32 %v4015_v60, %v3951_v23  ;;  %v8961_v60 = vld [vmem:[#allocation11_spill] sm:$0xff] }
 0x524   : > { %4962 = vmatmul.msk.f32.gmra.mxu3 %vm2423_vm6, %v8085_v5 }
 0x527   : > { %v3585_v51 = vpop.f32.mrf.mxu3 }
 0x528   : > { %v8092_v37 = vadd.f32 %v3585_v51, %v8960_v53  ;;  %v3858_v24 = vpop.f32.mrf.mxu1  ;;  %5051 = vmatmul.msk.f32.gmra.mxu2 %vm2423_vm6, %v8936_v6 }
 0x529   : > { %v3952_v30 = vadd.f32 %v3858_v24, %v7901_v33  ;;  %v5136_v33 = vld [vmem:[#allocation3 + $0x108] sm:$0xff] }
 0x52b   : > { %5016 = vmatmul.msk.f32.gmra.mxu1 %vm2423_vm6, %v5135_v55  ;;  %v4021_v19 = vpop.f32.mrf.mxu2  ;;  %v8098_v63 = vadd.f32 %v4018_v57, %v3952_v30  ;;  %v8962_v57 = vld [vmem:[#allocation36_spill] sm:$0xff] }
 0x52c   : > { %5067 = vmatmul.msk.f32.vlgmr.msra.gmra.mxu3 %vm2423_vm6, %v8961_v60  ;;  %v8963_v60 = vld [vmem:[#allocation45_spill] sm:$0xff] }
 0x52f   : > { %v3588_v58 = vpop.f32.mrf.mxu3 }
 0x530   : > { %v8103_v23 = vadd.f32 %v3588_v58, %v7863_v52  ;;  %v3861_v50 = vpop.f32.mrf.mxu1  ;;  %5052 = vmatmul.msk.f32.gmra.mxu2 %vm2423_vm6, %v8937_v48 }
 0x531   : > { %v3953_v6 = vadd.f32 %v3861_v50, %v7914_v41  ;;  %v5137_v41 = vld [vmem:[#allocation3 + $0x110] sm:$0xff] }
 0x533   : > { %5017 = vmatmul.msk.f32.gmra.mxu1 %vm2423_vm6, %v5136_v33  ;;  %v4024_v24 = vpop.f32.mrf.mxu2  ;;  %v8109_v51 = vadd.f32 %v4021_v19, %v3953_v6  ;;  %v8964_v33 = vld [vmem:[#allocation9_spill] sm:$0xff] }
 0x534   : > { %5068 = vmatmul.msk.f32.gmra.mxu3 %vm2423_vm6, %v8962_v57 }
 0x537   : > { %v3591_v53 = vpop.f32.mrf.mxu3 }
 0x538   : > { %v8114_v30 = vadd.f32 %v3591_v53, %v7878_v42  ;;  %v3864_v52 = vpop.f32.mrf.mxu1  ;;  %5053 = vmatmul.msk.f32.gmra.mxu2 %vm2423_vm6, %v8938_v22 }
 0x539   : > { %v3954_v48 = vadd.f32 %v3864_v52, %v7927_v2  ;;  %v5138_v2 = vld [vmem:[#allocation3 + $0x120] sm:$0xff] }
 0x53b   : > { %5018 = vmatmul.msk.f32.gmra.mxu1 %vm2423_vm6, %v5137_v41  ;;  %v8120_v55 = vadd.f32 %v4024_v24, %v3954_v48  ;;  %v4027_v19 = vpop.f32.mrf.mxu2  ;;  %v8965_v48 = vld [vmem:[#allocation14_spill] sm:$0xff] }
 0x53c   : > { %5069 = vmatmul.msk.f32.gmra.mxu3 %vm2423_vm6, %v8963_v60 }
 0x53f   : > { %v3594_v58 = vpop.f32.mrf.mxu3 }
 0x540   : > { %v8125_v50 = vadd.f32 %v3594_v58, %v7891_v32  ;;  %v3867_v42 = vpop.f32.mrf.mxu1  ;;  %5054 = vmatmul.msk.f32.gmra.mxu2 %vm2423_vm6, %v8940_v26 }
 0x541   : > { %v3955_v22 = vadd.f32 %v3867_v42, %v7940_v35  ;;  %v5139_v35 = vld [vmem:[#allocation3 + $0x128] sm:$0xff]  ;;  %v8966_v42 = vld [vmem:[#allocation48_spill] sm:$0xff] }
 0x543   : > { %5019 = vmatmul.msk.f32.gmra.mxu1 %vm2423_vm6, %v5138_v2  ;;  %v8131_v6 = vadd.f32 %v4027_v19, %v3955_v22  ;;  %v4030_v24 = vpop.f32.mrf.mxu2 }
 0x544   : > { %5070 = vmatmul.msk.f32.gmra.mxu3 %vm2423_vm6, %v8964_v33 }
 0x547   : > { %v3597_v57 = vpop.f32.mrf.mxu3 }
 0x548   : > { %v8136_v53 = vadd.f32 %v3597_v57, %v7904_v8  ;;  %v3870_v32 = vpop.f32.mrf.mxu1  ;;  %5055 = vmatmul.msk.f32.gmra.mxu2 %vm2423_vm6, %v8942_v10  ;;  %v8967_v57 = vld [vmem:[#allocation52_spill] sm:$0xff] }
 0x549   : > { %v3956_v26 = vadd.f32 %v3870_v32, %v7953_v29  ;;  %v5140_v29 = vld [vmem:[#allocation3 + $0x138] sm:$0xff] }
 0x54b   : > { %5020 = vmatmul.msk.f32.gmra.mxu1 %vm2423_vm6, %v5139_v35  ;;  %v8142_v52 = vadd.f32 %v4030_v24, %v3956_v26  ;;  %v4033_v19 = vpop.f32.mrf.mxu2 }
 0x54c   : > { %5071 = vmatmul.msk.f32.gmra.mxu3 %vm2423_vm6, %v8965_v48  ;;  %v5143_v48 = vld [vmem:[#allocation3 + $0x158] sm:$0xff] }
 0x54f   : > { %v3600_v41 = vpop.f32.mrf.mxu3 }
 0x550   : > { %v8147_v60 = vadd.f32 %v3600_v41, %v7917_v46  ;;  %v3873_v8 = vpop.f32.mrf.mxu1  ;;  %5056 = vmatmul.msk.f32.gmra.mxu2 %vm2423_vm6, %v8944_v38 }
 0x551   : > { %v3957_v10 = vadd.f32 %v3873_v8, %v7966_v14  ;;  %v5141_v14 = vld [vmem:[#allocation3 + $0x140] sm:$0xff] }
 0x553   : > { %5021 = vmatmul.msk.f32.gmra.mxu1 %vm2423_vm6, %v5140_v29  ;;  %v8153_v58 = vadd.f32 %v4033_v19, %v3957_v10  ;;  %v4036_v33 = vpop.f32.mrf.mxu2  ;;  %v5144_v19 = vld [vmem:[#allocation3 + $0x168] sm:$0xff]  ;;  %v5145_v10 = vld [vmem:[#allocation3 + $0x170] sm:$0xff]  ;;  %v8202_v29 = vld [vmem:[#allocation3 + $0x1a0] sm:$0xff] }
 0x554   : > { %5072 = vmatmul.msk.f32.gmra.mxu3 %vm2423_vm6, %v8966_v42 }
 0x557   : > { %v3603_v22 = vpop.f32.mrf.mxu3 }
 0x558   : > { %v8158_v2 = vadd.f32 %v3603_v22, %v7930_v7  ;;  %v3876_v46 = vpop.f32.mrf.mxu1  ;;  %5057 = vmatmul.msk.f32.gmra.mxu2 %vm2423_vm6, %v8946_v61  ;;  %v5142_v7 = vld [vmem:[#allocation3 + $0x150] sm:$0xff] }
 0x559   : > { %v3958_v38 = vadd.f32 %v3876_v46, %v7979_v12  ;;  %v8968_v12 = vld [vmem:[#allocation56_spill] sm:$0xff] }
 0x55a   : > { %v8972_v46 = vld [vmem:[#allocation4_spill] sm:$0xff] }
 0x55b   : > { %5022 = vmatmul.msk.f32.gmra.mxu1 %vm2423_vm6, %v5141_v14  ;;  %v8164_v24 = vadd.f32 %v4036_v33, %v3958_v38  ;;  %v8216_v33 = vld [vmem:[#allocation3 + $0x1a8] sm:$0x3] }
 0x55c   : > { %5073 = vmatmul.msk.f32.gmra.mxu3 %vm2423_vm6, %v8967_v57  ;;  %v8973_v57 = vld [vmem:[#allocation25_spill] sm:$0xff] }
 0x55f   : > { %v3606_v32 = vpop.f32.mrf.mxu3 }
 0x560   : > { %v8169_v26 = vadd.f32 %v3606_v32, %v7943_v36  ;;  %5058 = vmatmul.msk.f32.gmra.mxu2 %vm2423_vm6, %v8949_v3  ;;  %v8969_v36 = vld [vmem:[#allocation58_spill] sm:$0xff] }
 0x563   : > { %5023 = vmatmul.msk.f32.gmra.mxu1 %vm2423_vm6, %v5142_v7 }
 0x564   : > { %5074 = vmatmul.msk.f32.gmra.mxu3 %vm2423_vm6, %v8968_v12 }
 0x567   : > { %v3609_v61 = vpop.f32.mrf.mxu3 }
 0x568   : > { %v8177_v35 = vadd.f32 %v3609_v61, %v7956_v54  ;;  %5059 = vmatmul.msk.f32.gmra.mxu2 %vm2423_vm6, %v8952_v0  ;;  %v8970_v54 = vld [vmem:[#allocation24_spill] sm:$0xff]  ;;  %v8975_v61 = vld [vmem:[#allocation26_spill] sm:$0xff] }
 0x56b   : > { %5024 = vmatmul.msk.f32.gmra.mxu1 %vm2423_vm6, %v5143_v48 }
 0x56c   : > { %5075 = vmatmul.msk.f32.gmra.mxu3 %vm2423_vm6, %v8969_v36 }
 0x56f   : > { %v3612_v3 = vpop.f32.mrf.mxu3 }
 0x570   : > { %v8185_v41 = vadd.f32 %v3612_v3, %v7969_v34  ;;  %5060 = vmatmul.msk.f32.gmra.mxu2 %vm2423_vm6, %v8957_v40  ;;  %v8971_v34 = vld [vmem:[#allocation27_spill] sm:$0xff]  ;;  %v8200_v40 = vld [vmem:[#allocation3 + $0x198] sm:$0xff] }
 0x573   : > { %5025 = vmatmul.msk.f32.gmra.mxu1 %vm2423_vm6, %v5144_v19 }
 0x574   : > { %5076 = vmatmul.msk.f32.gmra.mxu3 %vm2423_vm6, %v8970_v54 }
 0x577   : > { %v3615_v0 = vpop.f32.mrf.mxu3 }
 0x578   : > { %v8193_v8 = vadd.f32 %v3615_v0, %v7982_v9  ;;  %5061 = vmatmul.msk.f32.gmra.mxu2 %vm2423_vm6, %v8071_v47  ;;  %v3984_v9 = vrot.slane %v8200_v40, 1  ;;  %v3985_v47 = vrot.slane %v8202_v29, 1  ;;  %v3879_v0 = vpop.f32.mrf.mxu1 }
 0x57a   : > { %v3986_v38 = vsel %vm694_vm3, %v3984_v9, %v3985_v47 }
 0x57b   : > { %5026 = vmatmul.msk.f32.gmra.mxu1 %vm2423_vm6, %v5145_v10 }
 0x57c   : > { %5077 = vmatmul.msk.f32.gmra.mxu3 %vm2423_vm6, %v8971_v34 }
 0x57f   : > { %v3618_v42 = vpop.f32.mrf.mxu3 }
 0x580   : > { %v8205_v22 = vadd.f32 %v3618_v42, %v7995_v39  ;;  %5062 = vmatmul.msk.f32.gmra.mxu2 %vm2423_vm6, %v8085_v5  ;;  %v3987_v5 = vrot.slane %v8216_v33, 1  ;;  %v4039_v42 = vpop.f32.mrf.mxu2 }
 0x583   : > { %5027 = vmatmul.msk.f32.gmra.mxu1 %vm2423_vm6, %v8953_v49  ;;  %v3988_v49 = vsel %vm694_vm3, %v3985_v47, %v3987_v5 }
 0x584   : > { %5078 = vmatmul.msk.f32.gmra.mxu3 %vm2423_vm6, %v8972_v46 }
 0x587   : > { %v3621_v14 = vpop.f32.mrf.mxu3 }
 0x588   : > { %v8219_v39 = vadd.f32 %v3621_v14, %v8008_v31  ;;  %5063 = vmatmul.msk.f32.gmra.mxu2 %vm2423_vm6, %v3986_v38  ;;  %v8974_v31 = vld [vmem:[#allocation46_spill] sm:$0xff]  ;;  %v3882_v38 = vpop.f32.mrf.mxu1  ;;  %v4042_v5 = vpop.f32.mrf.mxu2 }
 0x58b   : > { %5028 = vmatmul.msk.f32.gmra.mxu1 %vm2423_vm6, %v7819_v59 }
 0x58c   : > { %5079 = vmatmul.msk.f32.gmra.mxu3 %vm2423_vm6, %v8973_v57 }
 0x58f   : > { %v3624_v32 = vpop.f32.mrf.mxu3 }
 0x590   : > { %v8229_v7 = vadd.f32 %v3624_v32, %v8021_v62  ;;  %5064 = vmatmul.msk.f32.gmra.mxu2 %vm2423_vm6, %v3988_v49 }
 0x593   : > { %5029 = vmatmul.msk.f32.gmra.mxu1 %vm2423_vm6, %v8200_v40 }
 0x594   : > { %5080 = vmatmul.msk.f32.gmra.mxu3 %vm2423_vm6, %v8974_v31 }
 0x597   : > { %v3627_v12 = vpop.f32.mrf.mxu3 }
 0x598   : > { %v8237_v59 = vadd.f32 %v3627_v12, %v8034_v15  ;;  %v8256_v15 = vld [vmem:[%s8433_s5] ss:$0 sm:$0xff] }
 0x59b   : > { %5030 = vmatmul.msk.f32.gmra.mxu1 %vm2423_vm6, %v8202_v29 }
 0x59c   : > { %5081 = vmatmul.msk.f32.gmra.mxu3 %vm2423_vm6, %v8975_v61  ;;  %v4045_v61 = vpop.f32.mrf.mxu2 }
 0x59f   : > { %v3630_v62 = vpop.f32.mrf.mxu3 }
 0x5a0   : > { %v8244_v48 = vadd.f32 %v3630_v62, %v8052_v28 }
 0x5a4   : > { %5082 = vmatmul.msk.f32.gmra.mxu3 %vm2423_vm6, %v7633_v13 }
 0x5a7   : > { %v3633_v36 = vpop.f32.mrf.mxu3 }
 0x5a8   : > { %v8249_v3 = vadd.f32 %v3633_v36, %v8073_v20  ;;  %v3723_v20 = vpop.f32.mrf.mxu0 }
 0x5ac   : > { %5083 = vmatmul.msk.f32.gmra.mxu3 %vm2423_vm6, %v7651_v1 }
 0x5af   : > { %v4174_v19 = vpop.f32.mrf.mxu3 }
 0x5b0   : > { %v4270_v28 = vadd.f32 %v4174_v19, %v8087_v11  ;;  %v3726_v47 = vpop.f32.mrf.mxu0 }
 0x5b2   : > { %v4306_v54 = vadd.f32 %v8256_v15, %v4270_v28 }
 0x5b4   : > { %v4338_v13 = vmax.f32 %v4306_v54, 0.0  ;;  %5084 = vmatmul.msk.f32.gmra.mxu3 %vm2423_vm6, %v7668_v18 }
 0x5b6   : > { %4370 = vst.msk [vmem:[%s8264_s26] sm:$0xff] %vm2423_vm6, %v4338_v13 }
 0x5b7   : > { %v4177_v1 = vpop.f32.mrf.mxu3 }
 0x5b8   : > { %v4271_v11 = vadd.f32 %v4177_v1, %v8098_v63  ;;  %v3729_v49 = vpop.f32.mrf.mxu0 }
 0x5ba   : > { %v4307_v10 = vadd.f32 %v8256_v15, %v4271_v11 }
 0x5bc   : > { %v4339_v34 = vmax.f32 %v4307_v10, 0.0  ;;  %5085 = vmatmul.msk.f32.gmra.mxu3 %vm2423_vm6, %v7686_v44 }
 0x5be   : > { %4371 = vst.msk [vmem:[%s8264_s26 + $0x8] sm:$0xff] %vm2423_vm6, %v4339_v34 }
 0x5bf   : > { %v4180_v9 = vpop.f32.mrf.mxu3 }
 0x5c0   : > { %v4272_v18 = vadd.f32 %v4180_v9, %v8109_v51  ;;  %v3885_v51 = vpop.f32.mrf.mxu1 }
 0x5c2   : > { %v4308_v46 = vadd.f32 %v8256_v15, %v4272_v18 }
 0x5c4   : > { %v4340_v14 = vmax.f32 %v4308_v46, 0.0  ;;  %5086 = vmatmul.msk.f32.gmra.mxu3 %vm2423_vm6, %v7703_v21 }
 0x5c6   : > { %4372 = vst.msk [vmem:[%s8264_s26 + $0x10] sm:$0xff] %vm2423_vm6, %v4340_v14 }
 0x5c7   : > { %v4183_v63 = vpop.f32.mrf.mxu3 }
 0x5c8   : > { %v4273_v44 = vadd.f32 %v4183_v63, %v8120_v55  ;;  %v3732_v55 = vpop.f32.mrf.mxu0  ;;  %v3888_v36 = vpop.f32.mrf.mxu1 }
 0x5ca   : > { %v4309_v57 = vadd.f32 %v8256_v15, %v4273_v44 }
 0x5cc   : > { %v4341_v32 = vmax.f32 %v4309_v57, 0.0  ;;  %5087 = vmatmul.msk.f32.gmra.mxu3 %vm2423_vm6, %v7721_v45 }
 0x5ce   : > { %4373 = vst.msk [vmem:[%s8264_s26 + $0x18] sm:$0xff] %vm2423_vm6, %v4341_v32  ;;  %v8976_v32 = vld [vmem:[#allocation35_spill] sm:$0xff] }
 0x5cf   : > { %v4186_v31 = vpop.f32.mrf.mxu3 }
 0x5d0   : > { %v4274_v21 = vadd.f32 %v4186_v31, %v8131_v6  ;;  %v4048_v6 = vpop.f32.mrf.mxu2  ;;  %v3735_v1 = vpop.f32.mrf.mxu0  ;;  %v3804_v31 = vadd.f32 %v3726_v47, %v8976_v32 }
 0x5d1   : > { %v3891_v11 = vpop.f32.mrf.mxu1 }
 0x5d2   : > { %v4310_v12 = vadd.f32 %v8256_v15, %v4274_v21 }
 0x5d4   : > { %v4342_v62 = vmax.f32 %v4310_v12, 0.0  ;;  %5088 = vmatmul.msk.f32.gmra.mxu3 %vm2423_vm6, %v7738_v56 }
 0x5d6   : > { %4374 = vst.msk [vmem:[%s8264_s26 + $0x20] sm:$0xff] %vm2423_vm6, %v4342_v62  ;;  %v8977_v62 = vld [vmem:[#allocation62_spill] sm:$0xff] }
 0x5d7   : > { %v4189_v45 = vpop.f32.mrf.mxu3 }
 0x5d8   : > { %v4275_v19 = vadd.f32 %v4189_v45, %v8142_v52  ;;  %v4051_v52 = vpop.f32.mrf.mxu2  ;;  %v3738_v46 = vpop.f32.mrf.mxu0 }
 0x5d9   : > { %v3894_v63 = vpop.f32.mrf.mxu1 }
 0x5da   : > { %v4311_v28 = vadd.f32 %v8256_v15, %v4275_v19 }
 0x5dc   : > { %v4343_v54 = vmax.f32 %v4311_v28, 0.0  ;;  %5089 = vmatmul.msk.f32.gmra.mxu3 %vm2423_vm6, %v7756_v16  ;;  %v3803_v16 = vadd.f32 %v3723_v20, %v7987_v27  ;;  %v3960_v20 = vadd.f32 %v3882_v38, %v3804_v31 }
 0x5de   : > { %4375 = vst.msk [vmem:[%s8264_s26 + $0x28] sm:$0xff] %vm2423_vm6, %v4343_v54  ;;  %v3959_v14 = vadd.f32 %v3879_v0, %v3803_v16 }
 0x5df   : > { %v4192_v13 = vpop.f32.mrf.mxu3 }
 0x5e0   : > { %v4276_v56 = vadd.f32 %v4192_v13, %v8153_v58  ;;  %v4054_v27 = vpop.f32.mrf.mxu2  ;;  %v3741_v0 = vpop.f32.mrf.mxu0 }
 0x5e1   : > { %v3897_v45 = vpop.f32.mrf.mxu1 }
 0x5e2   : > { %v4312_v10 = vadd.f32 %v8256_v15, %v4276_v56 }
 0x5e4   : > { %v4344_v34 = vmax.f32 %v4312_v10, 0.0  ;;  %5090 = vmatmul.msk.f32.gmra.mxu3 %vm2423_vm6, %v7773_v17  ;;  %v4119_v17 = vadd.f32 %v4039_v42, %v3959_v14  ;;  %v8978_v42 = vld [vmem:[#allocation38_spill] sm:$0xff]  ;;  %v8979_v10 = vld [vmem:[#allocation65_spill] sm:$0xff] }
 0x5e5   : > { %v3805_v28 = vadd.f32 %v3729_v49, %v8978_v42 }
 0x5e6   : > { %4376 = vst.msk [vmem:[%s8264_s26 + $0x30] sm:$0xff] %vm2423_vm6, %v4344_v34 }
 0x5e7   : > { %v4195_v9 = vpop.f32.mrf.mxu3  ;;  %v3961_v47 = vadd.f32 %v3885_v51, %v3805_v28 }
 0x5e8   : > { %v4277_v18 = vadd.f32 %v4195_v9, %v8164_v24  ;;  %v4057_v38 = vpop.f32.mrf.mxu2  ;;  %v3744_v34 = vpop.f32.mrf.mxu0 }
 0x5e9   : > { %v4121_v9 = vadd.f32 %v4045_v61, %v3961_v47  ;;  %v3900_v16 = vpop.f32.mrf.mxu1  ;;  %v8982_v61 = vld [vmem:[#allocation10_spill] sm:$0xff] }
 0x5ea   : > { %v4313_v58 = vadd.f32 %v8256_v15, %v4277_v18 }
 0x5ec   : > { %v4345_v44 = vmax.f32 %v4313_v58, 0.0  ;;  %5091 = vmatmul.msk.f32.gmra.mxu3 %vm2423_vm6, %v7791_v25  ;;  %v4120_v25 = vadd.f32 %v4042_v5, %v3960_v20  ;;  %v8980_v5 = vld [vmem:[#allocation39_spill] sm:$0xff]  ;;  %v3807_v20 = vadd.f32 %v3735_v1, %v8982_v61 }
 0x5ed   : > { %v3806_v14 = vadd.f32 %v3732_v55, %v8980_v5 }
 0x5ee   : > { %4377 = vst.msk [vmem:[%s8264_s26 + $0x38] sm:$0xff] %vm2423_vm6, %v4345_v44  ;;  %v3963_v55 = vadd.f32 %v3891_v11, %v3807_v20 }
 0x5ef   : > { %v4198_v57 = vpop.f32.mrf.mxu3  ;;  %v3962_v49 = vadd.f32 %v3888_v36, %v3806_v14 }
 0x5f0   : > { %v4278_v21 = vadd.f32 %v4198_v57, %v4119_v17  ;;  %v8981_v17 = vld [vmem:[#allocation34_spill] sm:$0xff]  ;;  %v4060_v57 = vpop.f32.mrf.mxu2 }
 0x5f1   : > { %v4122_v32 = vadd.f32 %v4048_v6, %v3962_v49  ;;  %v3808_v6 = vadd.f32 %v3738_v46, %v8058_v4  ;;  %v8984_v4 = vld [vmem:[#allocation47_spill] sm:$0xff] }
 0x5f2   : > { %v4314_v24 = vadd.f32 %v8256_v15, %v4278_v21  ;;  %v3747_v21 = vpop.f32.mrf.mxu0  ;;  %v3809_v46 = vadd.f32 %v3741_v0, %v8984_v4  ;;  %v3810_v0 = vadd.f32 %v3744_v34, %v8092_v37 }
 0x5f3   : > { %v3964_v1 = vadd.f32 %v3894_v63, %v3808_v6 }
 0x5f4   : > { %v4346_v12 = vmax.f32 %v4314_v24, 0.0  ;;  %5092 = vmatmul.msk.f32.gmra.mxu3 %vm2423_vm6, %v8977_v62 }
 0x5f6   : > { %4378 = vst.msk [vmem:[%s8264_s26 + $0x40] sm:$0xff] %vm2423_vm6, %v4346_v12  ;;  %v3903_v12 = vpop.f32.mrf.mxu1 }
 0x5f7   : > { %v4201_v19 = vpop.f32.mrf.mxu3 }
 0x5f8   : > { %v4279_v54 = vadd.f32 %v4201_v19, %v4120_v25  ;;  %v8983_v25 = vld [vmem:[#allocation42_spill] sm:$0xff]  ;;  %v4123_v19 = vadd.f32 %v4051_v52, %v3963_v55  ;;  %v4063_v42 = vpop.f32.mrf.mxu2  ;;  %v4124_v52 = vadd.f32 %v4054_v27, %v3964_v1 }
 0x5fa   : > { %v4315_v13 = vadd.f32 %v8256_v15, %v4279_v54  ;;  %v3750_v47 = vpop.f32.mrf.mxu0 }
 0x5fc   : > { %v4347_v56 = vmax.f32 %v4315_v13, 0.0  ;;  %5093 = vmatmul.msk.f32.gmra.mxu3 %vm2423_vm6, %v8979_v10  ;;  %v4143_v10 = vrot.slane %v8200_v40, 2 }
 0x5fe   : > { %4379 = vst.msk [vmem:[%s8264_s26 + $0x48] sm:$0xff] %vm2423_vm6, %v4347_v56  ;;  %v3906_v11 = vpop.f32.mrf.mxu1 }
 0x5ff   : > { %v4204_v18 = vpop.f32.mrf.mxu3 }
 0x600   : > { %v4280_v58 = vadd.f32 %v4204_v18, %v4121_v9  ;;  %v4144_v9 = vrot.slane %v8202_v29, 2  ;;  %v4066_v63 = vpop.f32.mrf.mxu2  ;;  %v4146_v29 = vrot.slane %v8216_v33, 2 }
 0x602   : > { %v4316_v51 = vadd.f32 %v8256_v15, %v4280_v58  ;;  %v4145_v14 = vsel %vm1131_vm4, %v4143_v10, %v4144_v9  ;;  %v3965_v58 = vadd.f32 %v3897_v45, %v3809_v46  ;;  %v3966_v45 = vadd.f32 %v3900_v16, %v3810_v0 }
 0x604   : > { %v4348_v44 = vmax.f32 %v4316_v51, 0.0  ;;  %5094 = vmatmul.msk.f32.gmra.mxu3 %vm2423_vm6, %v8981_v17  ;;  %v3753_v51 = vpop.f32.mrf.mxu0  ;;  %v4125_v27 = vadd.f32 %v4057_v38, %v3965_v58  ;;  %v4126_v33 = vadd.f32 %v4060_v57, %v3966_v45 }
 0x606   : > { %4380 = vst.msk [vmem:[%s8264_s26 + $0x50] sm:$0xff] %vm2423_vm6, %v4348_v44  ;;  %v3909_v40 = vpop.f32.mrf.mxu1 }
 0x607   : > { %v4207_v31 = vpop.f32.mrf.mxu3 }
 0x608   : > { %v4281_v24 = vadd.f32 %v4207_v31, %v4122_v32  ;;  %v4147_v32 = vsel %vm1131_vm4, %v4144_v9, %v4146_v29  ;;  %v4069_v61 = vpop.f32.mrf.mxu2  ;;  %v3813_v9 = vadd.f32 %v3753_v51, %v8125_v50 }
 0x60a   : > { %v4317_v36 = vadd.f32 %v8256_v15, %v4281_v24 }
 0x60c   : > { %v4349_v62 = vmax.f32 %v4317_v36, 0.0  ;;  %5095 = vmatmul.msk.f32.gmra.mxu3 %vm2423_vm6, %v8983_v25  ;;  %v3756_v24 = vpop.f32.mrf.mxu0  ;;  %v3811_v36 = vadd.f32 %v3747_v21, %v8103_v23 }
 0x60e   : > { %4381 = vst.msk [vmem:[%s8264_s26 + $0x58] sm:$0xff] %vm2423_vm6, %v4349_v62  ;;  %v3912_v55 = vpop.f32.mrf.mxu1  ;;  %v3967_v34 = vadd.f32 %v3903_v12, %v3811_v36 }
 0x60f   : > { %v4210_v28 = vpop.f32.mrf.mxu3 }
 0x610   : > { %v4282_v54 = vadd.f32 %v4210_v28, %v4123_v19  ;;  %v4072_v25 = vpop.f32.mrf.mxu2  ;;  %v4127_v19 = vadd.f32 %v4063_v42, %v3967_v34 }
 0x612   : > { %v4318_v13 = vadd.f32 %v8256_v15, %v4282_v54  ;;  %v3812_v54 = vadd.f32 %v3750_v47, %v8114_v30 }
 0x614   : > { %v4350_v56 = vmax.f32 %v4318_v13, 0.0  ;;  %5096 = vmatmul.msk.f32.gmra.mxu3 %vm2423_vm6, %v8063_v43  ;;  %v3759_v6 = vpop.f32.mrf.mxu0  ;;  %v3968_v13 = vadd.f32 %v3906_v11, %v3812_v54 }
 0x616   : > { %4382 = vst.msk [vmem:[%s8264_s26 + $0x60] sm:$0xff] %vm2423_vm6, %v4350_v56  ;;  %v3915_v57 = vpop.f32.mrf.mxu1  ;;  %v4128_v12 = vadd.f32 %v4066_v63, %v3968_v13 }
 0x617   : > { %v4213_v18 = vpop.f32.mrf.mxu3 }
 0x618   : > { %v4283_v5 = vadd.f32 %v4213_v18, %v4124_v52  ;;  %v4075_v56 = vpop.f32.mrf.mxu2  ;;  %v3969_v18 = vadd.f32 %v3909_v40, %v3813_v9 }
 0x61a   : > { %v4319_v49 = vadd.f32 %v8256_v15, %v4283_v5  ;;  %v4129_v11 = vadd.f32 %v4069_v61, %v3969_v18  ;;  %v3814_v5 = vadd.f32 %v3756_v24, %v8136_v53 }
 0x61c   : > { %v4351_v43 = vmax.f32 %v4319_v49, 0.0  ;;  %5097 = vmatmul.msk.f32.gmra.mxu3 %vm2423_vm6, %v4145_v14  ;;  %v3762_v42 = vpop.f32.mrf.mxu0  ;;  %v3970_v58 = vadd.f32 %v3912_v55, %v3814_v5 }
 0x61d   : > { %v3816_v24 = vadd.f32 %v3762_v42, %v8158_v2 }
 0x61e   : > { %4383 = vst.msk [vmem:[%s8264_s26 + $0x68] sm:$0xff] %vm2423_vm6, %v4351_v43  ;;  %v3918_v47 = vpop.f32.mrf.mxu1  ;;  %v4130_v40 = vadd.f32 %v4072_v25, %v3970_v58 }
 0x61f   : > { %v4216_v44 = vpop.f32.mrf.mxu3  ;;  %v3972_v55 = vadd.f32 %v3918_v47, %v3816_v24 }
 0x620   : > { %v4284_v17 = vadd.f32 %v4216_v44, %v4125_v27  ;;  %v4078_v63 = vpop.f32.mrf.mxu2  ;;  %v3815_v27 = vadd.f32 %v3759_v6, %v8147_v60 }
 0x622   : > { %v4320_v31 = vadd.f32 %v8256_v15, %v4284_v17  ;;  %v3971_v0 = vadd.f32 %v3915_v57, %v3815_v27 }
 0x624   : > { %v4352_v20 = vmax.f32 %v4320_v31, 0.0  ;;  %5098 = vmatmul.msk.f32.gmra.mxu3 %vm2423_vm6, %v4147_v32  ;;  %v3765_v49 = vpop.f32.mrf.mxu0  ;;  %v4131_v31 = vadd.f32 %v4075_v56, %v3971_v0 }
 0x626   : > { %4384 = vst.msk [vmem:[%s8264_s26 + $0x70] sm:$0xff] %vm2423_vm6, %v4352_v20  ;;  %v3921_v43 = vpop.f32.mrf.mxu1 }
 0x627   : > { %v4219_v38 = vpop.f32.mrf.mxu3 }
 0x628   : > { %v4285_v37 = vadd.f32 %v4219_v38, %v4126_v33  ;;  %v4081_v17 = vpop.f32.mrf.mxu2 }
 0x62a   : > { %v4321_v16 = vadd.f32 %v8256_v15, %v4285_v37  ;;  %v4132_v37 = vadd.f32 %v4078_v63, %v3972_v55 }
 0x62c   : > { %v4353_v62 = vmax.f32 %v4321_v16, 0.0  ;;  %v3768_v45 = vpop.f32.mrf.mxu0 }
 0x62d   : > { %v3818_v13 = vadd.f32 %v3768_v45, %v8177_v35 }
 0x62e   : > { %4385 = vst.msk [vmem:[%s8264_s26 + $0x78] sm:$0xff] %vm2423_vm6, %v4353_v62  ;;  %v3924_v61 = vpop.f32.mrf.mxu1  ;;  %v3817_v62 = vadd.f32 %v3765_v49, %v8169_v26 }
 0x62f   : > { %v4222_v28 = vpop.f32.mrf.mxu3 }
 0x630   : > { %v4286_v1 = vadd.f32 %v4222_v28, %v4127_v19  ;;  %v4084_v36 = vpop.f32.mrf.mxu2  ;;  %v3973_v28 = vadd.f32 %v3921_v43, %v3817_v62 }
 0x632   : > { %v4322_v23 = vadd.f32 %v8256_v15, %v4286_v1  ;;  %v4133_v54 = vadd.f32 %v4081_v17, %v3973_v28 }
 0x634   : > { %v4354_v21 = vmax.f32 %v4322_v23, 0.0  ;;  %v3771_v16 = vpop.f32.mrf.mxu0 }
 0x635   : > { %v3819_v42 = vadd.f32 %v3771_v16, %v8185_v41 }
 0x636   : > { %4386 = vst.msk [vmem:[%s8264_s26 + $0x80] sm:$0xff] %vm2423_vm6, %v4354_v21  ;;  %v3927_v19 = vpop.f32.mrf.mxu1 }
 0x637   : > { %v4225_v10 = vpop.f32.mrf.mxu3  ;;  %v3975_v47 = vadd.f32 %v3927_v19, %v3819_v42 }
 0x638   : > { %v4287_v52 = vadd.f32 %v4225_v10, %v4128_v12  ;;  %v4087_v1 = vpop.f32.mrf.mxu2  ;;  %v3974_v12 = vadd.f32 %v3924_v61, %v3818_v13 }
 0x639   : > { %v4135_v5 = vadd.f32 %v4087_v1, %v3975_v47 }
 0x63a   : > { %v4323_v30 = vadd.f32 %v8256_v15, %v4287_v52  ;;  %v4134_v9 = vadd.f32 %v4084_v36, %v3974_v12 }
 0x63c   : > { %v4355_v4 = vmax.f32 %v4323_v30, 0.0  ;;  %v3774_v21 = vpop.f32.mrf.mxu0 }
 0x63d   : > { %v3820_v63 = vadd.f32 %v3774_v21, %v8193_v8 }
 0x63e   : > { %4387 = vst.msk [vmem:[%s8264_s26 + $0x88] sm:$0xff] %vm2423_vm6, %v4355_v4  ;;  %v3930_v56 = vpop.f32.mrf.mxu1 }
 0x63f   : > { %v4228_v46 = vpop.f32.mrf.mxu3 }
 0x640   : > { %v4288_v14 = vadd.f32 %v4228_v46, %v4129_v11  ;;  %v4090_v30 = vpop.f32.mrf.mxu2 }
 0x642   : > { %v4324_v50 = vadd.f32 %v8256_v15, %v4288_v14 }
 0x644   : > { %v4356_v51 = vmax.f32 %v4324_v50, 0.0  ;;  %v3777_v4 = vpop.f32.mrf.mxu0  ;;  %v3976_v50 = vadd.f32 %v3930_v56, %v3820_v63 }
 0x646   : > { %4388 = vst.msk [vmem:[%s8264_s26 + $0x90] sm:$0xff] %vm2423_vm6, %v4356_v51  ;;  %v3933_v46 = vpop.f32.mrf.mxu1 }
 0x647   : > { %v4231_v29 = vpop.f32.mrf.mxu3 }
 0x648   : > { %v4289_v44 = vadd.f32 %v4231_v29, %v4130_v40  ;;  %v4093_v49 = vpop.f32.mrf.mxu2  ;;  %v4136_v40 = vadd.f32 %v4090_v30, %v3976_v50 }
 0x64a   : > { %v4325_v53 = vadd.f32 %v8256_v15, %v4289_v44  ;;  %v3821_v44 = vadd.f32 %v3777_v4, %v8205_v22 }
 0x64c   : > { %v4357_v32 = vmax.f32 %v4325_v53, 0.0  ;;  %v3780_v43 = vpop.f32.mrf.mxu0  ;;  %v3977_v53 = vadd.f32 %v3933_v46, %v3821_v44 }
 0x64e   : > { %4389 = vst.msk [vmem:[%s8264_s26 + $0x98] sm:$0xff] %vm2423_vm6, %v4357_v32  ;;  %v3936_v29 = vpop.f32.mrf.mxu1  ;;  %v4137_v45 = vadd.f32 %v4093_v49, %v3977_v53 }
 0x64f   : > { %v4234_v20 = vpop.f32.mrf.mxu3 }
 0x650   : > { %v4290_v33 = vadd.f32 %v4234_v20, %v4131_v31  ;;  %v4096_v32 = vpop.f32.mrf.mxu2  ;;  %v3822_v20 = vadd.f32 %v3780_v43, %v8219_v39 }
 0x652   : > { %v4326_v60 = vadd.f32 %v8256_v15, %v4290_v33  ;;  %v3978_v55 = vadd.f32 %v3936_v29, %v3822_v20 }
 0x654   : > { %v4358_v38 = vmax.f32 %v4326_v60, 0.0  ;;  %v3783_v61 = vpop.f32.mrf.mxu0 }
 0x656   : > { %4390 = vst.msk [vmem:[%s8264_s26 + $0xa0] sm:$0xff] %vm2423_vm6, %v4358_v38  ;;  %v3939_v33 = vpop.f32.mrf.mxu1  ;;  %v4138_v38 = vadd.f32 %v4096_v32, %v3978_v55 }
 0x657   : > { %v4237_v34 = vpop.f32.mrf.mxu3 }
 0x658   : > { %v4291_v25 = vadd.f32 %v4237_v34, %v4132_v37  ;;  %v4099_v36 = vpop.f32.mrf.mxu2  ;;  %v3823_v34 = vadd.f32 %v3783_v61, %v8229_v7 }
 0x65a   : > { %v4327_v2 = vadd.f32 %v8256_v15, %v4291_v25  ;;  %v3979_v25 = vadd.f32 %v3939_v33, %v3823_v34 }
 0x65c   : > { %v4359_v6 = vmax.f32 %v4327_v2, 0.0  ;;  %v3786_v62 = vpop.f32.mrf.mxu0  ;;  %v4139_v2 = vadd.f32 %v4099_v36, %v3979_v25 }
 0x65e   : > { %4391 = vst.msk [vmem:[%s8264_s26 + $0xa8] sm:$0xff] %vm2423_vm6, %v4359_v6  ;;  %v3942_v19 = vpop.f32.mrf.mxu1 }
 0x65f   : > { %v4240_v57 = vpop.f32.mrf.mxu3 }
 0x660   : > { %v4292_v23 = vadd.f32 %v4240_v57, %v4133_v54  ;;  %v3824_v54 = vadd.f32 %v3786_v62, %v8237_v59  ;;  %v4102_v57 = vpop.f32.mrf.mxu2 }
 0x662   : > { %v4328_v26 = vadd.f32 %v8256_v15, %v4292_v23  ;;  %v3980_v13 = vadd.f32 %v3942_v19, %v3824_v54 }
 0x664   : > { %v4360_v10 = vmax.f32 %v4328_v26, 0.0  ;;  %v3789_v23 = vpop.f32.mrf.mxu0  ;;  %v4140_v26 = vadd.f32 %v4102_v57, %v3980_v13 }
 0x666   : > { %4392 = vst.msk [vmem:[%s8264_s26 + $0xb0] sm:$0xff] %vm2423_vm6, %v4360_v10  ;;  %v3945_v12 = vpop.f32.mrf.mxu1  ;;  %v3825_v10 = vadd.f32 %v3789_v23, %v8244_v48 }
 0x667   : > { %v4243_v52 = vpop.f32.mrf.mxu3 }
 0x668   : > { %v4293_v18 = vadd.f32 %v4243_v52, %v4134_v9  ;;  %v4105_v52 = vpop.f32.mrf.mxu2  ;;  %v3981_v42 = vadd.f32 %v3945_v12, %v3825_v10 }
 0x66a   : > { %v4329_v35 = vadd.f32 %v8256_v15, %v4293_v18  ;;  %v4141_v47 = vadd.f32 %v4105_v52, %v3981_v42 }
 0x66c   : > { %v4361_v11 = vmax.f32 %v4329_v35, 0.0  ;;  %v3792_v30 = vpop.f32.mrf.mxu0 }
 0x66e   : > { %4393 = vst.msk [vmem:[%s8264_s26 + $0xb8] sm:$0xff] %vm2423_vm6, %v4361_v11  ;;  %v3948_v35 = vpop.f32.mrf.mxu1  ;;  %v3826_v11 = vadd.f32 %v3792_v30, %v8249_v3 }
 0x66f   : > { %v4246_v14 = vpop.f32.mrf.mxu3 }
 0x670   : > { %v4294_v58 = vadd.f32 %v4246_v14, %v4135_v5  ;;  %v3982_v5 = vadd.f32 %v3948_v35, %v3826_v11  ;;  %v4108_v14 = vpop.f32.mrf.mxu2 }
 0x672   : > { %v4330_v41 = vadd.f32 %v8256_v15, %v4294_v58  ;;  %v4142_v58 = vadd.f32 %v4108_v14, %v3982_v5 }
 0x674   : > { %v4362_v51 = vmax.f32 %v4330_v41, 0.0 }
 0x676   : > { %4394 = vst.msk [vmem:[%s8264_s26 + $0xc0] sm:$0xff] %vm2423_vm6, %v4362_v51 }
 0x677   : > { %v4249_v27 = vpop.f32.mrf.mxu3 }
 0x678   : > { %v4295_v0 = vadd.f32 %v4249_v27, %v4136_v40 }
 0x67a   : > { %v4331_v8 = vadd.f32 %v8256_v15, %v4295_v0 }
 0x67c   : > { %v4363_v17 = vmax.f32 %v4331_v8, 0.0 }
 0x67e   : > { %4395 = vst.msk [vmem:[%s8264_s26 + $0xc8] sm:$0xff] %vm2423_vm6, %v4363_v17 }
 0x67f   : > { %v4252_v31 = vpop.f32.mrf.mxu3 }
 0x680   : > { %v4296_v24 = vadd.f32 %v4252_v31, %v4137_v45 }
 0x682   : > { %v4332_v22 = vadd.f32 %v8256_v15, %v4296_v24 }
 0x684   : > { %v4364_v60 = vmax.f32 %v4332_v22, 0.0 }
 0x686   : > { %4396 = vst.msk [vmem:[%s8264_s26 + $0xd0] sm:$0xff] %vm2423_vm6, %v4364_v60 }
 0x687   : > { %v4255_v37 = vpop.f32.mrf.mxu3 }
 0x688   : > { %v4297_v16 = vadd.f32 %v4255_v37, %v4138_v38 }
 0x68a   : > { %v4333_v39 = vadd.f32 %v8256_v15, %v4297_v16 }
 0x68c   : > { %v4365_v28 = vmax.f32 %v4333_v39, 0.0 }
 0x68e   : > { %4397 = vst.msk [vmem:[%s8264_s26 + $0xd8] sm:$0xff] %vm2423_vm6, %v4365_v28 }
 0x68f   : > { %v4258_v6 = vpop.f32.mrf.mxu3 }
 0x690   : > { %v4298_v1 = vadd.f32 %v4258_v6, %v4139_v2 }
 0x692   : > { %v4334_v7 = vadd.f32 %v8256_v15, %v4298_v1 }
 0x694   : > { %v4366_v21 = vmax.f32 %v4334_v7, 0.0 }
 0x696   : > { %4398 = vst.msk [vmem:[%s8264_s26 + $0xe0] sm:$0xff] %vm2423_vm6, %v4366_v21 }
 0x697   : > { %v4261_v56 = vpop.f32.mrf.mxu3 }
 0x698   : > { %v4299_v9 = vadd.f32 %v4261_v56, %v4140_v26 }
 0x69a   : > { %v4335_v59 = vadd.f32 %v8256_v15, %v4299_v9 }
 0x69c   : > { %v4367_v18 = vmax.f32 %v4335_v59, 0.0 }
 0x69e   : > { %4399 = vst.msk [vmem:[%s8264_s26 + $0xe8] sm:$0xff] %vm2423_vm6, %v4367_v18 }
 0x69f   : > { %v4264_v4 = vpop.f32.mrf.mxu3 }
 0x6a0   : > { %v4300_v46 = vadd.f32 %v4264_v4, %v4141_v47 }
 0x6a2   : > { %v4336_v48 = vadd.f32 %v8256_v15, %v4300_v46 }
 0x6a4   : > { %v4368_v63 = vmax.f32 %v4336_v48, 0.0 }
 0x6a6   : > { %4400 = vst.msk [vmem:[%s8264_s26 + $0xf0] sm:$0xff] %vm2423_vm6, %v4368_v63 }
 0x6a7   : > { %v4267_v50 = vpop.f32.mrf.mxu3 }
 0x6a8   : > { %v4301_v41 = vadd.f32 %v4267_v50, %v4142_v58 }
 0x6aa   : > { %v4337_v49 = vadd.f32 %v8256_v15, %v4301_v41 }
 0x6ac   : > { %v4369_v51 = vmax.f32 %v4337_v49, 0.0 }
 0x6ae   : > { %4401 = vst.msk [vmem:[%s8264_s26 + $0xf8] sm:$0xff] %vm2423_vm6, %v4369_v51 }
 0x6af PF: > { %s16_s21 = sadd.s32 1, %s5152_s21  }
 0x6b0   : > { %p13_p4 = scmp.ge.s32.totalorder %s16_s21, 4  }
 0x6b2   :  { %15 = sbr.rel (!%p13_p4) target bundleno = 1 (0x1), region = 92 }

</bundles_post_ra>
